<compile_context>
chip_gen: v7x
topology: tpu7x:2x2x1
jax: 0.10.0
libtpu: 0.0.40
codegen_flags: <defaults>
</compile_context>

<pallas_src>
import functools
import math

import jax
import jax.numpy as jnp
from jax import lax
from jax.experimental import pallas as pl
from jax.experimental.pallas import tpu as pltpu

EPS = 1e-5  # nn.LayerNorm default eps


# ----------------------------------------------------------------------------
# In-kernel helpers
# ----------------------------------------------------------------------------
def _act(y, leaky):
    if leaky:
        return jnp.where(y >= 0, y, 0.01 * y)   # nn.LeakyReLU default slope
    return jnp.maximum(y, 0.0)                  # nn.ReLU


def _ln_1pass_full(y):
    """LayerNorm over the whole 2D block (elementwise_affine=False), one-pass stats."""
    n = y.shape[0] * y.shape[1]
    s1 = jnp.sum(y)
    s2 = jnp.sum(y * y)
    mean = s1 / n
    var = s2 / n - mean * mean
    return (y - mean) * lax.rsqrt(var + EPS)


def _ln_1pass_rows(z):
    """LayerNorm over the last dim, one-pass stats."""
    n = z.shape[-1]
    s1 = jnp.sum(z, axis=-1, keepdims=True)
    s2 = jnp.sum(z * z, axis=-1, keepdims=True)
    mean = s1 / n
    var = s2 / n - mean * mean
    return (z - mean) * lax.rsqrt(var + EPS)


def _decimate_cols(acc, stride, n_out):
    """Select columns 0, s, 2s, ... of acc (C, Lfull) -> (C, n_out).

    Chunked 0/1-selection matmuls: per 128 output columns the selection matrix
    is at most (128*stride, 128) (<= 512 KiB f32) regardless of sequence length.
    """
    if stride == 1:
        return acc[:, :n_out]
    CH = 128
    nfull, rem = n_out // CH, n_out % CH

    def sel(width, ncols):
        r = lax.broadcasted_iota(jnp.int32, (width, ncols), 0)
        c = lax.broadcasted_iota(jnp.int32, (width, ncols), 1)
        return (r == c * stride).astype(jnp.float32)

    pieces = []
    if nfull:
        w = (CH - 1) * stride + 1
        p_full = sel(w, CH)                      # built once, reused by every full chunk
        for c in range(nfull):
            st = c * CH * stride
            pieces.append(jnp.dot(acc[:, st:st + w], p_full,
                                  preferred_element_type=jnp.float32))
    if rem:
        w = (rem - 1) * stride + 1
        st = nfull * CH * stride
        pieces.append(jnp.dot(acc[:, st:st + w], sel(w, rem),
                              preferred_element_type=jnp.float32))
    return pieces[0] if len(pieces) == 1 else jnp.concatenate(pieces, axis=1)


# ----------------------------------------------------------------------------
# Fully fused TCN kernel: conv stack + MLP head, one batch sample per grid step
# ----------------------------------------------------------------------------
def fused_tcn_kernel(x_ref, *refs, conv_meta, leaky, final_len):
    scr = (refs[-2], refs[-1])        # ping-pong activation scratch, (emb, Lmax) f32
    o_ref = refs[-3]
    prefs = refs[:-3]

    pi = 0
    src = None
    for li, (K, stride, Lfull, Lout) in enumerate(conv_meta):
        w_ref = prefs[pi]             # (Cout, K*Cin)  bf16, taps stacked along contraction
        b_ref = prefs[pi + 1]         # (Cout, 1)      f32
        pi += 2

        # Tap-stacked operand: one matmul per layer, contraction depth K*Cin.
        if li == 0:
            taps = [x_ref[0][:, k:k + Lfull] for k in range(K)]
        else:
            taps = [src[:, k:k + Lfull] for k in range(K)]
        s_op = (taps[0] if K == 1
                else jnp.concatenate(taps, axis=0)).astype(jnp.bfloat16)

        acc = jnp.dot(w_ref[...], s_op, preferred_element_type=jnp.float32)   # (Cout, Lfull)
        y = _decimate_cols(acc, stride, Lout) + b_ref[...]                    # (Cout, Lout)
        h = _act(_ln_1pass_full(y), leaky)

        dst = scr[li % 2]
        dst[:, :Lout] = h
        src = dst

    # ---------------- MLP head ----------------
    w1_ref, b1_ref, w2_ref, b2_ref, w3_ref, b3_ref = prefs[pi:pi + 6]
    hl = src[:, :final_len]                            # (emb, final_len) f32
    emb = hl.shape[0]
    # Flatten(start_dim=1) on NCW is channel-major: concat the emb rows along lanes.
    rows = [hl[c:c + 1, :] for c in range(emb)]
    flat = (rows[0] if emb == 1
            else jnp.concatenate(rows, axis=1)).astype(jnp.bfloat16)   # (1, emb*final_len)

    z = jnp.dot(flat, w1_ref[...], preferred_element_type=jnp.float32) + b1_ref[...]
    z = _act(_ln_1pass_rows(z), leaky)
    z = jnp.dot(z.astype(jnp.bfloat16), w2_ref[...],
                preferred_element_type=jnp.float32) + b2_ref[...]
    z = _act(_ln_1pass_rows(z), leaky)
    z = jnp.dot(z.astype(jnp.bfloat16), w3_ref[...],
                preferred_element_type=jnp.float32) + b3_ref[...]
    o_ref[0] = z                                        # (1, out_dim)


def tcn_forward(x, conv_layer_params, conv_weights, mlp_weights, leaky):
    B, Cin, L = x.shape
    emb_dim = conv_weights[-1][0].shape[0]
    w1, b1, w2, b2, w3, b3 = mlp_weights
    out_dim = w3.shape[1]

    conv_meta = []
    args = []
    in_specs = [pl.BlockSpec((1, Cin, L), lambda b: (b, 0, 0))]

    Lin = L
    for p, (w, bias) in zip(conv_layer_params, conv_weights):
        K, s = p['kernel_size'], p['stride']
        Lfull = Lin - K + 1                    # stride-1 output length
        Lout = (Lin - K) // s + 1              # strided output length
        conv_meta.append((K, s, Lfull, Lout))
        cout, cin = w.shape[0], w.shape[1]
        # (Cout, Cin, K) -> (Cout, K*Cin): column k*Cin + ci holds W[co, ci, k].
        w_stacked = jnp.transpose(w, (0, 2, 1)).reshape(cout, K * cin).astype(jnp.bfloat16)
        bk = bias.reshape(-1, 1).astype(jnp.float32)
        args += [w_stacked, bk]
        in_specs += [pl.BlockSpec(w_stacked.shape, lambda b: (0, 0)),
                     pl.BlockSpec(bk.shape, lambda b: (0, 0))]
        Lin = Lout
    final_len = Lin

    mlp_args = [w1.astype(jnp.bfloat16), b1.astype(jnp.float32),
                w2.astype(jnp.bfloat16), b2.astype(jnp.float32),
                w3.astype(jnp.bfloat16), b3.astype(jnp.float32)]
    args += mlp_args
    for a in mlp_args:
        in_specs.append(pl.BlockSpec(a.shape, lambda b: (0, 0)))

    Lmax = conv_meta[0][3]   # layer-1 output length == longest stored activation

    out = pl.pallas_call(
        functools.partial(fused_tcn_kernel, conv_meta=tuple(conv_meta),
                          leaky=leaky, final_len=final_len),
        out_shape=jax.ShapeDtypeStruct((B, 1, out_dim), jnp.float32),
        grid=(B,),
        in_specs=in_specs,
        out_specs=pl.BlockSpec((1, 1, out_dim), lambda b: (b, 0, 0)),
        scratch_shapes=[pltpu.VMEM((emb_dim, Lmax), jnp.float32),
                        pltpu.VMEM((emb_dim, Lmax), jnp.float32)],
        compiler_params=pltpu.CompilerParams(
            dimension_semantics=("parallel",),
            vmem_limit_bytes=32 * 1024 * 1024),
    )(x, *args)
    return out.reshape(B, out_dim)


# ----------------------------------------------------------------------------
# Parameter construction (deterministic, matches the module's __init__ shapes)
# ----------------------------------------------------------------------------
def calc_output_length(input_length, kernel_size, stride=1, padding=0, dilation=1):
    return math.floor((input_length + 2 * padding - dilation * (kernel_size - 1) - 1)
                      / stride + 1)


def kaiming_normal(key, shape, fan_in):
    # kaiming_normal_(a=0.01, mode='fan_in', nonlinearity='relu') -> gain=sqrt(2)
    std = math.sqrt(2.0) / math.sqrt(fan_in)
    return std * jax.random.normal(key, shape, dtype=jnp.float32)


def build_params(key, config):
    net = config['network']
    obs_dim, emb_dim, out_dim = net['obs_dim'], net['emb_dim'], net['out_dim']
    L = config['simulation']['output_sequence_length']

    conv_layer_params = (
        dict(in_channels=obs_dim, out_channels=emb_dim, kernel_size=1, stride=1),
        dict(in_channels=emb_dim, out_channels=emb_dim, kernel_size=10, stride=1),
        dict(in_channels=emb_dim, out_channels=emb_dim, kernel_size=10, stride=2),
        dict(in_channels=emb_dim, out_channels=emb_dim, kernel_size=10, stride=4),
        dict(in_channels=emb_dim, out_channels=emb_dim, kernel_size=10, stride=8),
        dict(in_channels=emb_dim, out_channels=emb_dim, kernel_size=10, stride=1),
    )

    conv_weights = []
    seq_len = L
    for p in conv_layer_params:
        key, k1 = jax.random.split(key)
        cin, cout, ks = p['in_channels'], p['out_channels'], p['kernel_size']
        w = kaiming_normal(k1, (cout, cin, ks), fan_in=cin * ks)
        b = jnp.zeros((cout,), jnp.float32)
        conv_weights.append((w, b))
        seq_len = calc_output_length(seq_len, ks, p['stride'])

    d_in = seq_len * emb_dim
    dims = [(d_in, 8 * emb_dim), (8 * emb_dim, 4 * emb_dim), (4 * emb_dim, out_dim)]
    mlp_weights = []
    for din, dout in dims:
        key, k1 = jax.random.split(key)
        w = kaiming_normal(k1, (din, dout), fan_in=din)   # stored (in, out)
        b = jnp.zeros((1, dout), jnp.float32)
        mlp_weights.extend([w, b])

    return conv_layer_params, conv_weights, tuple(mlp_weights), seq_len


# ----------------------------------------------------------------------------
# Pure-JAX reference (f32) for the correctness check
# ----------------------------------------------------------------------------
def tcn_reference(x, conv_layer_params, conv_weights, mlp_weights, leaky):
    def act(y):
        return jnp.where(y >= 0, y, 0.01 * y) if leaky else jnp.maximum(y, 0.0)

    for p, (w, b) in zip(conv_layer_params, conv_weights):
        y = lax.conv_general_dilated(
            x, w, window_strides=(p['stride'],), padding='VALID',
            dimension_numbers=('NCH', 'OIH', 'NCH')) + b[None, :, None]
        m = jnp.mean(y, axis=(1, 2), keepdims=True)
        v = jnp.mean((y - m) ** 2, axis=(1, 2), keepdims=True)
        x = act((y - m) * lax.rsqrt(v + EPS))
    flat = x.reshape(x.shape[0], -1)
    w1, b1, w2, b2, w3, b3 = mlp_weights
    h = flat @ w1 + b1
    m = jnp.mean(h, -1, keepdims=True)
    v = jnp.mean((h - m) ** 2, -1, keepdims=True)
    h = act((h - m) * lax.rsqrt(v + EPS))
    h = h @ w2 + b2
    m = jnp.mean(h, -1, keepdims=True)
    v = jnp.mean((h - m) ** 2, -1, keepdims=True)
    h = act((h - m) * lax.rsqrt(v + EPS))
    return h @ w3 + b3


# ----------------------------------------------------------------------------
if __name__ == "__main__":
    # Small but valid config (original uses sequence_length=7000; 700 keeps every
    # conv output length >= 1 at small scale).
    config = {
        'network': {
            'obs_dim': 4,
            'emb_dim': 8,
            'out_dim': 3,
            'activation': 'relu',
            'elementwise_affine_transformation': False,
            'init_weights_normal': True,
        },
        'simulation': {'output_sequence_length': 700},
    }
    leaky = config['network']['activation'] == 'leaky_relu'

    key = jax.random.PRNGKey(0)
    key, pkey, xkey = jax.random.split(key, 3)
    conv_layer_params, conv_weights, mlp_weights, final_len = build_params(pkey, config)

    B = 2
    x = jax.random.normal(
        xkey, (B, config['network']['obs_dim'],
               config['simulation']['output_sequence_length']), dtype=jnp.float32)

    out = tcn_forward(x, conv_layer_params, conv_weights, mlp_weights, leaky)
    out = jax.block_until_ready(out)

    ref = tcn_reference(x, conv_layer_params, conv_weights, mlp_weights, leaky)
    assert out.shape == (B, config['network']['out_dim'])
    err = jnp.max(jnp.abs(out - ref))
    # bf16 MXU operands (f32 accumulation / f32 LayerNorm) vs an all-f32 reference
    # -> loosened tolerance, as recommended by the perf review.
    assert jnp.allclose(out, ref, rtol=1e-1, atol=1e-1), f"mismatch: max abs err {err}"

    print("KERNEL_OK")
</pallas_src>

<mosaic_0001>
module attributes {stable_mosaic.version = 11 : i64} {
  func.func @fused_tcn_kernel(%arg0: i32, %arg1: memref<1x4x700xf32, #tpu.memory_space<vmem>>, %arg2: memref<8x4xbf16, #tpu.memory_space<vmem>>, %arg3: memref<8x1xf32, #tpu.memory_space<vmem>>, %arg4: memref<8x80xbf16, #tpu.memory_space<vmem>>, %arg5: memref<8x1xf32, #tpu.memory_space<vmem>>, %arg6: memref<8x80xbf16, #tpu.memory_space<vmem>>, %arg7: memref<8x1xf32, #tpu.memory_space<vmem>>, %arg8: memref<8x80xbf16, #tpu.memory_space<vmem>>, %arg9: memref<8x1xf32, #tpu.memory_space<vmem>>, %arg10: memref<8x80xbf16, #tpu.memory_space<vmem>>, %arg11: memref<8x1xf32, #tpu.memory_space<vmem>>, %arg12: memref<8x80xbf16, #tpu.memory_space<vmem>>, %arg13: memref<8x1xf32, #tpu.memory_space<vmem>>, %arg14: memref<8x64xbf16, #tpu.memory_space<vmem>>, %arg15: memref<1x64xf32, #tpu.memory_space<vmem>>, %arg16: memref<64x32xbf16, #tpu.memory_space<vmem>>, %arg17: memref<1x32xf32, #tpu.memory_space<vmem>>, %arg18: memref<32x3xbf16, #tpu.memory_space<vmem>>, %arg19: memref<1x3xf32, #tpu.memory_space<vmem>>, %arg20: memref<1x1x3xf32, #tpu.memory_space<vmem>>, %arg21: memref<8x700xf32, #tpu.memory_space<vmem>>, %arg22: memref<8x700xf32, #tpu.memory_space<vmem>>) attributes {dimension_semantics = [#tpu.dimension_semantics<parallel>], iteration_bounds = array<i64: 2>, scalar_prefetch = 0 : i64, scratch_operands = 2 : i64, tpu.core_type = #tpu.core_type<tc>, window_params = [{transform_indices = @transform_0, window_bounds = array<i64: 1, 4, 700>}, {pipeline_mode = #tpu.pipeline_mode<synchronous>, transform_indices = @transform_1, window_bounds = array<i64: 8, 4>}, {pipeline_mode = #tpu.pipeline_mode<synchronous>, transform_indices = @transform_2, window_bounds = array<i64: 8, 1>}, {pipeline_mode = #tpu.pipeline_mode<synchronous>, transform_indices = @transform_3, window_bounds = array<i64: 8, 80>}, {pipeline_mode = #tpu.pipeline_mode<synchronous>, transform_indices = @transform_4, window_bounds = array<i64: 8, 1>}, {pipeline_mode = #tpu.pipeline_mode<synchronous>, transform_indices = @transform_5, window_bounds = array<i64: 8, 80>}, {pipeline_mode = #tpu.pipeline_mode<synchronous>, transform_indices = @transform_6, window_bounds = array<i64: 8, 1>}, {pipeline_mode = #tpu.pipeline_mode<synchronous>, transform_indices = @transform_7, window_bounds = array<i64: 8, 80>}, {pipeline_mode = #tpu.pipeline_mode<synchronous>, transform_indices = @transform_8, window_bounds = array<i64: 8, 1>}, {pipeline_mode = #tpu.pipeline_mode<synchronous>, transform_indices = @transform_9, window_bounds = array<i64: 8, 80>}, {pipeline_mode = #tpu.pipeline_mode<synchronous>, transform_indices = @transform_10, window_bounds = array<i64: 8, 1>}, {pipeline_mode = #tpu.pipeline_mode<synchronous>, transform_indices = @transform_11, window_bounds = array<i64: 8, 80>}, {pipeline_mode = #tpu.pipeline_mode<synchronous>, transform_indices = @transform_12, window_bounds = array<i64: 8, 1>}, {pipeline_mode = #tpu.pipeline_mode<synchronous>, transform_indices = @transform_13, window_bounds = array<i64: 8, 64>}, {pipeline_mode = #tpu.pipeline_mode<synchronous>, transform_indices = @transform_14, window_bounds = array<i64: 1, 64>}, {pipeline_mode = #tpu.pipeline_mode<synchronous>, transform_indices = @transform_15, window_bounds = array<i64: 64, 32>}, {pipeline_mode = #tpu.pipeline_mode<synchronous>, transform_indices = @transform_16, window_bounds = array<i64: 1, 32>}, {pipeline_mode = #tpu.pipeline_mode<synchronous>, transform_indices = @transform_17, window_bounds = array<i64: 32, 3>}, {pipeline_mode = #tpu.pipeline_mode<synchronous>, transform_indices = @transform_18, window_bounds = array<i64: 1, 3>}, {transform_indices = @transform_19, window_bounds = array<i64: 1, 1, 3>}]} {
    %c0 = arith.constant 0 : index
    %c0_0 = arith.constant 0 : index
    %c0_1 = arith.constant 0 : index
    %0 = vector.load %arg1[%c0, %c0_0, %c0_1] : memref<1x4x700xf32, #tpu.memory_space<vmem>>, vector<1x4x700xf32>
    %1 = vector.shape_cast %0 : vector<1x4x700xf32> to vector<4x700xf32>
    %2 = arith.truncf %1 : vector<4x700xf32> to vector<4x700xbf16>
    %c0_2 = arith.constant 0 : index
    %c0_3 = arith.constant 0 : index
    %3 = vector.load %arg2[%c0_2, %c0_3] : memref<8x4xbf16, #tpu.memory_space<vmem>>, vector<8x4xbf16>
    %cst = arith.constant dense<0.000000e+00> : vector<8x700xf32>
    %4 = tpu.matmul %3, %2, %cst {dimension_numbers = #tpu.dot_dimension_numbers<[1], [0], [0], [1], [0, 0, 1, 1], [], []>} : vector<8x4xbf16>, vector<4x700xbf16>, vector<8x700xf32> -> vector<8x700xf32>
    %c0_4 = arith.constant 0 : index
    %c0_5 = arith.constant 0 : index
    %5 = vector.load %arg3[%c0_4, %c0_5] : memref<8x1xf32, #tpu.memory_space<vmem>>, vector<8x1xf32>
    %6 = vector.broadcast %5 : vector<8x1xf32> to vector<8x700xf32>
    %7 = arith.addf %4, %6 : vector<8x700xf32>
    %8 = vector.shape_cast %7 : vector<8x700xf32> to vector<1x8x700xf32>
    %cst_6 = arith.constant dense<0.000000e+00> : vector<1xf32>
    %9 = vector.multi_reduction <add>, %8, %cst_6 [1, 2] : vector<1x8x700xf32> to vector<1xf32>
    %10 = vector.shape_cast %9 : vector<1xf32> to vector<1x1x1xf32>
    %11 = vector.extract %10[0, 0, 0] : f32 from vector<1x1x1xf32>
    %12 = arith.mulf %7, %7 : vector<8x700xf32>
    %13 = vector.shape_cast %12 : vector<8x700xf32> to vector<1x8x700xf32>
    %cst_7 = arith.constant dense<0.000000e+00> : vector<1xf32>
    %14 = vector.multi_reduction <add>, %13, %cst_7 [1, 2] : vector<1x8x700xf32> to vector<1xf32>
    %15 = vector.shape_cast %14 : vector<1xf32> to vector<1x1x1xf32>
    %16 = vector.extract %15[0, 0, 0] : f32 from vector<1x1x1xf32>
    %cst_8 = arith.constant 5.600000e+03 : f32
    %17 = arith.divf %11, %cst_8 : f32
    %cst_9 = arith.constant 5.600000e+03 : f32
    %18 = arith.divf %16, %cst_9 : f32
    %19 = arith.mulf %17, %17 : f32
    %20 = arith.subf %18, %19 : f32
    %21 = vector.broadcast %17 : f32 to vector<8x700xf32>
    %22 = arith.subf %7, %21 : vector<8x700xf32>
    %cst_10 = arith.constant 9.99999974E-6 : f32
    %23 = arith.addf %20, %cst_10 : f32
    %24 = math.rsqrt %23 : f32
    %25 = vector.broadcast %24 : f32 to vector<8x700xf32>
    %26 = arith.mulf %22, %25 : vector<8x700xf32>
    %cst_11 = arith.constant 0.000000e+00 : f32
    %27 = vector.broadcast %cst_11 : f32 to vector<8x700xf32>
    %28 = arith.maximumf %26, %27 : vector<8x700xf32>
    %c0_12 = arith.constant 0 : index
    %c0_13 = arith.constant 0 : index
    %29 = vector.load %arg21[%c0_12, %c0_13] : memref<8x700xf32, #tpu.memory_space<vmem>>, vector<8x700xf32>
    tpu.vector_store %arg21[%c0_12, %c0_13], %28 {strides = array<i32>} : memref<8x700xf32, #tpu.memory_space<vmem>>, vector<8x700xf32>,
    %c0_14 = arith.constant 0 : index
    %c0_15 = arith.constant 0 : index
    %30 = vector.load %arg21[%c0_14, %c0_15] : memref<8x700xf32, #tpu.memory_space<vmem>>, vector<8x691xf32>
    %c0_16 = arith.constant 0 : index
    %c1 = arith.constant 1 : index
    %31 = vector.load %arg21[%c0_16, %c1] : memref<8x700xf32, #tpu.memory_space<vmem>>, vector<8x691xf32>
    %c0_17 = arith.constant 0 : index
    %c2 = arith.constant 2 : index
    %32 = vector.load %arg21[%c0_17, %c2] : memref<8x700xf32, #tpu.memory_space<vmem>>, vector<8x691xf32>
    %c0_18 = arith.constant 0 : index
    %c3 = arith.constant 3 : index
    %33 = vector.load %arg21[%c0_18, %c3] : memref<8x700xf32, #tpu.memory_space<vmem>>, vector<8x691xf32>
    %c0_19 = arith.constant 0 : index
    %c4 = arith.constant 4 : index
    %34 = vector.load %arg21[%c0_19, %c4] : memref<8x700xf32, #tpu.memory_space<vmem>>, vector<8x691xf32>
    %c0_20 = arith.constant 0 : index
    %c5 = arith.constant 5 : index
    %35 = vector.load %arg21[%c0_20, %c5] : memref<8x700xf32, #tpu.memory_space<vmem>>, vector<8x691xf32>
    %c0_21 = arith.constant 0 : index
    %c6 = arith.constant 6 : index
    %36 = vector.load %arg21[%c0_21, %c6] : memref<8x700xf32, #tpu.memory_space<vmem>>, vector<8x691xf32>
    %c0_22 = arith.constant 0 : index
    %c7 = arith.constant 7 : index
    %37 = vector.load %arg21[%c0_22, %c7] : memref<8x700xf32, #tpu.memory_space<vmem>>, vector<8x691xf32>
    %c0_23 = arith.constant 0 : index
    %c8 = arith.constant 8 : index
    %38 = vector.load %arg21[%c0_23, %c8] : memref<8x700xf32, #tpu.memory_space<vmem>>, vector<8x691xf32>
    %c0_24 = arith.constant 0 : index
    %c9 = arith.constant 9 : index
    %39 = vector.load %arg21[%c0_24, %c9] : memref<8x700xf32, #tpu.memory_space<vmem>>, vector<8x691xf32>
    %40 = tpu.concatenate %30, %31, %32, %33, %34, %35, %36, %37, %38, %39 in 0 : vector<8x691xf32>, vector<8x691xf32>, vector<8x691xf32>, vector<8x691xf32>, vector<8x691xf32>, vector<8x691xf32>, vector<8x691xf32>, vector<8x691xf32>, vector<8x691xf32>, vector<8x691xf32> -> vector<80x691xf32>
    %41 = arith.truncf %40 : vector<80x691xf32> to vector<80x691xbf16>
    %c0_25 = arith.constant 0 : index
    %c0_26 = arith.constant 0 : index
    %42 = vector.load %arg4[%c0_25, %c0_26] : memref<8x80xbf16, #tpu.memory_space<vmem>>, vector<8x80xbf16>
    %cst_27 = arith.constant dense<0.000000e+00> : vector<8x691xf32>
    %43 = tpu.matmul %42, %41, %cst_27 {dimension_numbers = #tpu.dot_dimension_numbers<[1], [0], [0], [1], [0, 0, 1, 1], [], []>} : vector<8x80xbf16>, vector<80x691xbf16>, vector<8x691xf32> -> vector<8x691xf32>
    %c0_28 = arith.constant 0 : index
    %c0_29 = arith.constant 0 : index
    %44 = vector.load %arg5[%c0_28, %c0_29] : memref<8x1xf32, #tpu.memory_space<vmem>>, vector<8x1xf32>
    %45 = vector.broadcast %44 : vector<8x1xf32> to vector<8x691xf32>
    %46 = arith.addf %43, %45 : vector<8x691xf32>
    %47 = vector.shape_cast %46 : vector<8x691xf32> to vector<1x8x691xf32>
    %cst_30 = arith.constant dense<0.000000e+00> : vector<1xf32>
    %48 = vector.multi_reduction <add>, %47, %cst_30 [1, 2] : vector<1x8x691xf32> to vector<1xf32>
    %49 = vector.shape_cast %48 : vector<1xf32> to vector<1x1x1xf32>
    %50 = vector.extract %49[0, 0, 0] : f32 from vector<1x1x1xf32>
    %51 = arith.mulf %46, %46 : vector<8x691xf32>
    %52 = vector.shape_cast %51 : vector<8x691xf32> to vector<1x8x691xf32>
    %cst_31 = arith.constant dense<0.000000e+00> : vector<1xf32>
    %53 = vector.multi_reduction <add>, %52, %cst_31 [1, 2] : vector<1x8x691xf32> to vector<1xf32>
    %54 = vector.shape_cast %53 : vector<1xf32> to vector<1x1x1xf32>
    %55 = vector.extract %54[0, 0, 0] : f32 from vector<1x1x1xf32>
    %cst_32 = arith.constant 5.528000e+03 : f32
    %56 = arith.divf %50, %cst_32 : f32
    %cst_33 = arith.constant 5.528000e+03 : f32
    %57 = arith.divf %55, %cst_33 : f32
    %58 = arith.mulf %56, %56 : f32
    %59 = arith.subf %57, %58 : f32
    %60 = vector.broadcast %56 : f32 to vector<8x691xf32>
    %61 = arith.subf %46, %60 : vector<8x691xf32>
    %cst_34 = arith.constant 9.99999974E-6 : f32
    %62 = arith.addf %59, %cst_34 : f32
    %63 = math.rsqrt %62 : f32
    %64 = vector.broadcast %63 : f32 to vector<8x691xf32>
    %65 = arith.mulf %61, %64 : vector<8x691xf32>
    %cst_35 = arith.constant 0.000000e+00 : f32
    %66 = vector.broadcast %cst_35 : f32 to vector<8x691xf32>
    %67 = arith.maximumf %65, %66 : vector<8x691xf32>
    %c0_36 = arith.constant 0 : index
    %c0_37 = arith.constant 0 : index
    %68 = vector.load %arg22[%c0_36, %c0_37] : memref<8x700xf32, #tpu.memory_space<vmem>>, vector<8x691xf32>
    tpu.vector_store %arg22[%c0_36, %c0_37], %67 {strides = array<i32>} : memref<8x700xf32, #tpu.memory_space<vmem>>, vector<8x691xf32>,
    %c0_38 = arith.constant 0 : index
    %c0_39 = arith.constant 0 : index
    %69 = vector.load %arg22[%c0_38, %c0_39] : memref<8x700xf32, #tpu.memory_space<vmem>>, vector<8x682xf32>
    %c0_40 = arith.constant 0 : index
    %c1_41 = arith.constant 1 : index
    %70 = vector.load %arg22[%c0_40, %c1_41] : memref<8x700xf32, #tpu.memory_space<vmem>>, vector<8x682xf32>
    %c0_42 = arith.constant 0 : index
    %c2_43 = arith.constant 2 : index
    %71 = vector.load %arg22[%c0_42, %c2_43] : memref<8x700xf32, #tpu.memory_space<vmem>>, vector<8x682xf32>
    %c0_44 = arith.constant 0 : index
    %c3_45 = arith.constant 3 : index
    %72 = vector.load %arg22[%c0_44, %c3_45] : memref<8x700xf32, #tpu.memory_space<vmem>>, vector<8x682xf32>
    %c0_46 = arith.constant 0 : index
    %c4_47 = arith.constant 4 : index
    %73 = vector.load %arg22[%c0_46, %c4_47] : memref<8x700xf32, #tpu.memory_space<vmem>>, vector<8x682xf32>
    %c0_48 = arith.constant 0 : index
    %c5_49 = arith.constant 5 : index
    %74 = vector.load %arg22[%c0_48, %c5_49] : memref<8x700xf32, #tpu.memory_space<vmem>>, vector<8x682xf32>
    %c0_50 = arith.constant 0 : index
    %c6_51 = arith.constant 6 : index
    %75 = vector.load %arg22[%c0_50, %c6_51] : memref<8x700xf32, #tpu.memory_space<vmem>>, vector<8x682xf32>
    %c0_52 = arith.constant 0 : index
    %c7_53 = arith.constant 7 : index
    %76 = vector.load %arg22[%c0_52, %c7_53] : memref<8x700xf32, #tpu.memory_space<vmem>>, vector<8x682xf32>
    %c0_54 = arith.constant 0 : index
    %c8_55 = arith.constant 8 : index
    %77 = vector.load %arg22[%c0_54, %c8_55] : memref<8x700xf32, #tpu.memory_space<vmem>>, vector<8x682xf32>
    %c0_56 = arith.constant 0 : index
    %c9_57 = arith.constant 9 : index
    %78 = vector.load %arg22[%c0_56, %c9_57] : memref<8x700xf32, #tpu.memory_space<vmem>>, vector<8x682xf32>
    %79 = tpu.concatenate %69, %70, %71, %72, %73, %74, %75, %76, %77, %78 in 0 : vector<8x682xf32>, vector<8x682xf32>, vector<8x682xf32>, vector<8x682xf32>, vector<8x682xf32>, vector<8x682xf32>, vector<8x682xf32>, vector<8x682xf32>, vector<8x682xf32>, vector<8x682xf32> -> vector<80x682xf32>
    %80 = arith.truncf %79 : vector<80x682xf32> to vector<80x682xbf16>
    %c0_58 = arith.constant 0 : index
    %c0_59 = arith.constant 0 : index
    %81 = vector.load %arg6[%c0_58, %c0_59] : memref<8x80xbf16, #tpu.memory_space<vmem>>, vector<8x80xbf16>
    %cst_60 = arith.constant dense<0.000000e+00> : vector<8x682xf32>
    %82 = tpu.matmul %81, %80, %cst_60 {dimension_numbers = #tpu.dot_dimension_numbers<[1], [0], [0], [1], [0, 0, 1, 1], [], []>} : vector<8x80xbf16>, vector<80x682xbf16>, vector<8x682xf32> -> vector<8x682xf32>
    %83 = tpu.iota {dimensions = array<i32: 0>} : vector<255x128xi32>
    %84 = tpu.iota {dimensions = array<i32: 1>} : vector<255x128xi32>
    %c2_i32 = arith.constant 2 : i32
    %85 = vector.broadcast %c2_i32 : i32 to vector<255x128xi32>
    %86 = arith.muli %84, %85 : vector<255x128xi32>
    %87 = arith.cmpi eq, %83, %86 : vector<255x128xi32>
    %88 = arith.extui %87 : vector<255x128xi1> to vector<255x128xi32>
    %89 = arith.sitofp %88 : vector<255x128xi32> to vector<255x128xf32>
    %90 = vector.extract_strided_slice %82 {offsets = [0, 0], sizes = [8, 255], strides = [1, 1]} : vector<8x682xf32> to vector<8x255xf32>
    %cst_61 = arith.constant dense<0.000000e+00> : vector<8x128xf32>
    %91 = tpu.matmul %90, %89, %cst_61 {dimension_numbers = #tpu.dot_dimension_numbers<[1], [0], [0], [1], [0, 0, 1, 1], [], []>} : vector<8x255xf32>, vector<255x128xf32>, vector<8x128xf32> -> vector<8x128xf32>
    %92 = vector.extract_strided_slice %82 {offsets = [0, 256], sizes = [8, 255], strides = [1, 1]} : vector<8x682xf32> to vector<8x255xf32>
    %cst_62 = arith.constant dense<0.000000e+00> : vector<8x128xf32>
    %93 = tpu.matmul %92, %89, %cst_62 {dimension_numbers = #tpu.dot_dimension_numbers<[1], [0], [0], [1], [0, 0, 1, 1], [], []>} : vector<8x255xf32>, vector<255x128xf32>, vector<8x128xf32> -> vector<8x128xf32>
    %94 = vector.extract_strided_slice %82 {offsets = [0, 512], sizes = [8, 169], strides = [1, 1]} : vector<8x682xf32> to vector<8x169xf32>
    %95 = tpu.iota {dimensions = array<i32: 0>} : vector<169x85xi32>
    %96 = tpu.iota {dimensions = array<i32: 1>} : vector<169x85xi32>
    %c2_i32_63 = arith.constant 2 : i32
    %97 = vector.broadcast %c2_i32_63 : i32 to vector<169x85xi32>
    %98 = arith.muli %96, %97 : vector<169x85xi32>
    %99 = arith.cmpi eq, %95, %98 : vector<169x85xi32>
    %100 = arith.extui %99 : vector<169x85xi1> to vector<169x85xi32>
    %101 = arith.sitofp %100 : vector<169x85xi32> to vector<169x85xf32>
    %cst_64 = arith.constant dense<0.000000e+00> : vector<8x85xf32>
    %102 = tpu.matmul %94, %101, %cst_64 {dimension_numbers = #tpu.dot_dimension_numbers<[1], [0], [0], [1], [0, 0, 1, 1], [], []>} : vector<8x169xf32>, vector<169x85xf32>, vector<8x85xf32> -> vector<8x85xf32>
    %103 = tpu.concatenate %91, %93, %102 in 1 : vector<8x128xf32>, vector<8x128xf32>, vector<8x85xf32> -> vector<8x341xf32>
    %c0_65 = arith.constant 0 : index
    %c0_66 = arith.constant 0 : index
    %104 = vector.load %arg7[%c0_65, %c0_66] : memref<8x1xf32, #tpu.memory_space<vmem>>, vector<8x1xf32>
    %105 = vector.broadcast %104 : vector<8x1xf32> to vector<8x341xf32>
    %106 = arith.addf %103, %105 : vector<8x341xf32>
    %107 = vector.shape_cast %106 : vector<8x341xf32> to vector<1x8x341xf32>
    %cst_67 = arith.constant dense<0.000000e+00> : vector<1xf32>
    %108 = vector.multi_reduction <add>, %107, %cst_67 [1, 2] : vector<1x8x341xf32> to vector<1xf32>
    %109 = vector.shape_cast %108 : vector<1xf32> to vector<1x1x1xf32>
    %110 = vector.extract %109[0, 0, 0] : f32 from vector<1x1x1xf32>
    %111 = arith.mulf %106, %106 : vector<8x341xf32>
    %112 = vector.shape_cast %111 : vector<8x341xf32> to vector<1x8x341xf32>
    %cst_68 = arith.constant dense<0.000000e+00> : vector<1xf32>
    %113 = vector.multi_reduction <add>, %112, %cst_68 [1, 2] : vector<1x8x341xf32> to vector<1xf32>
    %114 = vector.shape_cast %113 : vector<1xf32> to vector<1x1x1xf32>
    %115 = vector.extract %114[0, 0, 0] : f32 from vector<1x1x1xf32>
    %cst_69 = arith.constant 2.728000e+03 : f32
    %116 = arith.divf %110, %cst_69 : f32
    %cst_70 = arith.constant 2.728000e+03 : f32
    %117 = arith.divf %115, %cst_70 : f32
    %118 = arith.mulf %116, %116 : f32
    %119 = arith.subf %117, %118 : f32
    %120 = vector.broadcast %116 : f32 to vector<8x341xf32>
    %121 = arith.subf %106, %120 : vector<8x341xf32>
    %cst_71 = arith.constant 9.99999974E-6 : f32
    %122 = arith.addf %119, %cst_71 : f32
    %123 = math.rsqrt %122 : f32
    %124 = vector.broadcast %123 : f32 to vector<8x341xf32>
    %125 = arith.mulf %121, %124 : vector<8x341xf32>
    %cst_72 = arith.constant 0.000000e+00 : f32
    %126 = vector.broadcast %cst_72 : f32 to vector<8x341xf32>
    %127 = arith.maximumf %125, %126 : vector<8x341xf32>
    %c0_73 = arith.constant 0 : index
    %c0_74 = arith.constant 0 : index
    %128 = vector.load %arg21[%c0_73, %c0_74] : memref<8x700xf32, #tpu.memory_space<vmem>>, vector<8x341xf32>
    tpu.vector_store %arg21[%c0_73, %c0_74], %127 {strides = array<i32>} : memref<8x700xf32, #tpu.memory_space<vmem>>, vector<8x341xf32>,
    %c0_75 = arith.constant 0 : index
    %c0_76 = arith.constant 0 : index
    %129 = vector.load %arg21[%c0_75, %c0_76] : memref<8x700xf32, #tpu.memory_space<vmem>>, vector<8x332xf32>
    %c0_77 = arith.constant 0 : index
    %c1_78 = arith.constant 1 : index
    %130 = vector.load %arg21[%c0_77, %c1_78] : memref<8x700xf32, #tpu.memory_space<vmem>>, vector<8x332xf32>
    %c0_79 = arith.constant 0 : index
    %c2_80 = arith.constant 2 : index
    %131 = vector.load %arg21[%c0_79, %c2_80] : memref<8x700xf32, #tpu.memory_space<vmem>>, vector<8x332xf32>
    %c0_81 = arith.constant 0 : index
    %c3_82 = arith.constant 3 : index
    %132 = vector.load %arg21[%c0_81, %c3_82] : memref<8x700xf32, #tpu.memory_space<vmem>>, vector<8x332xf32>
    %c0_83 = arith.constant 0 : index
    %c4_84 = arith.constant 4 : index
    %133 = vector.load %arg21[%c0_83, %c4_84] : memref<8x700xf32, #tpu.memory_space<vmem>>, vector<8x332xf32>
    %c0_85 = arith.constant 0 : index
    %c5_86 = arith.constant 5 : index
    %134 = vector.load %arg21[%c0_85, %c5_86] : memref<8x700xf32, #tpu.memory_space<vmem>>, vector<8x332xf32>
    %c0_87 = arith.constant 0 : index
    %c6_88 = arith.constant 6 : index
    %135 = vector.load %arg21[%c0_87, %c6_88] : memref<8x700xf32, #tpu.memory_space<vmem>>, vector<8x332xf32>
    %c0_89 = arith.constant 0 : index
    %c7_90 = arith.constant 7 : index
    %136 = vector.load %arg21[%c0_89, %c7_90] : memref<8x700xf32, #tpu.memory_space<vmem>>, vector<8x332xf32>
    %c0_91 = arith.constant 0 : index
    %c8_92 = arith.constant 8 : index
    %137 = vector.load %arg21[%c0_91, %c8_92] : memref<8x700xf32, #tpu.memory_space<vmem>>, vector<8x332xf32>
    %c0_93 = arith.constant 0 : index
    %c9_94 = arith.constant 9 : index
    %138 = vector.load %arg21[%c0_93, %c9_94] : memref<8x700xf32, #tpu.memory_space<vmem>>, vector<8x332xf32>
    %139 = tpu.concatenate %129, %130, %131, %132, %133, %134, %135, %136, %137, %138 in 0 : vector<8x332xf32>, vector<8x332xf32>, vector<8x332xf32>, vector<8x332xf32>, vector<8x332xf32>, vector<8x332xf32>, vector<8x332xf32>, vector<8x332xf32>, vector<8x332xf32>, vector<8x332xf32> -> vector<80x332xf32>
    %140 = arith.truncf %139 : vector<80x332xf32> to vector<80x332xbf16>
    %c0_95 = arith.constant 0 : index
    %c0_96 = arith.constant 0 : index
    %141 = vector.load %arg8[%c0_95, %c0_96] : memref<8x80xbf16, #tpu.memory_space<vmem>>, vector<8x80xbf16>
    %cst_97 = arith.constant dense<0.000000e+00> : vector<8x332xf32>
    %142 = tpu.matmul %141, %140, %cst_97 {dimension_numbers = #tpu.dot_dimension_numbers<[1], [0], [0], [1], [0, 0, 1, 1], [], []>} : vector<8x80xbf16>, vector<80x332xbf16>, vector<8x332xf32> -> vector<8x332xf32>
    %143 = vector.extract_strided_slice %142 {offsets = [0, 0], sizes = [8, 329], strides = [1, 1]} : vector<8x332xf32> to vector<8x329xf32>
    %144 = tpu.iota {dimensions = array<i32: 0>} : vector<329x83xi32>
    %145 = tpu.iota {dimensions = array<i32: 1>} : vector<329x83xi32>
    %c4_i32 = arith.constant 4 : i32
    %146 = vector.broadcast %c4_i32 : i32 to vector<329x83xi32>
    %147 = arith.muli %145, %146 : vector<329x83xi32>
    %148 = arith.cmpi eq, %144, %147 : vector<329x83xi32>
    %149 = arith.extui %148 : vector<329x83xi1> to vector<329x83xi32>
    %150 = arith.sitofp %149 : vector<329x83xi32> to vector<329x83xf32>
    %cst_98 = arith.constant dense<0.000000e+00> : vector<8x83xf32>
    %151 = tpu.matmul %143, %150, %cst_98 {dimension_numbers = #tpu.dot_dimension_numbers<[1], [0], [0], [1], [0, 0, 1, 1], [], []>} : vector<8x329xf32>, vector<329x83xf32>, vector<8x83xf32> -> vector<8x83xf32>
    %c0_99 = arith.constant 0 : index
    %c0_100 = arith.constant 0 : index
    %152 = vector.load %arg9[%c0_99, %c0_100] : memref<8x1xf32, #tpu.memory_space<vmem>>, vector<8x1xf32>
    %153 = vector.broadcast %152 : vector<8x1xf32> to vector<8x83xf32>
    %154 = arith.addf %151, %153 : vector<8x83xf32>
    %155 = vector.shape_cast %154 : vector<8x83xf32> to vector<1x8x83xf32>
    %cst_101 = arith.constant dense<0.000000e+00> : vector<1xf32>
    %156 = vector.multi_reduction <add>, %155, %cst_101 [1, 2] : vector<1x8x83xf32> to vector<1xf32>
    %157 = vector.shape_cast %156 : vector<1xf32> to vector<1x1x1xf32>
    %158 = vector.extract %157[0, 0, 0] : f32 from vector<1x1x1xf32>
    %159 = arith.mulf %154, %154 : vector<8x83xf32>
    %160 = vector.shape_cast %159 : vector<8x83xf32> to vector<1x8x83xf32>
    %cst_102 = arith.constant dense<0.000000e+00> : vector<1xf32>
    %161 = vector.multi_reduction <add>, %160, %cst_102 [1, 2] : vector<1x8x83xf32> to vector<1xf32>
    %162 = vector.shape_cast %161 : vector<1xf32> to vector<1x1x1xf32>
    %163 = vector.extract %162[0, 0, 0] : f32 from vector<1x1x1xf32>
    %cst_103 = arith.constant 6.640000e+02 : f32
    %164 = arith.divf %158, %cst_103 : f32
    %cst_104 = arith.constant 6.640000e+02 : f32
    %165 = arith.divf %163, %cst_104 : f32
    %166 = arith.mulf %164, %164 : f32
    %167 = arith.subf %165, %166 : f32
    %168 = vector.broadcast %164 : f32 to vector<8x83xf32>
    %169 = arith.subf %154, %168 : vector<8x83xf32>
    %cst_105 = arith.constant 9.99999974E-6 : f32
    %170 = arith.addf %167, %cst_105 : f32
    %171 = math.rsqrt %170 : f32
    %172 = vector.broadcast %171 : f32 to vector<8x83xf32>
    %173 = arith.mulf %169, %172 : vector<8x83xf32>
    %cst_106 = arith.constant 0.000000e+00 : f32
    %174 = vector.broadcast %cst_106 : f32 to vector<8x83xf32>
    %175 = arith.maximumf %173, %174 : vector<8x83xf32>
    %c0_107 = arith.constant 0 : index
    %c0_108 = arith.constant 0 : index
    %176 = vector.load %arg22[%c0_107, %c0_108] : memref<8x700xf32, #tpu.memory_space<vmem>>, vector<8x83xf32>
    tpu.vector_store %arg22[%c0_107, %c0_108], %175 {strides = array<i32>} : memref<8x700xf32, #tpu.memory_space<vmem>>, vector<8x83xf32>,
    %c0_109 = arith.constant 0 : index
    %c0_110 = arith.constant 0 : index
    %177 = vector.load %arg22[%c0_109, %c0_110] : memref<8x700xf32, #tpu.memory_space<vmem>>, vector<8x74xf32>
    %c0_111 = arith.constant 0 : index
    %c1_112 = arith.constant 1 : index
    %178 = vector.load %arg22[%c0_111, %c1_112] : memref<8x700xf32, #tpu.memory_space<vmem>>, vector<8x74xf32>
    %c0_113 = arith.constant 0 : index
    %c2_114 = arith.constant 2 : index
    %179 = vector.load %arg22[%c0_113, %c2_114] : memref<8x700xf32, #tpu.memory_space<vmem>>, vector<8x74xf32>
    %c0_115 = arith.constant 0 : index
    %c3_116 = arith.constant 3 : index
    %180 = vector.load %arg22[%c0_115, %c3_116] : memref<8x700xf32, #tpu.memory_space<vmem>>, vector<8x74xf32>
    %c0_117 = arith.constant 0 : index
    %c4_118 = arith.constant 4 : index
    %181 = vector.load %arg22[%c0_117, %c4_118] : memref<8x700xf32, #tpu.memory_space<vmem>>, vector<8x74xf32>
    %c0_119 = arith.constant 0 : index
    %c5_120 = arith.constant 5 : index
    %182 = vector.load %arg22[%c0_119, %c5_120] : memref<8x700xf32, #tpu.memory_space<vmem>>, vector<8x74xf32>
    %c0_121 = arith.constant 0 : index
    %c6_122 = arith.constant 6 : index
    %183 = vector.load %arg22[%c0_121, %c6_122] : memref<8x700xf32, #tpu.memory_space<vmem>>, vector<8x74xf32>
    %c0_123 = arith.constant 0 : index
    %c7_124 = arith.constant 7 : index
    %184 = vector.load %arg22[%c0_123, %c7_124] : memref<8x700xf32, #tpu.memory_space<vmem>>, vector<8x74xf32>
    %c0_125 = arith.constant 0 : index
    %c8_126 = arith.constant 8 : index
    %185 = vector.load %arg22[%c0_125, %c8_126] : memref<8x700xf32, #tpu.memory_space<vmem>>, vector<8x74xf32>
    %c0_127 = arith.constant 0 : index
    %c9_128 = arith.constant 9 : index
    %186 = vector.load %arg22[%c0_127, %c9_128] : memref<8x700xf32, #tpu.memory_space<vmem>>, vector<8x74xf32>
    %187 = tpu.concatenate %177, %178, %179, %180, %181, %182, %183, %184, %185, %186 in 0 : vector<8x74xf32>, vector<8x74xf32>, vector<8x74xf32>, vector<8x74xf32>, vector<8x74xf32>, vector<8x74xf32>, vector<8x74xf32>, vector<8x74xf32>, vector<8x74xf32>, vector<8x74xf32> -> vector<80x74xf32>
    %188 = arith.truncf %187 : vector<80x74xf32> to vector<80x74xbf16>
    %c0_129 = arith.constant 0 : index
    %c0_130 = arith.constant 0 : index
    %189 = vector.load %arg10[%c0_129, %c0_130] : memref<8x80xbf16, #tpu.memory_space<vmem>>, vector<8x80xbf16>
    %cst_131 = arith.constant dense<0.000000e+00> : vector<8x74xf32>
    %190 = tpu.matmul %189, %188, %cst_131 {dimension_numbers = #tpu.dot_dimension_numbers<[1], [0], [0], [1], [0, 0, 1, 1], [], []>} : vector<8x80xbf16>, vector<80x74xbf16>, vector<8x74xf32> -> vector<8x74xf32>
    %191 = vector.extract_strided_slice %190 {offsets = [0, 0], sizes = [8, 73], strides = [1, 1]} : vector<8x74xf32> to vector<8x73xf32>
    %192 = tpu.iota {dimensions = array<i32: 0>} : vector<73x10xi32>
    %193 = tpu.iota {dimensions = array<i32: 1>} : vector<73x10xi32>
    %c8_i32 = arith.constant 8 : i32
    %194 = vector.broadcast %c8_i32 : i32 to vector<73x10xi32>
    %195 = arith.muli %193, %194 : vector<73x10xi32>
    %196 = arith.cmpi eq, %192, %195 : vector<73x10xi32>
    %197 = arith.extui %196 : vector<73x10xi1> to vector<73x10xi32>
    %198 = arith.sitofp %197 : vector<73x10xi32> to vector<73x10xf32>
    %cst_132 = arith.constant dense<0.000000e+00> : vector<8x10xf32>
    %199 = tpu.matmul %191, %198, %cst_132 {dimension_numbers = #tpu.dot_dimension_numbers<[1], [0], [0], [1], [0, 0, 1, 1], [], []>} : vector<8x73xf32>, vector<73x10xf32>, vector<8x10xf32> -> vector<8x10xf32>
    %c0_133 = arith.constant 0 : index
    %c0_134 = arith.constant 0 : index
    %200 = vector.load %arg11[%c0_133, %c0_134] : memref<8x1xf32, #tpu.memory_space<vmem>>, vector<8x1xf32>
    %201 = vector.broadcast %200 : vector<8x1xf32> to vector<8x10xf32>
    %202 = arith.addf %199, %201 : vector<8x10xf32>
    %203 = vector.shape_cast %202 : vector<8x10xf32> to vector<1x8x10xf32>
    %cst_135 = arith.constant dense<0.000000e+00> : vector<1xf32>
    %204 = vector.multi_reduction <add>, %203, %cst_135 [1, 2] : vector<1x8x10xf32> to vector<1xf32>
    %205 = vector.shape_cast %204 : vector<1xf32> to vector<1x1x1xf32>
    %206 = vector.extract %205[0, 0, 0] : f32 from vector<1x1x1xf32>
    %207 = arith.mulf %202, %202 : vector<8x10xf32>
    %208 = vector.shape_cast %207 : vector<8x10xf32> to vector<1x8x10xf32>
    %cst_136 = arith.constant dense<0.000000e+00> : vector<1xf32>
    %209 = vector.multi_reduction <add>, %208, %cst_136 [1, 2] : vector<1x8x10xf32> to vector<1xf32>
    %210 = vector.shape_cast %209 : vector<1xf32> to vector<1x1x1xf32>
    %211 = vector.extract %210[0, 0, 0] : f32 from vector<1x1x1xf32>
    %cst_137 = arith.constant 8.000000e+01 : f32
    %212 = arith.divf %206, %cst_137 : f32
    %cst_138 = arith.constant 8.000000e+01 : f32
    %213 = arith.divf %211, %cst_138 : f32
    %214 = arith.mulf %212, %212 : f32
    %215 = arith.subf %213, %214 : f32
    %216 = vector.broadcast %212 : f32 to vector<8x10xf32>
    %217 = arith.subf %202, %216 : vector<8x10xf32>
    %cst_139 = arith.constant 9.99999974E-6 : f32
    %218 = arith.addf %215, %cst_139 : f32
    %219 = math.rsqrt %218 : f32
    %220 = vector.broadcast %219 : f32 to vector<8x10xf32>
    %221 = arith.mulf %217, %220 : vector<8x10xf32>
    %cst_140 = arith.constant 0.000000e+00 : f32
    %222 = vector.broadcast %cst_140 : f32 to vector<8x10xf32>
    %223 = arith.maximumf %221, %222 : vector<8x10xf32>
    %c0_141 = arith.constant 0 : index
    %c0_142 = arith.constant 0 : index
    %224 = vector.load %arg21[%c0_141, %c0_142] : memref<8x700xf32, #tpu.memory_space<vmem>>, vector<8x10xf32>
    tpu.vector_store %arg21[%c0_141, %c0_142], %223 {strides = array<i32>} : memref<8x700xf32, #tpu.memory_space<vmem>>, vector<8x10xf32>,
    %c0_143 = arith.constant 0 : index
    %c0_144 = arith.constant 0 : index
    %225 = vector.load %arg21[%c0_143, %c0_144] : memref<8x700xf32, #tpu.memory_space<vmem>>, vector<8x1xf32>
    %c0_145 = arith.constant 0 : index
    %c1_146 = arith.constant 1 : index
    %226 = vector.load %arg21[%c0_145, %c1_146] : memref<8x700xf32, #tpu.memory_space<vmem>>, vector<8x1xf32>
    %c0_147 = arith.constant 0 : index
    %c2_148 = arith.constant 2 : index
    %227 = vector.load %arg21[%c0_147, %c2_148] : memref<8x700xf32, #tpu.memory_space<vmem>>, vector<8x1xf32>
    %c0_149 = arith.constant 0 : index
    %c3_150 = arith.constant 3 : index
    %228 = vector.load %arg21[%c0_149, %c3_150] : memref<8x700xf32, #tpu.memory_space<vmem>>, vector<8x1xf32>
    %c0_151 = arith.constant 0 : index
    %c4_152 = arith.constant 4 : index
    %229 = vector.load %arg21[%c0_151, %c4_152] : memref<8x700xf32, #tpu.memory_space<vmem>>, vector<8x1xf32>
    %c0_153 = arith.constant 0 : index
    %c5_154 = arith.constant 5 : index
    %230 = vector.load %arg21[%c0_153, %c5_154] : memref<8x700xf32, #tpu.memory_space<vmem>>, vector<8x1xf32>
    %c0_155 = arith.constant 0 : index
    %c6_156 = arith.constant 6 : index
    %231 = vector.load %arg21[%c0_155, %c6_156] : memref<8x700xf32, #tpu.memory_space<vmem>>, vector<8x1xf32>
    %c0_157 = arith.constant 0 : index
    %c7_158 = arith.constant 7 : index
    %232 = vector.load %arg21[%c0_157, %c7_158] : memref<8x700xf32, #tpu.memory_space<vmem>>, vector<8x1xf32>
    %c0_159 = arith.constant 0 : index
    %c8_160 = arith.constant 8 : index
    %233 = vector.load %arg21[%c0_159, %c8_160] : memref<8x700xf32, #tpu.memory_space<vmem>>, vector<8x1xf32>
    %c0_161 = arith.constant 0 : index
    %c9_162 = arith.constant 9 : index
    %234 = vector.load %arg21[%c0_161, %c9_162] : memref<8x700xf32, #tpu.memory_space<vmem>>, vector<8x1xf32>
    %235 = tpu.concatenate %225, %226, %227, %228, %229, %230, %231, %232, %233, %234 in 0 : vector<8x1xf32>, vector<8x1xf32>, vector<8x1xf32>, vector<8x1xf32>, vector<8x1xf32>, vector<8x1xf32>, vector<8x1xf32>, vector<8x1xf32>, vector<8x1xf32>, vector<8x1xf32> -> vector<80x1xf32>
    %236 = arith.truncf %235 : vector<80x1xf32> to vector<80x1xbf16>
    %c0_163 = arith.constant 0 : index
    %c0_164 = arith.constant 0 : index
    %237 = vector.load %arg12[%c0_163, %c0_164] : memref<8x80xbf16, #tpu.memory_space<vmem>>, vector<8x80xbf16>
    %cst_165 = arith.constant dense<0.000000e+00> : vector<8x1xf32>
    %238 = tpu.matmul %237, %236, %cst_165 {dimension_numbers = #tpu.dot_dimension_numbers<[1], [0], [0], [1], [0, 0, 1, 1], [], []>} : vector<8x80xbf16>, vector<80x1xbf16>, vector<8x1xf32> -> vector<8x1xf32>
    %c0_166 = arith.constant 0 : index
    %c0_167 = arith.constant 0 : index
    %239 = vector.load %arg13[%c0_166, %c0_167] : memref<8x1xf32, #tpu.memory_space<vmem>>, vector<8x1xf32>
    %240 = arith.addf %238, %239 : vector<8x1xf32>
    %241 = vector.shape_cast %240 : vector<8x1xf32> to vector<1x8x1xf32>
    %cst_168 = arith.constant dense<0.000000e+00> : vector<1xf32>
    %242 = vector.multi_reduction <add>, %241, %cst_168 [1, 2] : vector<1x8x1xf32> to vector<1xf32>
    %243 = vector.shape_cast %242 : vector<1xf32> to vector<1x1x1xf32>
    %244 = vector.extract %243[0, 0, 0] : f32 from vector<1x1x1xf32>
    %245 = arith.mulf %240, %240 : vector<8x1xf32>
    %246 = vector.shape_cast %245 : vector<8x1xf32> to vector<1x8x1xf32>
    %cst_169 = arith.constant dense<0.000000e+00> : vector<1xf32>
    %247 = vector.multi_reduction <add>, %246, %cst_169 [1, 2] : vector<1x8x1xf32> to vector<1xf32>
    %248 = vector.shape_cast %247 : vector<1xf32> to vector<1x1x1xf32>
    %249 = vector.extract %248[0, 0, 0] : f32 from vector<1x1x1xf32>
    %cst_170 = arith.constant 8.000000e+00 : f32
    %250 = arith.divf %244, %cst_170 : f32
    %cst_171 = arith.constant 8.000000e+00 : f32
    %251 = arith.divf %249, %cst_171 : f32
    %252 = arith.mulf %250, %250 : f32
    %253 = arith.subf %251, %252 : f32
    %254 = vector.broadcast %250 : f32 to vector<8x1xf32>
    %255 = arith.subf %240, %254 : vector<8x1xf32>
    %cst_172 = arith.constant 9.99999974E-6 : f32
    %256 = arith.addf %253, %cst_172 : f32
    %257 = math.rsqrt %256 : f32
    %258 = vector.broadcast %257 : f32 to vector<8x1xf32>
    %259 = arith.mulf %255, %258 : vector<8x1xf32>
    %cst_173 = arith.constant 0.000000e+00 : f32
    %260 = vector.broadcast %cst_173 : f32 to vector<8x1xf32>
    %261 = arith.maximumf %259, %260 : vector<8x1xf32>
    %c0_174 = arith.constant 0 : index
    %c0_175 = arith.constant 0 : index
    %262 = vector.load %arg22[%c0_174, %c0_175] : memref<8x700xf32, #tpu.memory_space<vmem>>, vector<8x1xf32>
    tpu.vector_store %arg22[%c0_174, %c0_175], %261 {strides = array<i32>} : memref<8x700xf32, #tpu.memory_space<vmem>>, vector<8x1xf32>,
    %c0_176 = arith.constant 0 : index
    %c0_177 = arith.constant 0 : index
    %263 = vector.load %arg22[%c0_176, %c0_177] : memref<8x700xf32, #tpu.memory_space<vmem>>, vector<8x1xf32>
    %264 = vector.extract_strided_slice %263 {offsets = [0, 0], sizes = [1, 1], strides = [1, 1]} : vector<8x1xf32> to vector<1x1xf32>
    %265 = vector.extract_strided_slice %263 {offsets = [1, 0], sizes = [1, 1], strides = [1, 1]} : vector<8x1xf32> to vector<1x1xf32>
    %266 = vector.extract_strided_slice %263 {offsets = [2, 0], sizes = [1, 1], strides = [1, 1]} : vector<8x1xf32> to vector<1x1xf32>
    %267 = vector.extract_strided_slice %263 {offsets = [3, 0], sizes = [1, 1], strides = [1, 1]} : vector<8x1xf32> to vector<1x1xf32>
    %268 = vector.extract_strided_slice %263 {offsets = [4, 0], sizes = [1, 1], strides = [1, 1]} : vector<8x1xf32> to vector<1x1xf32>
    %269 = vector.extract_strided_slice %263 {offsets = [5, 0], sizes = [1, 1], strides = [1, 1]} : vector<8x1xf32> to vector<1x1xf32>
    %270 = vector.extract_strided_slice %263 {offsets = [6, 0], sizes = [1, 1], strides = [1, 1]} : vector<8x1xf32> to vector<1x1xf32>
    %271 = vector.extract_strided_slice %263 {offsets = [7, 0], sizes = [1, 1], strides = [1, 1]} : vector<8x1xf32> to vector<1x1xf32>
    %272 = tpu.concatenate %264, %265, %266, %267, %268, %269, %270, %271 in 1 : vector<1x1xf32>, vector<1x1xf32>, vector<1x1xf32>, vector<1x1xf32>, vector<1x1xf32>, vector<1x1xf32>, vector<1x1xf32>, vector<1x1xf32> -> vector<1x8xf32>
    %273 = arith.truncf %272 : vector<1x8xf32> to vector<1x8xbf16>
    %c0_178 = arith.constant 0 : index
    %c0_179 = arith.constant 0 : index
    %274 = vector.load %arg14[%c0_178, %c0_179] : memref<8x64xbf16, #tpu.memory_space<vmem>>, vector<8x64xbf16>
    %cst_180 = arith.constant dense<0.000000e+00> : vector<1x64xf32>
    %275 = tpu.matmul %273, %274, %cst_180 {dimension_numbers = #tpu.dot_dimension_numbers<[1], [0], [0], [1], [0, 0, 1, 1], [], []>} : vector<1x8xbf16>, vector<8x64xbf16>, vector<1x64xf32> -> vector<1x64xf32>
    %c0_181 = arith.constant 0 : index
    %c0_182 = arith.constant 0 : index
    %276 = vector.load %arg15[%c0_181, %c0_182] : memref<1x64xf32, #tpu.memory_space<vmem>>, vector<1x64xf32>
    %277 = arith.addf %275, %276 : vector<1x64xf32>
    %cst_183 = arith.constant dense<0.000000e+00> : vector<1xf32>
    %278 = vector.multi_reduction <add>, %277, %cst_183 [1] : vector<1x64xf32> to vector<1xf32>
    %279 = vector.shape_cast %278 : vector<1xf32> to vector<1x1xf32>
    %280 = arith.mulf %277, %277 : vector<1x64xf32>
    %cst_184 = arith.constant dense<0.000000e+00> : vector<1xf32>
    %281 = vector.multi_reduction <add>, %280, %cst_184 [1] : vector<1x64xf32> to vector<1xf32>
    %282 = vector.shape_cast %281 : vector<1xf32> to vector<1x1xf32>
    %cst_185 = arith.constant 6.400000e+01 : f32
    %283 = vector.broadcast %cst_185 : f32 to vector<1x1xf32>
    %284 = arith.divf %279, %283 : vector<1x1xf32>
    %cst_186 = arith.constant 6.400000e+01 : f32
    %285 = vector.broadcast %cst_186 : f32 to vector<1x1xf32>
    %286 = arith.divf %282, %285 : vector<1x1xf32>
    %287 = arith.mulf %284, %284 : vector<1x1xf32>
    %288 = arith.subf %286, %287 : vector<1x1xf32>
    %289 = vector.broadcast %284 : vector<1x1xf32> to vector<1x64xf32>
    %290 = arith.subf %277, %289 : vector<1x64xf32>
    %cst_187 = arith.constant 9.99999974E-6 : f32
    %291 = vector.broadcast %cst_187 : f32 to vector<1x1xf32>
    %292 = arith.addf %288, %291 : vector<1x1xf32>
    %293 = math.rsqrt %292 : vector<1x1xf32>
    %294 = vector.broadcast %293 : vector<1x1xf32> to vector<1x64xf32>
    %295 = arith.mulf %290, %294 : vector<1x64xf32>
    %cst_188 = arith.constant 0.000000e+00 : f32
    %296 = vector.broadcast %cst_188 : f32 to vector<1x64xf32>
    %297 = arith.maximumf %295, %296 : vector<1x64xf32>
    %298 = arith.truncf %297 : vector<1x64xf32> to vector<1x64xbf16>
    %c0_189 = arith.constant 0 : index
    %c0_190 = arith.constant 0 : index
    %299 = vector.load %arg16[%c0_189, %c0_190] : memref<64x32xbf16, #tpu.memory_space<vmem>>, vector<64x32xbf16>
    %cst_191 = arith.constant dense<0.000000e+00> : vector<1x32xf32>
    %300 = tpu.matmul %298, %299, %cst_191 {dimension_numbers = #tpu.dot_dimension_numbers<[1], [0], [0], [1], [0, 0, 1, 1], [], []>} : vector<1x64xbf16>, vector<64x32xbf16>, vector<1x32xf32> -> vector<1x32xf32>
    %c0_192 = arith.constant 0 : index
    %c0_193 = arith.constant 0 : index
    %301 = vector.load %arg17[%c0_192, %c0_193] : memref<1x32xf32, #tpu.memory_space<vmem>>, vector<1x32xf32>
    %302 = arith.addf %300, %301 : vector<1x32xf32>
    %cst_194 = arith.constant dense<0.000000e+00> : vector<1xf32>
    %303 = vector.multi_reduction <add>, %302, %cst_194 [1] : vector<1x32xf32> to vector<1xf32>
    %304 = vector.shape_cast %303 : vector<1xf32> to vector<1x1xf32>
    %305 = arith.mulf %302, %302 : vector<1x32xf32>
    %cst_195 = arith.constant dense<0.000000e+00> : vector<1xf32>
    %306 = vector.multi_reduction <add>, %305, %cst_195 [1] : vector<1x32xf32> to vector<1xf32>
    %307 = vector.shape_cast %306 : vector<1xf32> to vector<1x1xf32>
    %cst_196 = arith.constant 3.200000e+01 : f32
    %308 = vector.broadcast %cst_196 : f32 to vector<1x1xf32>
    %309 = arith.divf %304, %308 : vector<1x1xf32>
    %cst_197 = arith.constant 3.200000e+01 : f32
    %310 = vector.broadcast %cst_197 : f32 to vector<1x1xf32>
    %311 = arith.divf %307, %310 : vector<1x1xf32>
    %312 = arith.mulf %309, %309 : vector<1x1xf32>
    %313 = arith.subf %311, %312 : vector<1x1xf32>
    %314 = vector.broadcast %309 : vector<1x1xf32> to vector<1x32xf32>
    %315 = arith.subf %302, %314 : vector<1x32xf32>
    %cst_198 = arith.constant 9.99999974E-6 : f32
    %316 = vector.broadcast %cst_198 : f32 to vector<1x1xf32>
    %317 = arith.addf %313, %316 : vector<1x1xf32>
    %318 = math.rsqrt %317 : vector<1x1xf32>
    %319 = vector.broadcast %318 : vector<1x1xf32> to vector<1x32xf32>
    %320 = arith.mulf %315, %319 : vector<1x32xf32>
    %cst_199 = arith.constant 0.000000e+00 : f32
    %321 = vector.broadcast %cst_199 : f32 to vector<1x32xf32>
    %322 = arith.maximumf %320, %321 : vector<1x32xf32>
    %323 = arith.truncf %322 : vector<1x32xf32> to vector<1x32xbf16>
    %c0_200 = arith.constant 0 : index
    %c0_201 = arith.constant 0 : index
    %324 = vector.load %arg18[%c0_200, %c0_201] : memref<32x3xbf16, #tpu.memory_space<vmem>>, vector<32x3xbf16>
    %cst_202 = arith.constant dense<0.000000e+00> : vector<1x3xf32>
    %325 = tpu.matmul %323, %324, %cst_202 {dimension_numbers = #tpu.dot_dimension_numbers<[1], [0], [0], [1], [0, 0, 1, 1], [], []>} : vector<1x32xbf16>, vector<32x3xbf16>, vector<1x3xf32> -> vector<1x3xf32>
    %c0_203 = arith.constant 0 : index
    %c0_204 = arith.constant 0 : index
    %326 = vector.load %arg19[%c0_203, %c0_204] : memref<1x3xf32, #tpu.memory_space<vmem>>, vector<1x3xf32>
    %327 = arith.addf %325, %326 : vector<1x3xf32>
    %c0_205 = arith.constant 0 : index
    %c0_206 = arith.constant 0 : index
    %c0_207 = arith.constant 0 : index
    %328 = vector.load %arg20[%c0_205, %c0_206, %c0_207] : memref<1x1x3xf32, #tpu.memory_space<vmem>>, vector<1x1x3xf32>
    %329 = vector.shape_cast %328 : vector<1x1x3xf32> to vector<1x3xf32>
    %330 = vector.shape_cast %327 : vector<1x3xf32> to vector<1x1x3xf32>
    tpu.vector_store %arg20[%c0_205, %c0_206, %c0_207], %330 {strides = array<i32>} : memref<1x1x3xf32, #tpu.memory_space<vmem>>, vector<1x1x3xf32>,
    return
  }
  func.func @transform_0(%arg0: i32) -> (i32, i32, i32) {
    %c0_i32 = arith.constant 0 : i32
    %c0_i32_0 = arith.constant 0 : i32
    %c0_i32_1 = arith.constant 0 : i32
    return %arg0, %c0_i32, %c0_i32_0 : i32, i32, i32
  }
  func.func @transform_1(%arg0: i32) -> (i32, i32) {
    %c0_i32 = arith.constant 0 : i32
    %c0_i32_0 = arith.constant 0 : i32
    %c0_i32_1 = arith.constant 0 : i32
    return %c0_i32, %c0_i32_0 : i32, i32
  }
  func.func @transform_2(%arg0: i32) -> (i32, i32) {
    %c0_i32 = arith.constant 0 : i32
    %c0_i32_0 = arith.constant 0 : i32
    %c0_i32_1 = arith.constant 0 : i32
    return %c0_i32, %c0_i32_0 : i32, i32
  }
  func.func @transform_3(%arg0: i32) -> (i32, i32) {
    %c0_i32 = arith.constant 0 : i32
    %c0_i32_0 = arith.constant 0 : i32
    %c0_i32_1 = arith.constant 0 : i32
    return %c0_i32, %c0_i32_0 : i32, i32
  }
  func.func @transform_4(%arg0: i32) -> (i32, i32) {
    %c0_i32 = arith.constant 0 : i32
    %c0_i32_0 = arith.constant 0 : i32
    %c0_i32_1 = arith.constant 0 : i32
    return %c0_i32, %c0_i32_0 : i32, i32
  }
  func.func @transform_5(%arg0: i32) -> (i32, i32) {
    %c0_i32 = arith.constant 0 : i32
    %c0_i32_0 = arith.constant 0 : i32
    %c0_i32_1 = arith.constant 0 : i32
    return %c0_i32, %c0_i32_0 : i32, i32
  }
  func.func @transform_6(%arg0: i32) -> (i32, i32) {
    %c0_i32 = arith.constant 0 : i32
    %c0_i32_0 = arith.constant 0 : i32
    %c0_i32_1 = arith.constant 0 : i32
    return %c0_i32, %c0_i32_0 : i32, i32
  }
  func.func @transform_7(%arg0: i32) -> (i32, i32) {
    %c0_i32 = arith.constant 0 : i32
    %c0_i32_0 = arith.constant 0 : i32
    %c0_i32_1 = arith.constant 0 : i32
    return %c0_i32, %c0_i32_0 : i32, i32
  }
  func.func @transform_8(%arg0: i32) -> (i32, i32) {
    %c0_i32 = arith.constant 0 : i32
    %c0_i32_0 = arith.constant 0 : i32
    %c0_i32_1 = arith.constant 0 : i32
    return %c0_i32, %c0_i32_0 : i32, i32
  }
  func.func @transform_9(%arg0: i32) -> (i32, i32) {
    %c0_i32 = arith.constant 0 : i32
    %c0_i32_0 = arith.constant 0 : i32
    %c0_i32_1 = arith.constant 0 : i32
    return %c0_i32, %c0_i32_0 : i32, i32
  }
  func.func @transform_10(%arg0: i32) -> (i32, i32) {
    %c0_i32 = arith.constant 0 : i32
    %c0_i32_0 = arith.constant 0 : i32
    %c0_i32_1 = arith.constant 0 : i32
    return %c0_i32, %c0_i32_0 : i32, i32
  }
  func.func @transform_11(%arg0: i32) -> (i32, i32) {
    %c0_i32 = arith.constant 0 : i32
    %c0_i32_0 = arith.constant 0 : i32
    %c0_i32_1 = arith.constant 0 : i32
    return %c0_i32, %c0_i32_0 : i32, i32
  }
  func.func @transform_12(%arg0: i32) -> (i32, i32) {
    %c0_i32 = arith.constant 0 : i32
    %c0_i32_0 = arith.constant 0 : i32
    %c0_i32_1 = arith.constant 0 : i32
    return %c0_i32, %c0_i32_0 : i32, i32
  }
  func.func @transform_13(%arg0: i32) -> (i32, i32) {
    %c0_i32 = arith.constant 0 : i32
    %c0_i32_0 = arith.constant 0 : i32
    %c0_i32_1 = arith.constant 0 : i32
    return %c0_i32, %c0_i32_0 : i32, i32
  }
  func.func @transform_14(%arg0: i32) -> (i32, i32) {
    %c0_i32 = arith.constant 0 : i32
    %c0_i32_0 = arith.constant 0 : i32
    %c0_i32_1 = arith.constant 0 : i32
    return %c0_i32, %c0_i32_0 : i32, i32
  }
  func.func @transform_15(%arg0: i32) -> (i32, i32) {
    %c0_i32 = arith.constant 0 : i32
    %c0_i32_0 = arith.constant 0 : i32
    %c0_i32_1 = arith.constant 0 : i32
    return %c0_i32, %c0_i32_0 : i32, i32
  }
  func.func @transform_16(%arg0: i32) -> (i32, i32) {
    %c0_i32 = arith.constant 0 : i32
    %c0_i32_0 = arith.constant 0 : i32
    %c0_i32_1 = arith.constant 0 : i32
    return %c0_i32, %c0_i32_0 : i32, i32
  }
  func.func @transform_17(%arg0: i32) -> (i32, i32) {
    %c0_i32 = arith.constant 0 : i32
    %c0_i32_0 = arith.constant 0 : i32
    %c0_i32_1 = arith.constant 0 : i32
    return %c0_i32, %c0_i32_0 : i32, i32
  }
  func.func @transform_18(%arg0: i32) -> (i32, i32) {
    %c0_i32 = arith.constant 0 : i32
    %c0_i32_0 = arith.constant 0 : i32
    %c0_i32_1 = arith.constant 0 : i32
    return %c0_i32, %c0_i32_0 : i32, i32
  }
  func.func @transform_19(%arg0: i32) -> (i32, i32, i32) {
    %c0_i32 = arith.constant 0 : i32
    %c0_i32_0 = arith.constant 0 : i32
    %c0_i32_1 = arith.constant 0 : i32
    return %arg0, %c0_i32, %c0_i32_0 : i32, i32, i32
  }
}

</mosaic_0001>

<bundles_post_ra>
// kernel: tpu_custom_call.1
= control target key start
LH: loop header
LB: loop body
LE: loop exit
PB: predicated region body
PF: predicated region fallthrough
CT: control target
= control target key end

     0   :  { %s5965_s0 = inlined_call_operand.vmem [shape: f32[2,4,700], index: 0, kind: input, shape index: {}]   ;;  %s5966_s1 = inlined_call_operand.vmem [shape: bf16[8,4], index: 1, kind: input, shape index: {}]   ;;  %s5967_s2 = inlined_call_operand.vmem [shape: f32[8,1], index: 2, kind: input, shape index: {}]   ;;  %s5968_s3 = inlined_call_operand.vmem [shape: bf16[8,80], index: 3, kind: input, shape index: {}]   ;;  %s5969_s4 = inlined_call_operand.vmem [shape: f32[8,1], index: 4, kind: input, shape index: {}]   ;;  %s5970_s5 = inlined_call_operand.vmem [shape: bf16[8,80], index: 5, kind: input, shape index: {}]   ;;  %s5971_s6 = inlined_call_operand.vmem [shape: f32[8,1], index: 6, kind: input, shape index: {}]   ;;  %s5972_s7 = inlined_call_operand.vmem [shape: bf16[8,80], index: 7, kind: input, shape index: {}]   ;;  %s5973_s8 = inlined_call_operand.vmem [shape: f32[8,1], index: 8, kind: input, shape index: {}]   ;;  %s5974_s9 = inlined_call_operand.vmem [shape: bf16[8,80], index: 9, kind: input, shape index: {}]   ;;  %s5975_s10 = inlined_call_operand.vmem [shape: f32[8,1], index: 10, kind: input, shape index: {}]   ;;  %s5976_s11 = inlined_call_operand.vmem [shape: bf16[8,80], index: 11, kind: input, shape index: {}]   ;;  %s5977_s12 = inlined_call_operand.vmem [shape: f32[8,1], index: 12, kind: input, shape index: {}]   ;;  %s5978_s13 = inlined_call_operand.vmem [shape: bf16[8,64], index: 13, kind: input, shape index: {}]   ;;  %s5979_s14 = inlined_call_operand.vmem [shape: f32[1,64], index: 14, kind: input, shape index: {}]   ;;  %s5980_s15 = inlined_call_operand.vmem [shape: bf16[64,32], index: 15, kind: input, shape index: {}]   ;;  %s5981_s16 = inlined_call_operand.vmem [shape: f32[1,32], index: 16, kind: input, shape index: {}]   ;;  %s5982_s17 = inlined_call_operand.vmem [shape: bf16[32,3], index: 17, kind: input, shape index: {}]   ;;  %s5983_s18 = inlined_call_operand.vmem [shape: f32[1,3], index: 18, kind: input, shape index: {}]   ;;  %s5984_s19 = inlined_call_operand.hbm [shape: f32[2,1,3], index: 19, kind: output, shape index: {}]  }
   0x1   :  { %6025 = sst [smem:[#allocation13_spill]] %s5965_s0 }
   0x2   :  { %6026 = sst [smem:[#allocation14_spill]] %s5966_s1 }
   0x3   :  { %6027 = sst [smem:[#allocation15_spill]] %s5967_s2 }
   0x4   :  { %6028 = sst [smem:[#allocation16_spill]] %s5968_s3 }
   0x5   :  { %6029 = sst [smem:[#allocation17_spill]] %s5969_s4 }
   0x6   :  { %6030 = sst [smem:[#allocation18_spill]] %s5970_s5 }
   0x7   :  { %6031 = sst [smem:[#allocation19_spill]] %s5971_s6 }
   0x8   :  { %6032 = sst [smem:[#allocation20_spill]] %s5972_s7 }
   0x9   :  { %6033 = sst [smem:[#allocation21_spill]] %s5984_s19 }
   0xa   :  { %24 = vsyncpa [#allocation5], 0 }
   0xb   :  { %26 = vsyncpa [#allocation5 + $0x1], 0  ;;  %s4592_s0 = smov 0   ;;  %s4594_s30 = smov 0  }
   0xc   :  { %s4596_s20 = smov 0   ;;  %s4598_s21 = smov 0  }
   0xd LB: > { %6034 = sst [smem:[#allocation7_spill]] %s4455_s0  ;;  %s4613_s1 = sadd.s32 4294967295, %s4467_s21   ;;  %s4467_s21 = sphi %s4598_s21, %s6123_s21   ;;  %s4463_s20 = sphi %s4596_s20, %s6125_s20   ;;  %s4459_s30 = sphi %s4594_s30, %s6127_s30   ;;  %s4455_s0 = sphi %s4592_s0, %s6126_s0  }
   0xe   : > { %6035 = sst [smem:[#allocation8_spill]] %s4463_s20  ;;  %s3337_s22 = sadd.s32 4294967294, %s4467_s21  }
   0xf   : > { %6036 = sst [smem:[#allocation9_spill]] %s4467_s21  ;;  %s4617_s2 = sadd.s32 1, %s4467_s21  }
  0x10   : > { %6037 = sst [smem:[#allocation10_spill]] %s4617_s2  ;;  %s443_s23 = sadd.s32 1, %s4463_s20 }
  0x11   : > { %s440_s24 = ssub.s32 %s4467_s21, %s4617_s2  ;;  %p453_p0 = scmp.ne.s32.totalorder %s4463_s20, %s4459_s30 }
  0x12   : > { %p441_p1 = scmp.eq.s32.totalorder %s440_s24, 0  ;;  %p454_p2 = scmp.eq.s32.totalorder %s4613_s1, 1 }
  0x13   : > { %p459_p3 = scmp.ne.s32.totalorder %s4459_s30, %s4455_s0  ;;  %p460_p4 = scmp.eq.s32.totalorder %s3337_s22, 1 }
  0x14   : > { %s4628_s25 = scalar_select %p441_p1, %s4463_s20, %s443_s23  }
  0x15   : > { %p4630_p5 = por %p454_p2, %p453_p0  ;;  %p4634_p6 = por %p460_p4, %p459_p3 }
  0x16   : > { %6038 = sst [smem:[#allocation11_spill]] %s4628_s25  ;;  %p3340_p7 = scmp.ge.s32.totalorder %s4467_s21, 1 }
  0x17   : > { %s6040_s26 = scalar_select %p4634_p6, 1, 0 }
  0x18   : > { %p540_p8 = scmp.lt.s32.totalorder %s4467_s21, 3 }
  0x19   : > { %6041 = sst [smem:[#allocation12_spill]] %s6040_s26 }
  0x1a   : > { %p541_p9 = pnand %p3340_p7, %p540_p8 }
  0x1b   : > { %p595_p10 = scmp.lt.s32.totalorder (!%p541_p9), %s4613_s1, 1  ;;  %v4469_v0 = vmov (!%p541_p9), 0   ;;  %s6042_s29 = sld [smem:[#allocation15_spill]] (!%p541_p9)  ;;  %vm630_vm0 = vcmask (!%p541_p9), 1041408   ;;  %vm6006_vm1 = vcmask (!%p541_p9), 31744   ;;  %vm776_vm2 = vcmask (!%p541_p9), 490496  }
  0x1c   : > { %544 = sbr.rel (%p541_p9) target bundleno = 5674 (0x162a), region = 96  ;;  %681 = vmatprep.mubr.bf16.mxu0 (!%p541_p9), %v4469_v0  ;;  %722 = vmatprep.mubr.bf16.mxu1 (!%p541_p9), %v4469_v0  ;;  %s6043_s20 = sld [smem:[#allocation13_spill]] (!%p541_p9)  ;;  %vm6018_vm3 = vcmask (!%p541_p9), 1039360   ;;  %vm6013_vm4 = vcmask (!%p541_p9), 1022976   ;;  %vm6015_vm5 = vcmask (!%p541_p9), 1031168   ;;  %vm6012_vm6 = vcmask (!%p541_p9), 1014784  }
  0x1d   : > { %4128 = vset.pattern.permute.xlu0 (!%p541_p9), %v4469_v0  ;;  %4334 = vset.pattern.permute.xlu1 (!%p541_p9), %v4469_v0  ;;  %s6044_s25 = sld [smem:[#allocation14_spill]] (!%p541_p9)  ;;  %s6045_s4 = sld [smem:[#allocation17_spill]] (!%p541_p9)  ;;  %vm6011_vm7 = vcmask (!%p541_p9), 1006592   ;;  %vm6007_vm8 = vcmask (!%p541_p9), 990208   ;;  %vm6008_vm9 = vcmask (!%p541_p9), 998400   ;;  %vm6010_vm10 = vcmask (!%p541_p9), 982016  }
  0x1e   : > { %vm6009_vm11 = vcmask (!%p541_p9), 973824   ;;  %vm6014_vm12 = vcmask (!%p541_p9), 654336   ;;  %vm1243_vm13 = vcmask (!%p541_p9), 416768   ;;  %s6055_s5 = sld [smem:[#allocation18_spill]] (!%p541_p9)  ;;  %s6086_s6 = sld [smem:[#allocation19_spill]] (!%p541_p9) }
  0x1f   : > { %s6112_s7 = sld [smem:[#allocation20_spill]] (!%p541_p9) }
  0x21   : > { %v620_v1 = vld [vmem:[%s6042_s29] sm:$0xff] (!%p541_p9) }
  0x22   : > { %623 = vperm.xlu0 (!%p541_p9), %4128, %v620_v1  }
  0x23   : > { %s596_s22 = scalar_select %p595_p10, %s4613_s1, 1  ;;  %v619_v16 = vld [vmem:[%s6044_s25] sm:$0xf] }
  0x24   : > { %s6004_s25 = smov 127  }
  0x25   : > { %s4030_s23 = smul.u32 24, %s596_s22 }
  0x27   : > { %s599_s2 = scalar_lea.vmem %s6043_s20, %s4030_s23 }
  0x28   : > { %v601_v2 = vld [vmem:[%s599_s2] sm:$0xff]  ;;  %v603_v3 = vld [vmem:[%s599_s2 + $0x10] sm:$0xff]  ;;  %v602_v4 = vld [vmem:[%s599_s2 + $0x8] sm:$0xff] }
  0x29   : > { %v607_v5 = vcombine.high %v601_v2, %v601_v2  ;;  %v613_v6 = vpack.c.bf16 %v601_v2, %v601_v2  ;;  %v608_v7 = vcombine.high %v602_v4, %v602_v4  ;;  %v615_v8 = vpack.c.bf16 %v602_v4, %v602_v4 }
  0x2a   : > { %v609_v9 = vcombine.high %v603_v3, %v603_v3  ;;  %v617_v10 = vpack.c.bf16 %v603_v3, %v603_v3 }
  0x2b   : > { %v614_v11 = vpack.c.bf16 %v607_v5, %v607_v5  ;;  %v632_v12 = vsel %vm630_vm0, %v613_v6, 0  ;;  %v616_v13 = vpack.c.bf16 %v608_v7, %v608_v7  ;;  %v638_v14 = vsel %vm630_vm0, %v615_v8, 0 }
  0x2c   : > { %v618_v15 = vpack.c.bf16 %v609_v9, %v609_v9  ;;  %v644_v17 = vsel %vm630_vm0, %v617_v10, 0 }
  0x2d   : > { %3342 = vmatprep.subr.msk.bf16.mxu0 %vm630_vm0, %v614_v11  ;;  %3344 = vmatprep.subr.msk.bf16.mxu1 %vm630_vm0, %v616_v13 }
  0x2e   : > { %650 = vmatpush1.bf16.msra.mxu0 %v632_v12  ;;  %691 = vmatpush1.bf16.msra.mxu1 %v638_v14 }
  0x2f   : > { %3346 = vmatprep.subr.msk.bf16.mxu0 %vm630_vm0, %v618_v15 }
  0x31   : > { %3343 = vmatmul.mubr.msk.bf16.vlgmr.msra.gmra.mrb[0].mxu0 %vm6006_vm1, %v619_v16  ;;  %3345 = vmatmul.mubr.msk.bf16.vlgmr.msra.gmra.mrb[0].mxu1 %vm6006_vm1, %v619_v16 }
  0x32   : > { %732 = vmatpush1.bf16.msra.mxu0 %v644_v17  ;;  %763 = vmatprep.mubr.bf16.mxu0 %v4469_v0 }
  0x33   : > { %1148 = vmatprep.mubr.bf16.mxu1 %v4469_v0 }
  0x39   : > { %3347 = vmatmul.mubr.msk.bf16.vlgmr.msra.gmra.mrb[4].mxu0 %vm6006_vm1, %v619_v16 }
  0x3a   : > { %1189 = vmatprep.mubr.bf16.mxu0 %v4469_v0 }
  0xa1   : > { %v624_v18 = vpop.permute.xlu0 %623 }
 0x104   : > { %v683_v19 = vpop.f32.mrb[0].mxu0  ;;  %v724_v20 = vpop.f32.mrb[0].mxu1 }
 0x105   : > { %v4667_v21 = vadd.f32 %v683_v19, %v624_v18  ;;  %v685_v22 = vpop.f32.mrb[1].mxu0  ;;  %v4669_v23 = vadd.f32 %v724_v20, %v624_v18  ;;  %v726_v24 = vpop.f32.mrb[1].mxu1 }
 0x106   : > { %v4671_v25 = vadd.f32 %v685_v22, %v624_v18  ;;  %v687_v26 = vpop.f32.mrb[2].mxu0  ;;  %v728_v27 = vpop.f32.mrb[2].mxu1  ;;  %v4681_v34 = vadd.f32 %v726_v24, %v624_v18 }
 0x107   : > { %v788_v28 = vmul.f32 %v4667_v21, %v4667_v21  ;;  %v688_v29 = vpop.f32.mrb[3].mxu0  ;;  %v729_v30 = vpop.f32.mrb[3].mxu1  ;;  %v790_v33 = vmul.f32 %v4669_v23, %v4669_v23 }
 0x108   : > { %v772_v31 = vadd.f32 %v4671_v25, %v4667_v21  ;;  %v789_v32 = vmul.f32 %v4671_v25, %v4671_v25  ;;  %v791_v38 = vmul.f32 %v4681_v34, %v4681_v34 }
 0x10a   : > { %v794_v35 = vadd.f32 %v789_v32, %v788_v28  ;;  %v773_v36 = vadd.f32 %v772_v31, %v4669_v23 }
 0x10c   : > { %v774_v37 = vadd.f32 %v773_v36, %v4681_v34  ;;  %v765_v39 = vpop.f32.mrb[4].mxu0  ;;  %v795_v40 = vadd.f32 %v794_v35, %v790_v33  ;;  %v1106_v33 = vld [vmem:[%s6045_s4] sm:$0xff] }
 0x10d   : > { %v766_v41 = vadd.f32 %v765_v39, %v624_v18  ;;  %v767_v42 = vpop.f32.mrb[5].mxu0 }
 0x10e   : > { %v768_v43 = vadd.f32 %v767_v42, %v624_v18  ;;  %v769_v44 = vpop.f32.mrb[6].mxu0  ;;  %v796_v45 = vadd.f32 %v795_v40, %v791_v38 }
 0x10f   : > { %v770_v46 = vpop.f32.mrb[7].mxu0  ;;  %v775_v47 = vadd.f32 %v774_v37, %v766_v41  ;;  %v792_v48 = vmul.f32 %v766_v41, %v766_v41 }
 0x110   : > { %v777_v49 = vsel %vm776_vm2, %v768_v43, 0.0  ;;  %v793_v50 = vmul.f32 %v768_v43, %v768_v43 }
 0x111   : > { %v778_v51 = vadd.f32 %v777_v49, %v775_v47  ;;  %v797_v52 = vadd.f32 %v796_v45, %v792_v48 }
 0x112   : > { %v798_v53 = vsel %vm776_vm2, %v793_v50, 0.0 }
 0x113   : > { %779 = vadd.xlane.f32.xlu0 %v778_v51  ;;  %v799_v54 = vadd.f32 %v798_v53, %v797_v52 }
 0x115   : > { %800 = vadd.xlane.f32.xlu1 %v799_v54 }
 0x1a0   : > { %v780_v55 = vpop.xlane.xlu0 %779 }
 0x1a1   : > { %v781_v56 = vrot.slane %v780_v55, 4 }
 0x1a2   : > { %v801_v57 = vpop.xlane.xlu1 %800 }
 0x1a3   : > { %v782_v58 = vadd.f32 %v781_v56, %v780_v55  ;;  %v802_v59 = vrot.slane %v801_v57, 4 }
 0x1a5   : > { %v803_v60 = vadd.f32 %v802_v59, %v801_v57  ;;  %v783_v61 = vrot.slane %v782_v58, 2 }
 0x1a7   : > { %v784_v62 = vadd.f32 %v783_v61, %v782_v58  ;;  %v804_v63 = vrot.slane %v803_v60, 2 }
 0x1a9   : > { %v785_v1 = vrot.slane %v784_v62, 1  ;;  %v805_v2 = vadd.f32 %v804_v63, %v803_v60 }
 0x1ab   : > { %v786_v3 = vadd.f32 %v785_v1, %v784_v62  ;;  %v806_v4 = vrot.slane %v805_v2, 1 }
 0x1ad   : > { %4031 = vpush %v786_v3  ;;  %v807_v5 = vadd.f32 %v806_v4, %v805_v2 }
 0x1af   : > { %4033 = vpush %v807_v5 }
 0x1de   : > { %s4032_s27 = spop %4031 }
 0x1df   : > { %s811_s28 = smul.f32 0.00017857143, %s4032_s27  ;;  %s6002_s27 = smov 125  }
 0x1e0   : > { %s4034_s29 = spop %4033 }
 0x1e1   : > { %s815_s22 = smul.f32 %s811_s28, %s811_s28  ;;  %v817_v8 = vstv %s811_s28  ;;  %s5996_s28 = smov 121  }
 0x1e2   : > { %s814_s23 = smul.f32 0.00017857143, %s4034_s29  ;;  %v818_v9 = vsub.f32 %v4667_v21, %v817_v8  ;;  %v819_v10 = vsub.f32 %v4671_v25, %v817_v8  ;;  %v820_v11 = vsub.f32 %v4669_v23, %v817_v8  ;;  %v821_v12 = vsub.f32 %v4681_v34, %v817_v8  ;;  %s5988_s29 = smov 126  }
 0x1e3   : > { %v822_v13 = vsub.f32 %v766_v41, %v817_v8  ;;  %v823_v14 = vsub.f32 %v768_v43, %v817_v8 }
 0x1e4   : > { %s816_s24 = ssub.f32 %s814_s23, %s815_s22  ;;  %s5994_s22 = smov 120  }
 0x1e5   : > { %s5990_s23 = smov 124  }
 0x1e6   : > { %s824_s20 = sadd.f32 1e-05, %s816_s24  ;;  %s6000_s24 = smov 123  }
 0x1e8   : > { %v825_v6 = vstv %s824_s20  ;;  %s5998_s20 = smov 122  }
 0x1e9   : > { %4389 = vrsqrt.f32 %v825_v6 }
 0x1f3   : > { %v4390_v7 = vpop.eup %4389 }
 0x1f4   : > { %4035 = vpush %v4390_v7 }
 0x225   : > { %s4036_s2 = spop %4035 }
 0x226   : > { %v828_v15 = vstv %s4036_s2 }
 0x227   : > { %v829_v16 = vmul.f32 %v828_v15, %v818_v9  ;;  %v4693_v17 = vmul.f32 %v828_v15, %v819_v10  ;;  %v831_v18 = vmul.f32 %v828_v15, %v820_v11  ;;  %v832_v19 = vmul.f32 %v828_v15, %v821_v12 }
 0x228   : > { %v833_v20 = vmul.f32 %v828_v15, %v822_v13  ;;  %v834_v22 = vmul.f32 %v828_v15, %v823_v14 }
 0x229   : > { %v4695_v24 = vmax.f32 %v829_v16, 0.0  ;;  %v836_v21 = vmax.f32 %v4693_v17, 0.0  ;;  %v4698_v25 = vmax.f32 %v831_v18, 0.0  ;;  %v4700_v23 = vmax.f32 %v832_v19, 0.0 }
 0x22a   : > { %v4702_v26 = vmax.f32 %v833_v20, 0.0  ;;  %v840_v27 = vmax.f32 %v834_v22, 0.0 }
 0x22b   : > { %843 = vst [vmem:[#allocation2 + $0x10] sm:$0xff] %v4698_v25  ;;  %v4129_v28 = vpack.i.bf16 %v4698_v25, %v836_v21  ;;  %v4154_v29 = vpack.i.bf16 %v4700_v23, %v4695_v24 }
 0x22c   : > { %846 = vst.msk [vmem:[#allocation2 + $0x28] sm:$0xff] %vm776_vm2, %v840_v27  ;;  %v4234_v32 = vpack.i.bf16 %v4702_v26, %v4700_v23 }
 0x22d   : > { %4130 = vrot.lane.b32.xlu1 %v4129_v28, %s6004_s25  ;;  %4155 = vrot.lane.b32.xlu0 %v4154_v29, %s6002_s27 }
 0x231   : > { %4185 = vrot.lane.b32.xlu0 %v4129_v28, %s5996_s28  ;;  %4135 = vrot.lane.b32.xlu1 %v4154_v29, %s6004_s25 }
 0x233   : > { %v4718_v30 = vld [vmem:[#allocation2 + $0x28] sm:$0xff] }
 0x234   : > { %v4209_v31 = vpack.i.bf16 %v4718_v30, %v4702_v26 }
 0x235   : > { %1003 = vrot.lane.b32.xlu0 %v4695_v24, %s5996_s28  ;;  %4140 = vrot.lane.b32.xlu1 %v4129_v28, %s5988_s29 }
 0x239   : > { %4200 = vrot.lane.b32.xlu0 %v4129_v28, %s5994_s22  ;;  %4145 = vrot.lane.b32.xlu1 %v4129_v28, %s6002_s27 }
 0x23d   : > { %1027 = vrot.lane.b32.xlu0 %v4695_v24, %s5994_s22  ;;  %4150 = vrot.lane.b32.xlu1 %v4154_v29, %s5988_s29 }
 0x241   : > { %4210 = vrot.lane.b32.xlu0 %v4209_v31, %s5988_s29  ;;  %4160 = vrot.lane.b32.xlu1 %v4129_v28, %s5990_s23 }
 0x245   : > { %4220 = vrot.lane.b32.xlu0 %v4209_v31, %s5990_s23  ;;  %4165 = vrot.lane.b32.xlu1 %v4129_v28, %s6000_s24 }
 0x249   : > { %987 = vrot.lane.b32.xlu0 %v4702_v26, %s5998_s20  ;;  %4170 = vrot.lane.b32.xlu1 %v4154_v29, %s5990_s23  ;;  %s5992_s23 = smov 119  }
 0x24d   : > { %4235 = vrot.lane.b32.xlu0 %v4234_v32, %s5994_s22  ;;  %4175 = vrot.lane.b32.xlu1 %v4154_v29, %s6000_s24 }
 0x251   : > { %989 = vrot.lane.b32.xlu0 %v4718_v30, %s5998_s20  ;;  %4180 = vrot.lane.b32.xlu1 %v4129_v28, %s5998_s20 }
 0x255   : > { %1037 = vrot.lane.b32.xlu0 %v4718_v30, %s5994_s22  ;;  %4190 = vrot.lane.b32.xlu1 %v4154_v29, %s5998_s20 }
 0x259   : > { %1109 = vperm.xlu0 %4128, %v1106_v33   ;;  %4195 = vrot.lane.b32.xlu1 %v4209_v31, %s6004_s25 }
 0x25d   : > { %4205 = vrot.lane.b32.xlu1 %v4129_v28, %s5992_s23 }
 0x261   : > { %1051 = vrot.lane.b32.xlu1 %v4695_v24, %s5992_s23 }
 0x265   : > { %4215 = vrot.lane.b32.xlu1 %v4209_v31, %s6002_s27 }
 0x269   : > { %4225 = vrot.lane.b32.xlu1 %v4209_v31, %s6000_s24 }
 0x26d   : > { %4230 = vrot.lane.b32.xlu1 %v4234_v32, %s5996_s28 }
 0x271   : > { %4240 = vrot.lane.b32.xlu1 %v4234_v32, %s5992_s23 }
 0x275   : > { %1013 = vrot.lane.b32.xlu1 %v4718_v30, %s5996_s28 }
 0x279   : > { %1061 = vrot.lane.b32.xlu1 %v4718_v30, %s5992_s23  ;;  %s6046_s23 = sld [smem:[#allocation16_spill]] }
 0x29f   : > { %v4757_v34 = vpop.permute.xlu1 %4130  ;;  %v4777_v49 = vpop.permute.xlu0 %4155 }
 0x2a0   : > { %v4133_v35 = vunpack.i.h.bf16 %v4757_v34  ;;  %v4132_v36 = vunpack.i.l.bf16 %v4757_v34  ;;  %v4157_v54 = vunpack.i.l.bf16 %v4777_v49 }
 0x2a2   : > { %v873_v37 = vsel %vm6018_vm3, %v4132_v36, %v4133_v35 }
 0x2a3   : > { %v4764_v38 = vpop.permute.xlu1 %4135  ;;  %v1076_v39 = vpack.c.bf16 %v873_v37, %v836_v21  ;;  %v4791_v58 = vpop.permute.xlu0 %4185 }
 0x2a4   : > { %v4137_v40 = vunpack.i.l.bf16 %v4764_v38  ;;  %v4188_v12 = vunpack.i.h.bf16 %v4791_v58  ;;  %v4187_v13 = vunpack.i.l.bf16 %v4791_v58  ;;  %v4138_v29 = vunpack.i.h.bf16 %v4764_v38 }
 0x2a5   : > { %1116 = vmatprep.subr.bf16.mxu1 %v1076_v39 }
 0x2a6   : > { %v872_v41 = vsel %vm6018_vm3, %v4137_v40, %v4132_v36  ;;  %v874_v40 = vsel %vm6018_vm3, %v4133_v35, %v4138_v29 }
 0x2a7   : > { %v4768_v42 = vpop.permute.xlu1 %4140  ;;  %v1075_v43 = vpack.c.bf16 %v872_v41, %v4695_v24  ;;  %v1004_v3 = vpop.permute.xlu0 %1003  ;;  %v1017_v24 = vsel %vm6007_vm8, %v4187_v13, %v4188_v12  ;;  %v1077_v34 = vpack.c.bf16 %v874_v40, %v4698_v25 }
 0x2a8   : > { %v4143_v44 = vunpack.i.h.bf16 %v4768_v42  ;;  %v4142_v45 = vunpack.i.l.bf16 %v4768_v42  ;;  %v1016_v31 = vsel %vm6007_vm8, %v1004_v3, %v4187_v13 }
 0x2a9   : > { %1117 = vmatpush1.bf16.msra.mxu1 %v1075_v43 }
 0x2aa   : > { %v897_v50 = vsel %vm6015_vm5, %v4142_v45, %v4143_v44 }
 0x2ab   : > { %v4773_v46 = vpop.permute.xlu1 %4145  ;;  %v4810_v9 = vpop.permute.xlu0 %4200 }
 0x2ac   : > { %v4148_v47 = vunpack.i.h.bf16 %v4773_v46  ;;  %v4147_v48 = vunpack.i.l.bf16 %v4773_v46  ;;  %v4203_v41 = vunpack.i.h.bf16 %v4810_v9  ;;  %v4202_v43 = vunpack.i.l.bf16 %v4810_v9 }
 0x2ae   : > { %v921_v51 = vsel %vm6013_vm4, %v4147_v48, %v4148_v47  ;;  %v920_v56 = vsel %vm6013_vm4, %v4157_v54, %v4147_v48  ;;  %v1041_v54 = vsel %vm6010_vm10, %v4202_v43, %v4203_v41 }
 0x2af   : > { %v4785_v52 = vpop.permute.xlu1 %4150  ;;  %v1082_v53 = vpack.c.bf16 %v921_v51, %v897_v50  ;;  %v1028_v20 = vpop.permute.xlu0 %1027 }
 0x2b0   : > { %v4152_v55 = vunpack.i.l.bf16 %v4785_v52 }
 0x2b1   : > { %1118 = vmatprep.subr.bf16.mxu1 %v1082_v53 }
 0x2b2   : > { %v896_v57 = vsel %vm6015_vm5, %v4152_v55, %v4142_v45 }
 0x2b3   : > { %v4793_v59 = vpop.permute.xlu1 %4160  ;;  %v1081_v60 = vpack.c.bf16 %v920_v56, %v896_v57  ;;  %v4211_v33 = vpop.permute.xlu0 %4210  ;;  %v1040_v57 = vsel %vm6010_vm10, %v1028_v20, %v4202_v43 }
 0x2b4   : > { %v4163_v61 = vunpack.i.h.bf16 %v4793_v59  ;;  %v4162_v62 = vunpack.i.l.bf16 %v4793_v59  ;;  %v4213_v13 = vunpack.i.h.bf16 %v4211_v33 }
 0x2b5   : > { %1119 = vmatpush1.bf16.msra.mxu1 %v1081_v60  ;;  %v4153_v60 = vunpack.i.h.bf16 %v4785_v52 }
 0x2b6   : > { %v945_v4 = vsel %vm6012_vm6, %v4162_v62, %v4163_v61 }
 0x2b7   : > { %v4797_v63 = vpop.permute.xlu1 %4165  ;;  %v4847_v35 = vpop.permute.xlu0 %4220  ;;  %v898_v52 = vsel %vm6015_vm5, %v4143_v44, %v4153_v60 }
 0x2b8   : > { %v4168_v1 = vunpack.i.h.bf16 %v4797_v63  ;;  %v4167_v2 = vunpack.i.l.bf16 %v4797_v63  ;;  %v4222_v46 = vunpack.i.l.bf16 %v4847_v35 }
 0x2ba   : > { %v969_v5 = vsel %vm6011_vm7, %v4167_v2, %v4168_v1 }
 0x2bb   : > { %v4807_v6 = vpop.permute.xlu1 %4170  ;;  %v1088_v7 = vpack.c.bf16 %v969_v5, %v945_v4  ;;  %v4158_v5 = vunpack.i.h.bf16 %v4777_v49 }
 0x2bc   : > { %v4172_v8 = vunpack.i.l.bf16 %v4807_v6  ;;  %v4173_v49 = vunpack.i.h.bf16 %v4807_v6 }
 0x2bd   : > { %1120 = vmatprep.subr.bf16.mxu1 %v1088_v7  ;;  %v4861_v7 = vpop.permute.xlu0 %987 }
 0x2be   : > { %v944_v14 = vsel %vm6012_vm6, %v4172_v8, %v4162_v62  ;;  %v946_v43 = vsel %vm6012_vm6, %v4163_v61, %v4173_v49 }
 0x2bf   : > { %v4812_v10 = vpop.permute.xlu1 %4175 }
 0x2c0   : > { %v4177_v11 = vunpack.i.l.bf16 %v4812_v10 }
 0x2c2   : > { %v968_v15 = vsel %vm6011_vm7, %v4177_v11, %v4167_v2  ;;  %v4212_v2 = vunpack.i.l.bf16 %v4211_v33  ;;  %v4866_v11 = vld [vmem:[%s6046_s23] sm:$0xf]  ;;  %v947_v33 = vsel %vm6012_vm6, %v4173_v49, %v4222_v46 }
 0x2c3   : > { %v4819_v16 = vpop.permute.xlu1 %4180  ;;  %v1087_v17 = vpack.c.bf16 %v968_v15, %v944_v14 }
 0x2c4   : > { %v4183_v18 = vunpack.i.h.bf16 %v4819_v16  ;;  %v4182_v19 = vunpack.i.l.bf16 %v4819_v16  ;;  %v899_v44 = vsel %vm6015_vm5, %v4153_v60, %v4212_v2 }
 0x2c5   : > { %1121 = vmatpush1.bf16.msra.mxu1 %v1087_v17  ;;  %v4178_v17 = vunpack.i.h.bf16 %v4812_v10  ;;  %v4223_v10 = vunpack.i.h.bf16 %v4847_v35 }
 0x2c6   : > { %v993_v22 = vsel %vm6008_vm9, %v4182_v19, %v4183_v18 }
 0x2c7   : > { %v4829_v21 = vpop.permute.xlu1 %4190  ;;  %v1094_v27 = vpack.c.bf16 %v1017_v24, %v993_v22 }
 0x2c8   : > { %v4192_v28 = vunpack.i.l.bf16 %v4829_v21 }
 0x2c9   : > { %1122 = vmatprep.subr.bf16.mxu1 %v1094_v27 }
 0x2ca   : > { %v992_v32 = vsel %vm6008_vm9, %v4192_v28, %v4182_v19 }
 0x2cb   : > { %v4196_v36 = vpop.permute.xlu1 %4195  ;;  %v1093_v37 = vpack.c.bf16 %v1016_v31, %v992_v32  ;;  %v970_v31 = vsel %vm6011_vm7, %v4168_v1, %v4178_v17  ;;  %v948_v1 = vsel %vm6012_vm6, %v4222_v46, %v4223_v10 }
 0x2cc   : > { %v4197_v39 = vunpack.i.l.bf16 %v4196_v36  ;;  %v4198_v53 = vunpack.i.h.bf16 %v4196_v36  ;;  %v4193_v36 = vunpack.i.h.bf16 %v4829_v21 }
 0x2cd   : > { %1123 = vmatpush1.bf16.msra.mxu1 %v1093_v37 }
 0x2ce   : > { %v875_v38 = vsel %vm6018_vm3, %v4138_v29, %v4197_v39  ;;  %v876_v3 = vsel %vm6018_vm3, %v4197_v39, %v4198_v53  ;;  %v1080_v4 = vpack.c.bf16 %v4198_v53, %v4718_v30  ;;  %v922_v30 = vsel %vm6013_vm4, %v4148_v47, %v4158_v5  ;;  %v4236_v29 = vpop.permute.xlu0 %4235 }
 0x2cf   : > { %v4841_v45 = vpop.permute.xlu1 %4205  ;;  %v1078_v48 = vpack.c.bf16 %v875_v38, %v4700_v23  ;;  %v1079_v19 = vpack.c.bf16 %v876_v3, %v4702_v26  ;;  %v1083_v6 = vpack.c.bf16 %v922_v30, %v898_v52  ;;  %v900_v26 = vsel %vm6015_vm5, %v4212_v2, %v4213_v13 }
 0x2d0   : > { %v4208_v50 = vunpack.i.h.bf16 %v4841_v45  ;;  %v4207_v51 = vunpack.i.l.bf16 %v4841_v45  ;;  %v4238_v21 = vunpack.i.h.bf16 %v4236_v29  ;;  %v4237_v35 = vunpack.i.l.bf16 %v4236_v29 }
 0x2d1   : > { %1157 = vmatprep.subr.bf16.mxu0 %v1078_v48  ;;  %v995_v61 = vsel %vm6008_vm9, %v4193_v36, %v4861_v7 }
 0x2d2   : > { %1158 = vmatpush1.bf16.msra.mxu0 %v1077_v34  ;;  %v1065_v23 = vsel %vm6009_vm11, %v4207_v51, %v4208_v50  ;;  %v1089_v34 = vpack.c.bf16 %v970_v31, %v946_v43  ;;  %v1042_v58 = vsel %vm6010_vm10, %v4203_v41, %v4237_v35  ;;  %v1043_v16 = vsel %vm6010_vm10, %v4237_v35, %v4238_v21 }
 0x2d3   : > { %v1052_v55 = vpop.permute.xlu1 %1051  ;;  %v1100_v56 = vpack.c.bf16 %v1065_v23, %v1041_v54  ;;  %v994_v54 = vsel %vm6008_vm9, %v4183_v18, %v4193_v36 }
 0x2d4   : > { %v1064_v25 = vsel %vm6009_vm11, %v1052_v55, %v4207_v51  ;;  %v990_v55 = vpop.permute.xlu0 %989 }
 0x2d5   : > { %v1099_v62 = vpack.c.bf16 %v1064_v25, %v1040_v57  ;;  %1124 = vmatprep.subr.bf16.mxu1 %v1100_v56 }
 0x2d7   : > { %v4216_v8 = vpop.permute.xlu1 %4215  ;;  %1125 = vmatpush1.bf16.msra.mxu1 %v1099_v62 }
 0x2d8   : > { %v4218_v14 = vunpack.i.h.bf16 %v4216_v8  ;;  %v4217_v15 = vunpack.i.l.bf16 %v4216_v8  ;;  %1198 = vmatprep.subr.bf16.mxu1 %v1080_v4  ;;  %v1038_v52 = vpop.permute.xlu0 %1037 }
 0x2da   : > { %v924_v20 = vsel %vm6013_vm4, %v4217_v15, %v4218_v14  ;;  %3348 = vmatmul.mubr.msk.bf16.vlgmr.msra.gmra.mrb[4].mxu1 %vm6014_vm12, %v4866_v11  ;;  %v1086_v42 = vpack.c.bf16 %v4218_v14, %v4213_v13  ;;  %v923_v22 = vsel %vm6013_vm4, %v4158_v5, %v4217_v15  ;;  %v996_v5 = vsel %vm6008_vm9, %v4861_v7, %v990_v55 }
 0x2db   : > { %v4226_v24 = vpop.permute.xlu1 %4225  ;;  %1199 = vmatpush1.bf16.msra.mxu1 %v1079_v19  ;;  %v1084_v47 = vpack.c.bf16 %v923_v22, %v899_v44  ;;  %1230 = vmatprep.mubr.bf16.mxu1 %v4469_v0  ;;  %v1085_v32 = vpack.c.bf16 %v924_v20, %v900_v26 }
 0x2dc   : > { %v4228_v27 = vunpack.i.h.bf16 %v4226_v24  ;;  %v4227_v28 = vunpack.i.l.bf16 %v4226_v24  ;;  %1200 = vmatprep.subr.bf16.mxu1 %v1086_v42  ;;  %v1110_v19 = vpop.permute.xlu0 %1109 }
 0x2dd   : > { %1159 = vmatprep.subr.bf16.mxu0 %v1084_v47 }
 0x2de   : > { %v972_v37 = vsel %vm6011_vm7, %v4227_v28, %v4228_v27  ;;  %1160 = vmatpush1.bf16.msra.mxu0 %v1083_v6  ;;  %v1092_v39 = vpack.c.bf16 %v4228_v27, %v4223_v10  ;;  %v971_v40 = vsel %vm6011_vm7, %v4178_v17, %v4227_v28 }
 0x2df   : > { %v4231_v38 = vpop.permute.xlu1 %4230  ;;  %1201 = vmatpush1.bf16.msra.mxu1 %v1085_v32  ;;  %v1090_v63 = vpack.c.bf16 %v971_v40, %v947_v33  ;;  %v1091_v53 = vpack.c.bf16 %v972_v37, %v948_v1 }
 0x2e0   : > { %v4233_v48 = vunpack.i.h.bf16 %v4231_v38  ;;  %v4232_v51 = vunpack.i.l.bf16 %v4231_v38  ;;  %1202 = vmatprep.subr.bf16.mxu1 %v1092_v39 }
 0x2e1   : > { %1161 = vmatprep.subr.bf16.mxu0 %v1090_v63 }
 0x2e2   : > { %v1018_v59 = vsel %vm6007_vm8, %v4188_v12, %v4232_v51  ;;  %1162 = vmatpush1.bf16.msra.mxu0 %v1089_v34  ;;  %v1019_v23 = vsel %vm6007_vm8, %v4232_v51, %v4233_v48 }
 0x2e3   : > { %v4241_v56 = vpop.permute.xlu1 %4240  ;;  %1203 = vmatpush1.bf16.msra.mxu1 %v1091_v53  ;;  %v1096_v57 = vpack.c.bf16 %v1019_v23, %v995_v61  ;;  %v1095_v60 = vpack.c.bf16 %v1018_v59, %v994_v54 }
 0x2e4   : > { %v4243_v25 = vunpack.i.h.bf16 %v4241_v56  ;;  %v4242_v62 = vunpack.i.l.bf16 %v4241_v56 }
 0x2e5   : > { %1163 = vmatprep.subr.bf16.mxu0 %v1096_v57 }
 0x2e6   : > { %v1066_v12 = vsel %vm6009_vm11, %v4208_v50, %v4242_v62  ;;  %1164 = vmatpush1.bf16.msra.mxu0 %v1095_v60  ;;  %v1067_v18 = vsel %vm6009_vm11, %v4242_v62, %v4243_v25  ;;  %v1044_v50 = vsel %vm6010_vm10, %v4238_v21, %v1038_v52 }
 0x2e7   : > { %v1014_v2 = vpop.permute.xlu1 %1013  ;;  %v1102_v3 = vpack.c.bf16 %v1067_v18, %v1043_v16  ;;  %v1101_v4 = vpack.c.bf16 %v1066_v12, %v1042_v58 }
 0x2e8   : > { %v1020_v8 = vsel %vm6007_vm8, %v4233_v48, %v1014_v2  ;;  %v1098_v9 = vpack.c.bf16 %v1014_v2, %v990_v55 }
 0x2e9   : > { %v1097_v41 = vpack.c.bf16 %v1020_v8, %v996_v5  ;;  %1165 = vmatprep.subr.bf16.mxu0 %v1102_v3 }
 0x2ea   : > { %1166 = vmatpush1.bf16.msra.mxu0 %v1101_v4  ;;  %1204 = vmatprep.subr.bf16.mxu1 %v1098_v9 }
 0x2eb   : > { %v1062_v45 = vpop.permute.xlu1 %1061  ;;  %1205 = vmatpush1.bf16.msra.mxu1 %v1097_v41 }
 0x2ec   : > { %v1068_v13 = vsel %vm6009_vm11, %v4243_v25, %v1062_v45  ;;  %v1104_v14 = vpack.c.bf16 %v1062_v45, %v1038_v52 }
 0x2ed   : > { %v1103_v15 = vpack.c.bf16 %v1068_v13, %v1044_v50  ;;  %3349 = vmatmul.mubr.msk.bf16.vlgmr.msra.gmra.mrb[8].mxu0 %vm6014_vm12, %v4866_v11 }
 0x2ee   : > { %1206 = vmatprep.subr.bf16.mxu1 %v1104_v14  ;;  %1599 = vmatprep.mubr.bf16.mxu0 %v4469_v0 }
 0x2ef   : > { %1207 = vmatpush1.bf16.msra.mxu1 %v1103_v15 }
 0x2f2   : > { %3350 = vmatmul.mubr.msk.bf16.vlgmr.msra.gmra.mrb[8].mxu1 %vm6014_vm12, %v4866_v11 }
 0x2f3   : > { %1640 = vmatprep.mubr.bf16.mxu1 %v4469_v0 }
 0x3ad   : > { %v1150_v7 = vpop.f32.mrb[4].mxu1 }
 0x3ae   : > { %v1152_v30 = vpop.f32.mrb[5].mxu1  ;;  %v4925_v20 = vadd.f32 %v1150_v7, %v1110_v19 }
 0x3af   : > { %v1154_v49 = vpop.f32.mrb[6].mxu1  ;;  %v4927_v42 = vadd.f32 %v1152_v30, %v1110_v19 }
 0x3b0   : > { %v1155_v17 = vpop.f32.mrb[7].mxu1  ;;  %v1255_v44 = vmul.f32 %v4925_v20, %v4925_v20 }
 0x3b1   : > { %v1256_v22 = vmul.f32 %v4927_v42, %v4927_v42  ;;  %v1239_v11 = vadd.f32 %v4927_v42, %v4925_v20 }
 0x3b3   : > { %v1261_v10 = vadd.f32 %v1256_v22, %v1255_v44 }
 0x3c0   : > { %v1191_v46 = vpop.f32.mrb[8].mxu0 }
 0x3c1   : > { %v4935_v24 = vadd.f32 %v1191_v46, %v1110_v19  ;;  %v1193_v47 = vpop.f32.mrb[9].mxu0 }
 0x3c2   : > { %v4937_v6 = vadd.f32 %v1193_v47, %v1110_v19  ;;  %v1195_v26 = vpop.f32.mrb[10].mxu0 }
 0x3c3   : > { %v1240_v27 = vadd.f32 %v1239_v11, %v4935_v24  ;;  %v1257_v28 = vmul.f32 %v4935_v24, %v4935_v24  ;;  %v1196_v29 = vpop.f32.mrb[11].mxu0 }
 0x3c4   : > { %v1258_v31 = vmul.f32 %v4937_v6, %v4937_v6 }
 0x3c5   : > { %v1262_v32 = vadd.f32 %v1261_v10, %v1257_v28  ;;  %v1241_v33 = vadd.f32 %v1240_v27, %v4937_v6  ;;  %v1232_v36 = vpop.f32.mrb[8].mxu1 }
 0x3c6   : > { %v1233_v37 = vadd.f32 %v1232_v36, %v1110_v19  ;;  %v1234_v39 = vpop.f32.mrb[9].mxu1 }
 0x3c7   : > { %v1235_v40 = vadd.f32 %v1234_v39, %v1110_v19  ;;  %v1236_v43 = vpop.f32.mrb[10].mxu1  ;;  %v1263_v38 = vadd.f32 %v1262_v32, %v1258_v31 }
 0x3c8   : > { %v1259_v63 = vmul.f32 %v1233_v37, %v1233_v37  ;;  %v1237_v1 = vpop.f32.mrb[11].mxu1  ;;  %v1242_v48 = vadd.f32 %v1241_v33, %v1233_v37 }
 0x3c9   : > { %v1244_v51 = vsel %vm1243_vm13, %v1235_v40, 0.0  ;;  %v1260_v34 = vmul.f32 %v1235_v40, %v1235_v40 }
 0x3ca   : > { %v1245_v21 = vadd.f32 %v1244_v51, %v1242_v48  ;;  %v1264_v35 = vadd.f32 %v1263_v38, %v1259_v63 }
 0x3cb   : > { %v1265_v53 = vsel %vm1243_vm13, %v1260_v34, 0.0 }
 0x3cc   : > { %1246 = vadd.xlane.f32.xlu1 %v1245_v21  ;;  %v1266_v54 = vadd.f32 %v1265_v53, %v1264_v35 }
 0x3ce   : > { %1267 = vadd.xlane.f32.xlu0 %v1266_v54 }
 0x459   : > { %v1247_v59 = vpop.xlane.xlu1 %1246 }
 0x45a   : > { %v1248_v61 = vrot.slane %v1247_v59, 4 }
 0x45b   : > { %v1268_v23 = vpop.xlane.xlu0 %1267 }
 0x45c   : > { %v1249_v55 = vadd.f32 %v1248_v61, %v1247_v59  ;;  %v1269_v56 = vrot.slane %v1268_v23, 4 }
 0x45e   : > { %v1250_v57 = vrot.slane %v1249_v55, 2  ;;  %v1270_v60 = vadd.f32 %v1269_v56, %v1268_v23 }
 0x460   : > { %v1271_v25 = vrot.slane %v1270_v60, 2  ;;  %v1251_v62 = vadd.f32 %v1250_v57, %v1249_v55 }
 0x462   : > { %v1252_v58 = vrot.slane %v1251_v62, 1  ;;  %v1272_v12 = vadd.f32 %v1271_v25, %v1270_v60 }
 0x464   : > { %v1253_v16 = vadd.f32 %v1252_v58, %v1251_v62  ;;  %v1273_v18 = vrot.slane %v1272_v12, 1 }
 0x466   : > { %4037 = vpush %v1253_v16  ;;  %v1274_v2 = vadd.f32 %v1273_v18, %v1272_v12 }
 0x468   : > { %4039 = vpush %v1274_v2 }
 0x497   : > { %s4038_s23 = spop %4037 }
 0x498   : > { %s1278_s29 = smul.f32 0.00018089724, %s4038_s23  ;;  %s6052_s23 = smov 121  }
 0x499   : > { %s4040_s2 = spop %4039 }
 0x49a   : > { %s1282_s22 = smul.f32 %s1278_s29, %s1278_s29  ;;  %v1284_v5 = vstv %s1278_s29  ;;  %s6053_s29 = smov 120  }
 0x49b   : > { %s1281_s28 = smul.f32 0.00018089724, %s4040_s2  ;;  %v1285_v8 = vsub.f32 %v4925_v20, %v1284_v5  ;;  %v1286_v9 = vsub.f32 %v4927_v42, %v1284_v5  ;;  %v1287_v52 = vsub.f32 %v4935_v24, %v1284_v5  ;;  %v1288_v41 = vsub.f32 %v4937_v6, %v1284_v5  ;;  %s6054_s2 = smov 119  }
 0x49c   : > { %v1289_v45 = vsub.f32 %v1233_v37, %v1284_v5  ;;  %v1290_v50 = vsub.f32 %v1235_v40, %v1284_v5 }
 0x49d   : > { %s1283_s20 = ssub.f32 %s1281_s28, %s1282_s22  ;;  %s6048_s28 = smov 125  }
 0x49e   : > { %s6049_s22 = smov 124  }
 0x49f   : > { %s1291_s24 = sadd.f32 1e-05, %s1283_s20  ;;  %s6051_s20 = smov 122  }
 0x4a1   : > { %v1292_v3 = vstv %s1291_s24  ;;  %s6050_s24 = smov 123  }
 0x4a2   : > { %4391 = vrsqrt.f32 %v1292_v3 }
 0x4ac   : > { %v4392_v4 = vpop.eup %4391 }
 0x4ad   : > { %4041 = vpush %v4392_v4 }
 0x4de   : > { %s4042_s27 = spop %4041 }
 0x4df   : > { %v1295_v13 = vstv %s4042_s27  ;;  %s6047_s27 = smov 126  }
 0x4e0   : > { %v1296_v14 = vmul.f32 %v1295_v13, %v1285_v8  ;;  %v4951_v15 = vmul.f32 %v1295_v13, %v1286_v9  ;;  %v4953_v7 = vmul.f32 %v1295_v13, %v1287_v52  ;;  %v4955_v30 = vmul.f32 %v1295_v13, %v1288_v41 }
 0x4e1   : > { %v4957_v49 = vmul.f32 %v1295_v13, %v1289_v45  ;;  %v1301_v17 = vmul.f32 %v1295_v13, %v1290_v50 }
 0x4e2   : > { %v4959_v19 = vmax.f32 %v1296_v14, 0.0  ;;  %v1303_v20 = vmax.f32 %v4951_v15, 0.0  ;;  %v1304_v42 = vmax.f32 %v4953_v7, 0.0  ;;  %v1305_v44 = vmax.f32 %v4955_v30, 0.0 }
 0x4e3   : > { %v1306_v22 = vmax.f32 %v4957_v49, 0.0  ;;  %v1307_v46 = vmax.f32 %v1301_v17, 0.0 }
 0x4e4   : > { %1308 = vst [vmem:[#allocation3] sm:$0xff] %v4959_v19  ;;  %1326 = vrot.lane.b32.xlu1 %v4959_v19, %s6004_s25  ;;  %v4244_v11 = vpack.i.bf16 %v1304_v42, %v1303_v20 }
 0x4e5   : > { %1313 = vst.msk [vmem:[#allocation3 + $0x28] sm:$0xff] %vm1243_vm13, %v1307_v46  ;;  %v4289_v24 = vpack.i.bf16 %v1306_v22, %v1305_v44 }
 0x4e6   : > { %4245 = vrot.lane.b32.xlu0 %v4244_v11, %s6004_s25 }
 0x4e8   : > { %4250 = vrot.lane.b32.xlu1 %v4244_v11, %s6047_s27 }
 0x4ea   : > { %4255 = vrot.lane.b32.xlu0 %v4244_v11, %s6048_s28 }
 0x4ec   : > { %1349 = vrot.lane.b32.xlu1 %v4959_v19, %s6047_s27  ;;  %v5003_v47 = vld [vmem:[#allocation3 + $0x28] sm:$0xff] }
 0x4ee   : > { %1372 = vrot.lane.b32.xlu0 %v4959_v19, %s6048_s28 }
 0x4f0   : > { %4260 = vrot.lane.b32.xlu1 %v4244_v11, %s6049_s22 }
 0x4f2   : > { %4265 = vrot.lane.b32.xlu0 %v4244_v11, %s6050_s24 }
 0x4f4   : > { %1395 = vrot.lane.b32.xlu1 %v4959_v19, %s6049_s22 }
 0x4f6   : > { %1418 = vrot.lane.b32.xlu0 %v4959_v19, %s6050_s24 }
 0x4f8   : > { %4270 = vrot.lane.b32.xlu1 %v4244_v11, %s6051_s20 }
 0x4fa   : > { %4275 = vrot.lane.b32.xlu0 %v4244_v11, %s6052_s23 }
 0x4fc   : > { %1441 = vrot.lane.b32.xlu1 %v4959_v19, %s6051_s20 }
 0x4fe   : > { %1464 = vrot.lane.b32.xlu0 %v4959_v19, %s6052_s23 }
 0x500   : > { %4280 = vrot.lane.b32.xlu1 %v4244_v11, %s6053_s29 }
 0x502   : > { %4285 = vrot.lane.b32.xlu0 %v4244_v11, %s6054_s2 }
 0x504   : > { %1487 = vrot.lane.b32.xlu1 %v4959_v19, %s6053_s29 }
 0x506   : > { %1510 = vrot.lane.b32.xlu0 %v4959_v19, %s6054_s2 }
 0x508   : > { %4290 = vrot.lane.b32.xlu1 %v4289_v24, %s6004_s25 }
 0x50a   : > { %4295 = vrot.lane.b32.xlu0 %v4289_v24, %s6047_s27 }
 0x50c   : > { %4300 = vrot.lane.b32.xlu1 %v4289_v24, %s6048_s28 }
 0x50e   : > { %1336 = vrot.lane.b32.xlu0 %v5003_v47, %s6004_s25 }
 0x510   : > { %4305 = vrot.lane.b32.xlu1 %v4289_v24, %s6049_s22 }
 0x512   : > { %4310 = vrot.lane.b32.xlu0 %v4289_v24, %s6050_s24 }
 0x514   : > { %1359 = vrot.lane.b32.xlu1 %v5003_v47, %s6047_s27 }
 0x516   : > { %1382 = vrot.lane.b32.xlu0 %v5003_v47, %s6048_s28 }
 0x518   : > { %4315 = vrot.lane.b32.xlu1 %v4289_v24, %s6051_s20 }
 0x51a   : > { %4320 = vrot.lane.b32.xlu0 %v4289_v24, %s6052_s23 }
 0x51c   : > { %1405 = vrot.lane.b32.xlu1 %v5003_v47, %s6049_s22 }
 0x51e   : > { %1428 = vrot.lane.b32.xlu0 %v5003_v47, %s6050_s24 }
 0x520   : > { %4325 = vrot.lane.b32.xlu1 %v4289_v24, %s6053_s29 }
 0x522   : > { %4330 = vrot.lane.b32.xlu0 %v4289_v24, %s6054_s2 }
 0x524   : > { %1451 = vrot.lane.b32.xlu1 %v5003_v47, %s6051_s20 }
 0x526   : > { %1474 = vrot.lane.b32.xlu0 %v5003_v47, %s6052_s23 }
 0x528   : > { %1497 = vrot.lane.b32.xlu1 %v5003_v47, %s6053_s29 }
 0x52a   : > { %1520 = vrot.lane.b32.xlu0 %v5003_v47, %s6054_s2 }
 0x556   : > { %v1327_v6 = vpop.permute.xlu1 %1326 }
 0x558   : > { %v5029_v26 = vpop.permute.xlu0 %4245 }
 0x559   : > { %v4248_v10 = vunpack.i.h.bf16 %v5029_v26  ;;  %v4247_v27 = vunpack.i.l.bf16 %v5029_v26 }
 0x55a   : > { %v5033_v28 = vpop.permute.xlu1 %4250 }
 0x55b   : > { %v1338_v29 = vsel %vm6018_vm3, %v1327_v6, %v4247_v27  ;;  %v4253_v31 = vunpack.i.h.bf16 %v5033_v28  ;;  %v4252_v32 = vunpack.i.l.bf16 %v5033_v28  ;;  %v1339_v33 = vsel %vm6018_vm3, %v4247_v27, %v4248_v10 }
 0x55c   : > { %v1533_v36 = vpack.c.bf16 %v1338_v29, %v4959_v19  ;;  %v5042_v37 = vpop.permute.xlu0 %4255  ;;  %v1534_v39 = vpack.c.bf16 %v1339_v33, %v1303_v20 }
 0x55d   : > { %v4258_v40 = vunpack.i.h.bf16 %v5042_v37  ;;  %v4257_v43 = vunpack.i.l.bf16 %v5042_v37  ;;  %v1362_v63 = vsel %vm6015_vm5, %v4252_v32, %v4253_v31 }
 0x55e   : > { %1567 = vmatprep.subr.bf16.mxu0 %v1534_v39  ;;  %v1350_v38 = vpop.permute.xlu1 %1349 }
 0x55f   : > { %1568 = vmatpush1.bf16.msra.mxu0 %v1533_v36  ;;  %v1385_v1 = vsel %vm6013_vm4, %v4257_v43, %v4258_v40  ;;  %v1361_v34 = vsel %vm6015_vm5, %v1350_v38, %v4252_v32 }
 0x560   : > { %v1373_v48 = vpop.permute.xlu0 %1372  ;;  %v1540_v51 = vpack.c.bf16 %v1385_v1, %v1362_v63 }
 0x561   : > { %v1384_v21 = vsel %vm6013_vm4, %v1373_v48, %v4257_v43 }
 0x562   : > { %v1539_v35 = vpack.c.bf16 %v1384_v21, %v1361_v34  ;;  %v5054_v53 = vpop.permute.xlu1 %4260  ;;  %1569 = vmatprep.subr.bf16.mxu0 %v1540_v51  ;;  %v5105_v51 = vld [vmem:[%s6055_s5] sm:$0xf] }
 0x563   : > { %v4263_v54 = vunpack.i.h.bf16 %v5054_v53  ;;  %v4262_v59 = vunpack.i.l.bf16 %v5054_v53 }
 0x564   : > { %v5058_v61 = vpop.permute.xlu0 %4265  ;;  %1570 = vmatpush1.bf16.msra.mxu0 %v1539_v35 }
 0x565   : > { %v4268_v23 = vunpack.i.h.bf16 %v5058_v61  ;;  %v4267_v55 = vunpack.i.l.bf16 %v5058_v61  ;;  %v1408_v57 = vsel %vm6012_vm6, %v4262_v59, %v4263_v54 }
 0x566   : > { %v1396_v56 = vpop.permute.xlu1 %1395 }
 0x567   : > { %v1431_v60 = vsel %vm6011_vm7, %v4267_v55, %v4268_v23  ;;  %v1407_v58 = vsel %vm6012_vm6, %v1396_v56, %v4262_v59 }
 0x568   : > { %v1419_v25 = vpop.permute.xlu0 %1418  ;;  %v1546_v62 = vpack.c.bf16 %v1431_v60, %v1408_v57 }
 0x569   : > { %v1430_v12 = vsel %vm6011_vm7, %v1419_v25, %v4267_v55 }
 0x56a   : > { %v1545_v16 = vpack.c.bf16 %v1430_v12, %v1407_v58  ;;  %v5070_v18 = vpop.permute.xlu1 %4270  ;;  %1571 = vmatprep.subr.bf16.mxu0 %v1546_v62 }
 0x56b   : > { %v4273_v2 = vunpack.i.h.bf16 %v5070_v18  ;;  %v4272_v3 = vunpack.i.l.bf16 %v5070_v18 }
 0x56c   : > { %v5074_v4 = vpop.permute.xlu0 %4275  ;;  %1572 = vmatpush1.bf16.msra.mxu0 %v1545_v16 }
 0x56d   : > { %v4278_v5 = vunpack.i.h.bf16 %v5074_v4  ;;  %v4277_v8 = vunpack.i.l.bf16 %v5074_v4  ;;  %v1454_v52 = vsel %vm6008_vm9, %v4272_v3, %v4273_v2 }
 0x56e   : > { %v1442_v9 = vpop.permute.xlu1 %1441 }
 0x56f   : > { %v1477_v41 = vsel %vm6007_vm8, %v4277_v8, %v4278_v5  ;;  %v1453_v13 = vsel %vm6008_vm9, %v1442_v9, %v4272_v3 }
 0x570   : > { %v1465_v45 = vpop.permute.xlu0 %1464  ;;  %v1552_v50 = vpack.c.bf16 %v1477_v41, %v1454_v52 }
 0x571   : > { %v1476_v14 = vsel %vm6007_vm8, %v1465_v45, %v4277_v8 }
 0x572   : > { %v1551_v15 = vpack.c.bf16 %v1476_v14, %v1453_v13  ;;  %v5086_v17 = vpop.permute.xlu1 %4280  ;;  %1573 = vmatprep.subr.bf16.mxu0 %v1552_v50 }
 0x573   : > { %v4283_v19 = vunpack.i.h.bf16 %v5086_v17  ;;  %v4282_v20 = vunpack.i.l.bf16 %v5086_v17 }
 0x574   : > { %v5090_v46 = vpop.permute.xlu0 %4285  ;;  %1574 = vmatpush1.bf16.msra.mxu0 %v1551_v15 }
 0x575   : > { %v4288_v11 = vunpack.i.h.bf16 %v5090_v46  ;;  %v4287_v24 = vunpack.i.l.bf16 %v5090_v46  ;;  %v1500_v27 = vsel %vm6010_vm10, %v4282_v20, %v4283_v19 }
 0x576   : > { %v1488_v6 = vpop.permute.xlu1 %1487 }
 0x577   : > { %v1523_v29 = vsel %vm6009_vm11, %v4287_v24, %v4288_v11  ;;  %v1499_v36 = vsel %vm6010_vm10, %v1488_v6, %v4282_v20 }
 0x578   : > { %v1511_v32 = vpop.permute.xlu0 %1510  ;;  %v1558_v33 = vpack.c.bf16 %v1523_v29, %v1500_v27 }
 0x579   : > { %v1522_v39 = vsel %vm6009_vm11, %v1511_v32, %v4287_v24 }
 0x57a   : > { %v1557_v43 = vpack.c.bf16 %v1522_v39, %v1499_v36  ;;  %v4291_v38 = vpop.permute.xlu1 %4290  ;;  %1575 = vmatprep.subr.bf16.mxu0 %v1558_v33 }
 0x57b   : > { %v4293_v63 = vunpack.i.h.bf16 %v4291_v38  ;;  %v4292_v1 = vunpack.i.l.bf16 %v4291_v38 }
 0x57c   : > { %v4296_v48 = vpop.permute.xlu0 %4295  ;;  %1576 = vmatpush1.bf16.msra.mxu0 %v1557_v43 }
 0x57d   : > { %v1340_v34 = vsel %vm6018_vm3, %v4248_v10, %v4292_v1  ;;  %v4298_v21 = vunpack.i.h.bf16 %v4296_v48  ;;  %v4297_v35 = vunpack.i.l.bf16 %v4296_v48  ;;  %v1341_v59 = vsel %vm6018_vm3, %v4292_v1, %v4293_v63 }
 0x57e   : > { %v1535_v55 = vpack.c.bf16 %v1340_v34, %v1304_v42  ;;  %v4301_v56 = vpop.permute.xlu1 %4300  ;;  %v1536_v57 = vpack.c.bf16 %v1341_v59, %v1305_v44 }
 0x57f   : > { %v4303_v60 = vunpack.i.h.bf16 %v4301_v56  ;;  %v4302_v25 = vunpack.i.l.bf16 %v4301_v56  ;;  %3351 = vmatmul.mubr.msk.bf16.vlgmr.msra.gmra.mrb[12].mxu0 %vm6014_vm12, %v5105_v51  ;;  %v1363_v26 = vsel %vm6015_vm5, %v4253_v31, %v4297_v35  ;;  %v1364_v62 = vsel %vm6015_vm5, %v4297_v35, %v4298_v21 }
 0x580   : > { %v1337_v10 = vpop.permute.xlu0 %1336  ;;  %1608 = vmatprep.subr.bf16.mxu1 %v1536_v57  ;;  %1681 = vmatprep.mubr.bf16.mxu0 %v4469_v0 }
 0x581   : > { %v1386_v7 = vsel %vm6013_vm4, %v4258_v40, %v4302_v25  ;;  %v1342_v30 = vsel %vm6018_vm3, %v4293_v63, %v1337_v10  ;;  %v1538_v42 = vpack.c.bf16 %v1337_v10, %v5003_v47  ;;  %1609 = vmatpush1.bf16.msra.mxu1 %v1535_v55  ;;  %v1387_v44 = vsel %vm6013_vm4, %v4302_v25, %v4303_v60 }
 0x582   : > { %v1541_v28 = vpack.c.bf16 %v1386_v7, %v1363_v26  ;;  %v1537_v31 = vpack.c.bf16 %v1342_v30, %v1306_v22  ;;  %v4306_v58 = vpop.permute.xlu1 %4305  ;;  %v1542_v12 = vpack.c.bf16 %v1387_v44, %v1364_v62 }
 0x583   : > { %v4308_v16 = vunpack.i.h.bf16 %v4306_v58  ;;  %v4307_v3 = vunpack.i.l.bf16 %v4306_v58  ;;  %1649 = vmatprep.subr.bf16.mxu0 %v1538_v42 }
 0x584   : > { %v4311_v8 = vpop.permute.xlu0 %4310  ;;  %1610 = vmatprep.subr.bf16.mxu1 %v1542_v12  ;;  %1650 = vmatpush1.bf16.msra.mxu0 %v1537_v31 }
 0x585   : > { %v4313_v37 = vunpack.i.h.bf16 %v4311_v8  ;;  %v4312_v40 = vunpack.i.l.bf16 %v4311_v8  ;;  %1611 = vmatpush1.bf16.msra.mxu1 %v1541_v28  ;;  %v1409_v47 = vsel %vm6012_vm6, %v4263_v54, %v4307_v3  ;;  %v1410_v22 = vsel %vm6012_vm6, %v4307_v3, %v4308_v16 }
 0x586   : > { %v1360_v9 = vpop.permute.xlu1 %1359  ;;  %v1690_v54 = vlaneseq }
 0x587   : > { %v1432_v49 = vsel %vm6011_vm7, %v4268_v23, %v4312_v40  ;;  %v1433_v52 = vsel %vm6011_vm7, %v4312_v40, %v4313_v37  ;;  %v1365_v13 = vsel %vm6015_vm5, %v4298_v21, %v1360_v9 }
 0x588   : > { %v1547_v41 = vpack.c.bf16 %v1432_v49, %v1409_v47  ;;  %v1383_v45 = vpop.permute.xlu0 %1382  ;;  %v1548_v50 = vpack.c.bf16 %v1433_v52, %v1410_v22  ;;  %v5140_v32 = vshrl.u32 %v1690_v54, 7  ;;  %v5142_v33 = vand.u32 127, %v1690_v54 }
 0x589   : > { %v1388_v14 = vsel %vm6013_vm4, %v4303_v60, %v1383_v45  ;;  %v1544_v15 = vpack.c.bf16 %v1383_v45, %v1360_v9  ;;  %v4479_v49 = vmov 1.0|1.0  }
 0x58a   : > { %v1543_v20 = vpack.c.bf16 %v1388_v14, %v1365_v13  ;;  %v4316_v53 = vpop.permute.xlu1 %4315  ;;  %1612 = vmatprep.subr.bf16.mxu1 %v1548_v50  ;;  %v5158_v4 = vadd.s32 136, %v5140_v32  ;;  %v5164_v60 = vadd.s32 8, %v5140_v32  ;;  %v5167_v10 = vadd.s32 144, %v5140_v32 }
 0x58b   : > { %v4318_v24 = vunpack.i.h.bf16 %v4316_v53  ;;  %v4317_v61 = vunpack.i.l.bf16 %v4316_v53  ;;  %1613 = vmatpush1.bf16.msra.mxu1 %v1547_v41  ;;  %1651 = vmatprep.subr.bf16.mxu0 %v1544_v15  ;;  %v5170_v62 = vadd.s32 152, %v5140_v32  ;;  %v5179_v30 = vadd.s32 16, %v5140_v32 }
 0x58c   : > { %v4321_v23 = vpop.permute.xlu0 %4320  ;;  %1652 = vmatpush1.bf16.msra.mxu0 %v1543_v20  ;;  %v5192_v3 = vadd.s32 24, %v5140_v32  ;;  %v5211_v40 = vadd.s32 160, %v5140_v32  ;;  %v5214_v9 = vadd.s32 168, %v5140_v32  ;;  %v5234_v52 = vadd.s32 32, %v5140_v32 }
 0x58d   : > { %v4323_v6 = vunpack.i.h.bf16 %v4321_v23  ;;  %v4322_v27 = vunpack.i.l.bf16 %v4321_v23  ;;  %v1455_v36 = vsel %vm6008_vm9, %v4273_v2, %v4317_v61  ;;  %v1456_v43 = vsel %vm6008_vm9, %v4317_v61, %v4318_v24 }
 0x58e   : > { %v1406_v29 = vpop.permute.xlu1 %1405  ;;  %v5155_v2 = vadd.s32 128, %v5140_v32  ;;  %v5237_v41 = vadd.s32 40, %v5140_v32  ;;  %v6060_v14 = vmov 0  ;;  %v5252_v15 = vadd.s32 176, %v5140_v32 }
 0x58f   : > { %v1478_v39 = vsel %vm6007_vm8, %v4278_v5, %v4322_v27  ;;  %v1479_v38 = vsel %vm6007_vm8, %v4322_v27, %v4323_v6  ;;  %v1411_v34 = vsel %vm6012_vm6, %v4308_v16, %v1406_v29  ;;  %v5161_v5 = vmul.u32 2, %v5142_v33 }
 0x590   : > { %v1553_v63 = vpack.c.bf16 %v1478_v39, %v1455_v36  ;;  %v1429_v1 = vpop.permute.xlu0 %1428  ;;  %v1554_v48 = vpack.c.bf16 %v1479_v38, %v1456_v43  ;;  %v5261_v53 = vadd.s32 184, %v5140_v32  ;;  %v5297_v23 = vadd.s32 56, %v5140_v32 }
 0x591   : > { %v1434_v21 = vsel %vm6011_vm7, %v4313_v37, %v1429_v1  ;;  %v1550_v35 = vpack.c.bf16 %v1429_v1, %v1406_v29  ;;  %vm1742_vm14 = vcmp.eq.s32.totalorder %v5155_v2, %v5161_v5  ;;  %vm1743_vm15 = vcmp.eq.s32.totalorder %v5158_v4, %v5161_v5 }
 0x592   : > { %v1549_v59 = vpack.c.bf16 %v1434_v21, %v1411_v34  ;;  %v4326_v18 = vpop.permute.xlu1 %4325  ;;  %1614 = vmatprep.subr.bf16.mxu1 %v1554_v48  ;;  %vm1726_vm0 = vcmp.eq.s32.totalorder %v5140_v32, %v5161_v5  ;;  %vm1727_vm2 = vcmp.eq.s32.totalorder %v5164_v60, %v5161_v5  ;;  %vm5202_vm13 = vmpackc.low %vm1743_vm15, %vm1742_vm14  ;;  %vm1744_vm1 = vcmp.eq.s32.totalorder %v5167_v10, %v5161_v5 }
 0x593   : > { %v4328_v55 = vunpack.i.h.bf16 %v4326_v18  ;;  %v4327_v56 = vunpack.i.l.bf16 %v4326_v18  ;;  %1615 = vmatpush1.bf16.msra.mxu1 %v1553_v63  ;;  %1653 = vmatprep.subr.bf16.mxu0 %v1550_v35  ;;  %vm5225_vm14 = vmpackc.low %vm1727_vm2, %vm1726_vm0  ;;  %vm1728_vm15 = vcmp.eq.s32.totalorder %v5179_v30, %v5161_v5  ;;  %vm6016_vm2 = vcmp.eq.s32.totalorder %v5211_v40, %v5161_v5 }
 0x594   : > { %v4331_v57 = vpop.permute.xlu0 %4330  ;;  %1654 = vmatpush1.bf16.msra.mxu0 %v1549_v59  ;;  %vm1749_vm7 = vcmp.eq.s32.totalorder %v5261_v53, %v5161_v5  ;;  %v5310_v27 = vadd.s32 200, %v5140_v32  ;;  %vm1733_vm5 = vcmp.eq.s32.totalorder %v5297_v23, %v5161_v5  ;;  %v5336_v36 = vadd.s32 64, %v5140_v32 }
 0x595   : > { %v4333_v25 = vunpack.i.h.bf16 %v4331_v57  ;;  %v4332_v26 = vunpack.i.l.bf16 %v4331_v57  ;;  %v1501_v42 = vsel %vm6010_vm10, %v4283_v19, %v4327_v56  ;;  %v1502_v28 = vsel %vm6010_vm10, %v4327_v56, %v4328_v55 }
 0x596   : > { %v1452_v7 = vpop.permute.xlu1 %1451  ;;  %v5339_v39 = vadd.s32 72, %v5140_v32  ;;  %v5342_v43 = vadd.s32 208, %v5140_v32  ;;  %v5352_v38 = vadd.s32 216, %v5140_v32  ;;  %v5365_v1 = vadd.s32 80, %v5140_v32 }
 0x597   : > { %v1524_v44 = vsel %vm6009_vm11, %v4288_v11, %v4332_v26  ;;  %v1525_v31 = vsel %vm6009_vm11, %v4332_v26, %v4333_v25  ;;  %v1457_v17 = vsel %vm6008_vm9, %v4318_v24, %v1452_v7  ;;  %v6056_v11 = vmov 0 }
 0x598   : > { %v1559_v58 = vpack.c.bf16 %v1524_v44, %v1501_v42  ;;  %v1475_v12 = vpop.permute.xlu0 %1474  ;;  %v1560_v16 = vpack.c.bf16 %v1525_v31, %v1502_v28  ;;  %v6057_v11 = vsel %vm5202_vm13, 4294967295, %v6056_v11  ;;  %vm1729_vm9 = vcmp.eq.s32.totalorder %v5192_v3, %v5161_v5 }
 0x599   : > { %v1480_v19 = vsel %vm6007_vm8, %v4323_v6, %v1475_v12  ;;  %v1556_v46 = vpack.c.bf16 %v1475_v12, %v1452_v7  ;;  %vm1745_vm8 = vcmp.eq.s32.totalorder %v5170_v62, %v5161_v5  ;;  %v5280_v24 = vadd.s32 48, %v5140_v32 }
 0x59a   : > { %v1555_v8 = vpack.c.bf16 %v1480_v19, %v1457_v17  ;;  %v1498_v37 = vpop.permute.xlu1 %1497  ;;  %1616 = vmatprep.subr.bf16.mxu1 %v1560_v16  ;;  %vm5247_vm0 = vmpackc.low %vm1745_vm8, %vm1744_vm1  ;;  %v5307_v6 = vadd.s32 192, %v5140_v32  ;;  %v5381_v34 = vadd.s32 88, %v5140_v32  ;;  %v5389_v21 = vadd.s32 224, %v5140_v32 }
 0x59b   : > { %1617 = vmatpush1.bf16.msra.mxu1 %v1559_v58  ;;  %1655 = vmatprep.subr.bf16.mxu0 %v1556_v46  ;;  %v1503_v45 = vsel %vm6010_vm10, %v4328_v55, %v1498_v37  ;;  %v6061_v14 = vsel %vm5247_vm0, 4294967295, %v6060_v14  ;;  %vm5275_vm1 = vmpackc.low %vm1729_vm9, %vm1728_vm15  ;;  %vm1730_vm10 = vcmp.eq.s32.totalorder %v5234_v52, %v5161_v5  ;;  %vm1731_vm9 = vcmp.eq.s32.totalorder %v5237_v41, %v5161_v5  ;;  %v2050_v46 = vld [vmem:[%s6086_s6] sm:$0xff] }
 0x59c   : > { %v1521_v47 = vpop.permute.xlu0 %1520  ;;  %1656 = vmatpush1.bf16.msra.mxu0 %v1555_v8  ;;  %3867 = vmatprep.subr.msk.bf16.mxu1 %vm5202_vm13, %v4479_v49  ;;  %vm1748_vm15 = vcmp.eq.s32.totalorder %v5252_v15, %v5161_v5  ;;  %vm5320_vm6 = vmpackc.low %vm1731_vm9, %vm1730_vm10  ;;  %vm1732_vm4 = vcmp.eq.s32.totalorder %v5280_v24, %v5161_v5  ;;  %vm1751_vm10 = vcmp.eq.s32.totalorder %v5310_v27, %v5161_v5  ;;  %v5392_v35 = vadd.s32 232, %v5140_v32 }
 0x59d   : > { %v1526_v50 = vsel %vm6009_vm11, %v4333_v25, %v1521_v47  ;;  %v1562_v13 = vpack.c.bf16 %v1521_v47, %v1498_v37  ;;  %vm6017_vm11 = vcmp.eq.s32.totalorder %v5214_v9, %v5161_v5  ;;  %vm5360_vm9 = vmpackc.low %vm1733_vm5, %vm1732_vm4  ;;  %vm1735_vm4 = vcmp.eq.s32.totalorder %v5339_v39, %v5161_v5  ;;  %2053 = vperm.xlu1 %4334, %v2050_v46  }
 0x59e   : > { %v1561_v20 = vpack.c.bf16 %v1526_v50, %v1503_v45  ;;  %3352 = vmatmul.mubr.msk.bf16.vlgmr.msra.gmra.mrb[12].mxu1 %vm6014_vm12, %v5105_v51  ;;  %vm5288_vm8 = vmpackc.low %vm6017_vm11, %vm6016_vm2  ;;  %vm1734_vm2 = vcmp.eq.s32.totalorder %v5336_v36, %v5161_v5  ;;  %vm1752_vm5 = vcmp.eq.s32.totalorder %v5342_v43, %v5161_v5  ;;  %v5395_v59 = vadd.s32 248, %v5140_v32 }
 0x59f   : > { %1657 = vmatprep.subr.bf16.mxu0 %v1562_v13  ;;  %3869 = vmatpush3.bf16.msk.msra.mxu1 %vm5225_vm14, %v4479_v49  ;;  %v5408_v55 = vadd.s32 96, %v5140_v32  ;;  %vm1736_vm11 = vcmp.eq.s32.totalorder %v5365_v1, %v5161_v5  ;;  %v5422_v57 = vadd.s32 104, %v5140_v32  ;;  %v5432_v25 = vadd.s32 240, %v5140_v32 }
 0x5a0   : > { %1658 = vmatpush1.bf16.msra.mxu0 %v1561_v20  ;;  %3871 = vmatprep.subr.msk.bf16.mxu1 %vm5247_vm0, %v4479_v49  ;;  %v4480_v42 = vmov 0.0   ;;  %v5459_v28 = vadd.s32 112, %v5140_v32  ;;  %v5462_v31 = vadd.s32 120, %v5140_v32  ;;  %v4481_v12 = vmov 1.0  }
 0x5a1   : > { %3900 = vmatprep.subr.msk.bf16.mxu0 %vm5202_vm13, %v4479_v49  ;;  %vm1738_vm3 = vcmp.eq.s32.totalorder %v5408_v55, %v5161_v5  ;;  %vm1739_vm13 = vcmp.eq.s32.totalorder %v5422_v57, %v5161_v5  ;;  %v4482_v19 = vmov 0.0|0.0  }
 0x5a3   : > { %3353 = vmatmul.mubr.msk.bf16.vlgmr.msra.gmra.mrb[16].mxu0 %vm6014_vm12, %v5105_v51  ;;  %3873 = vmatpush3.bf16.msk.msra.mxu1 %vm5275_vm1, %v4479_v49  ;;  %vm5329_vm12 = vmpackc.low %vm1749_vm7, %vm1748_vm15  ;;  %vm1750_vm7 = vcmp.eq.s32.totalorder %v5307_v6, %v5161_v5 }
 0x5a4   : > { %3875 = vmatprep.subr.msk.bf16.mxu1 %vm5288_vm8, %v4479_v49  ;;  %3902 = vmatpush3.bf16.msk.msra.mxu0 %vm5225_vm14, %v4479_v49  ;;  %vm5370_vm15 = vmpackc.low %vm1751_vm10, %vm1750_vm7  ;;  %vm1753_vm7 = vcmp.eq.s32.totalorder %v5352_v38, %v5161_v5 }
 0x5a5   : > { %3904 = vmatprep.subr.msk.bf16.mxu0 %vm5247_vm0, %v4479_v49  ;;  %vm5413_vm10 = vmpackc.low %vm1753_vm7, %vm1752_vm5  ;;  %vm1755_vm5 = vcmp.eq.s32.totalorder %v5392_v35, %v5161_v5  ;;  %vm1757_vm7 = vcmp.eq.s32.totalorder %v5395_v59, %v5161_v5 }
 0x5a6   : > { %v3385_v44 = vsel %vm1757_vm7, 1.0, %v4480_v42  ;;  %vm1741_vm7 = vcmp.eq.s32.totalorder %v5462_v31, %v5161_v5 }
 0x5a7   : > { %3877 = vmatpush3.bf16.msk.msra.mxu1 %vm5320_vm6, %v4479_v49  ;;  %v3894_v16 = vpack.c.bf16 %v3385_v44, %v4481_v12 }
 0x5a8   : > { %3879 = vmatprep.subr.msk.bf16.mxu1 %vm5329_vm12, %v4479_v49  ;;  %3906 = vmatpush3.bf16.msk.msra.mxu0 %vm5275_vm1, %v4479_v49 }
 0x5a9   : > { %3908 = vmatprep.subr.msk.bf16.mxu0 %vm5288_vm8, %v4479_v49  ;;  %vm5403_vm8 = vmpackc.low %vm1735_vm4, %vm1734_vm2  ;;  %vm1737_vm2 = vcmp.eq.s32.totalorder %v5381_v34, %v5161_v5  ;;  %vm1754_vm4 = vcmp.eq.s32.totalorder %v5389_v21, %v5161_v5 }
 0x5aa   : > { %vm5451_vm0 = vmpackc.low %vm1755_vm5, %vm1754_vm4  ;;  %vm1740_vm5 = vcmp.eq.s32.totalorder %v5459_v28, %v5161_v5 }
 0x5ab   : > { %3881 = vmatpush3.bf16.msk.msra.mxu1 %vm5360_vm9, %v4479_v49  ;;  %vm5475_vm4 = vmpackc.low %vm1739_vm13, %vm1738_vm3  ;;  %vm6087_vm13 = vcmask 1039360  }
 0x5ac   : > { %3883 = vmatprep.subr.msk.bf16.mxu1 %vm5370_vm15, %v4479_v49  ;;  %3910 = vmatpush3.bf16.msk.msra.mxu0 %vm5320_vm6, %v4479_v49  ;;  %vm5493_vm3 = vmpackc.low %vm1741_vm7, %vm1740_vm5 }
 0x5ad   : > { %3912 = vmatprep.subr.msk.bf16.mxu0 %vm5329_vm12, %v4479_v49  ;;  %vm5442_vm12 = vmpackc.low %vm1737_vm2, %vm1736_vm11  ;;  %vm1756_vm11 = vcmp.eq.s32.totalorder %v5432_v25, %v5161_v5  ;;  %vm1825_vm2 = vcmask 1046528  }
 0x5af   : > { %3885 = vmatpush3.bf16.msk.msra.mxu1 %vm5403_vm8, %v4479_v49 }
 0x5b0   : > { %3887 = vmatprep.subr.msk.bf16.mxu1 %vm5413_vm10, %v4479_v49  ;;  %3914 = vmatpush3.bf16.msk.msra.mxu0 %vm5360_vm9, %v4479_v49 }
 0x5b1   : > { %3916 = vmatprep.subr.msk.bf16.mxu0 %vm5370_vm15, %v4479_v49  ;;  %vm3895_vm15 = vmpackc.low %vm1825_vm2, %vm1756_vm11  ;;  %vm2060_vm11 = vcmask 695296  }
 0x5b3   : > { %3889 = vmatpush3.bf16.msk.msra.mxu1 %vm5442_vm12, %v4479_v49 }
 0x5b4   : > { %3891 = vmatprep.subr.msk.bf16.mxu1 %vm5451_vm0, %v4479_v49  ;;  %3918 = vmatpush3.bf16.msk.msra.mxu0 %vm5403_vm8, %v4479_v49 }
 0x5b5   : > { %3920 = vmatprep.subr.msk.bf16.mxu0 %vm5413_vm10, %v4479_v49  ;;  %vm6092_vm10 = vcmp.eq.s32.totalorder %v5211_v40, %v5161_v5 }
 0x5b7   : > { %3893 = vmatpush3.bf16.msk.msra.mxu1 %vm5475_vm4, %v4479_v49 }
 0x5b8   : > { %3896 = vmatprep.subr.msk.bf16.mxu1 %vm3895_vm15, %v3894_v16  ;;  %3922 = vmatpush3.bf16.msk.msra.mxu0 %vm5442_vm12, %v4479_v49 }
 0x5b9   : > { %3924 = vmatprep.subr.msk.bf16.mxu0 %vm5451_vm0, %v4479_v49  ;;  %vm6089_vm0 = vnez %v6057_v11 }
 0x5bb   : > { %3898 = vmatpush3.bf16.msk.msra.mxu1 %vm5493_vm3, %v4479_v49 }
 0x5bc   : > { %3926 = vmatpush3.bf16.msk.msra.mxu0 %vm5475_vm4, %v4479_v49  ;;  %3932 = vmatprep.subr.bf16.mxu1 %v4482_v19 }
 0x5bd   : > { %3929 = vmatprep.subr.msk.bf16.mxu0 %vm3895_vm15, %v3894_v16 }
 0x5c0   : > { %3931 = vmatpush3.bf16.msk.msra.mxu0 %vm5493_vm3, %v4479_v49 }
 0x61c   : > { %v2054_v44 = vpop.permute.xlu1 %2053 }
 0x652   : > { %v1601_v8 = vpop.f32.mrb[12].mxu0 }
 0x653   : > { %v1603_v37 = vpop.f32.mrb[13].mxu0 }
 0x654   : > { %v1605_v47 = vpop.f32.mrb[14].mxu0  ;;  %3418 = vmatprep.mubr.msk.f32.mxu1 %vm6087_vm13, %v1603_v37 }
 0x655   : > { %v1606_v45 = vpop.f32.mrb[15].mxu0  ;;  %1894 = vmatmul.mubr.f32.vlgmr.msra.gmra.mrb[16].mxu1 %v1601_v8 }
 0x656   : > { %3934 = vmatpush1.bf16.msk.msra.mxu1 %vm5225_vm14, %v4479_v49  ;;  %vm1972_vm14 = vcmask 334848  }
 0x657   : > { %3935 = vmatprep.subr.bf16.mxu1 %v4482_v19 }
 0x65a   : > { %3937 = vmatpush1.bf16.msk.msra.mxu1 %vm5275_vm1, %v4479_v49  ;;  %vm6090_vm1 = vcmp.eq.s32.totalorder %v5214_v9, %v5161_v5 }
 0x65b   : > { %3938 = vmatprep.subr.bf16.mxu1 %v4482_v19  ;;  %v3375_v61 = vsel %vm6090_vm1, 1.0, %v4480_v42 }
 0x65c   : > { %v3963_v48 = vpack.c.bf16 %v3375_v61, %v4481_v12 }
 0x65e   : > { %3940 = vmatpush1.bf16.msk.msra.mxu1 %vm5320_vm6, %v4479_v49  ;;  %vm6088_vm6 = vmmov %vm6087_vm13 }
 0x65f   : > { %3941 = vmatprep.subr.bf16.mxu1 %v4482_v19 }
 0x662   : > { %3943 = vmatpush1.bf16.msk.msra.mxu1 %vm5360_vm9, %v4479_v49  ;;  %vm1976_vm9 = vcmask 1040384  }
 0x663   : > { %3944 = vmatprep.subr.bf16.mxu1 %v4482_v19 }
 0x666   : > { %3946 = vmatpush1.bf16.msk.msra.mxu1 %vm5403_vm8, %v4479_v49  ;;  %vm6091_vm8 = vnez %v6061_v14 }
 0x667   : > { %3947 = vmatprep.subr.bf16.mxu1 %v4482_v19 }
 0x66a   : > { %3949 = vmatpush1.bf16.msk.msra.mxu1 %vm5442_vm12, %v4479_v49  ;;  %vm3964_vm12 = vmpackc.low %vm1976_vm9, %vm6092_vm10 }
 0x66b   : > { %3950 = vmatprep.subr.bf16.mxu1 %v4482_v19 }
 0x66e   : > { %3952 = vmatpush1.bf16.msk.msra.mxu1 %vm5475_vm4, %v4479_v49 }
 0x66f   : > { %3953 = vmatprep.subr.bf16.mxu1 %v4482_v19 }
 0x671   : > { %v1642_v22 = vpop.f32.mrb[12].mxu1 }
 0x672   : > { %3955 = vmatpush1.bf16.msk.msra.mxu1 %vm5493_vm3, %v4479_v49  ;;  %v1644_v50 = vpop.f32.mrb[13].mxu1 }
 0x673   : > { %3451 = vmatprep.mubr.msk.f32.mxu0 %vm6088_vm6, %v1644_v50  ;;  %3956 = vmatprep.subr.bf16.mxu1 %v4482_v19  ;;  %v1646_v13 = vpop.f32.mrb[14].mxu1 }
 0x674   : > { %1967 = vmatmul.mubr.f32.vlgmr.msra.gmra.mrb[20].mxu0 %v1642_v22  ;;  %v1647_v20 = vpop.f32.mrb[15].mxu1 }
 0x675   : > { %2269 = vmatprep.mubr.bf16.mxu0 %v4469_v0 }
 0x676   : > { %3958 = vmatpush1.bf16.msk.msra.mxu1 %vm6089_vm0, %v4479_v49  ;;  %v1683_v54 = vpop.f32.mrb[16].mxu0 }
 0x677   : > { %3959 = vmatprep.subr.bf16.mxu1 %v4482_v19  ;;  %v1685_v29 = vpop.f32.mrb[17].mxu0 }
 0x678   : > { %v1687_v51 = vpop.f32.mrb[18].mxu0  ;;  %3474 = vmatprep.mubr.msk.f32.mxu1 %vm1972_vm14, %v1685_v29 }
 0x679   : > { %v1688_v63 = vpop.f32.mrb[19].mxu0 }
 0x67a   : > { %3961 = vmatpush1.bf16.msk.msra.mxu1 %vm6091_vm8, %v4479_v49 }
 0x67b   : > { %3962 = vmatprep.subr.bf16.mxu1 %v4482_v19 }
 0x67e   : > { %3965 = vmatpush1.bf16.msk.msra.mxu1 %vm3964_vm12, %v3963_v48 }
 0x681   : > { %2045 = vmatmul.mubr.f32.vlgmr.msra.gmra.mrb[18].mxu1 %v1683_v54 }
 0x728   : > { %v3629_v0 = vpop.f32.mrb[16].mxu1 }
 0x729   : > { %v3630_v11 = vpop.f32.mrb[17].mxu1 }
 0x72a   : > { %v3631_v18 = vadd.f32 %v3630_v11, %v3629_v0 }
 0x72c   : > { %v2056_v16 = vadd.f32 %v3631_v18, %v2054_v44 }
 0x72e   : > { %v2072_v37 = vmul.f32 %v2056_v16, %v2056_v16 }
 0x747   : > { %v3664_v56 = vpop.f32.mrb[20].mxu0 }
 0x748   : > { %v3665_v26 = vpop.f32.mrb[21].mxu0 }
 0x749   : > { %v3666_v7 = vadd.f32 %v3665_v26, %v3664_v56 }
 0x74b   : > { %v2057_v58 = vadd.f32 %v3666_v7, %v2054_v44 }
 0x74d   : > { %v2073_v17 = vmul.f32 %v2057_v58, %v2057_v58  ;;  %v2059_v8 = vadd.f32 %v2057_v58, %v2056_v16 }
 0x74f   : > { %v2075_v50 = vadd.f32 %v2073_v17, %v2072_v37 }
 0x754   : > { %v2046_v14 = vpop.f32.mrb[18].mxu1 }
 0x755   : > { %v2058_v46 = vadd.f32 %v2054_v44, %v2046_v14  ;;  %v2048_v5 = vpop.f32.mrb[19].mxu1 }
 0x757   : > { %v2061_v47 = vsel %vm2060_vm11, %v2058_v46, 0.0  ;;  %v2074_v45 = vmul.f32 %v2058_v46, %v2058_v46 }
 0x758   : > { %v2062_v22 = vadd.f32 %v2061_v47, %v2059_v8 }
 0x759   : > { %v2076_v13 = vsel %vm2060_vm11, %v2074_v45, 0.0 }
 0x75a   : > { %2063 = vadd.xlane.f32.xlu0 %v2062_v22  ;;  %v2077_v20 = vadd.f32 %v2076_v13, %v2075_v50 }
 0x75c   : > { %2078 = vadd.xlane.f32.xlu1 %v2077_v20 }
 0x7e7   : > { %v2064_v54 = vpop.xlane.xlu0 %2063 }
 0x7e8   : > { %v2065_v61 = vrot.slane %v2064_v54, 4 }
 0x7e9   : > { %v2079_v29 = vpop.xlane.xlu1 %2078 }
 0x7ea   : > { %v2066_v51 = vadd.f32 %v2065_v61, %v2064_v54  ;;  %v2080_v63 = vrot.slane %v2079_v29, 4 }
 0x7ec   : > { %v2067_v48 = vrot.slane %v2066_v51, 2  ;;  %v2081_v0 = vadd.f32 %v2080_v63, %v2079_v29 }
 0x7ee   : > { %v2082_v11 = vrot.slane %v2081_v0, 2  ;;  %v2068_v18 = vadd.f32 %v2067_v48, %v2066_v51  ;;  %v5613_v51 = vmul.u32 4, %v5142_v33 }
 0x7f0   : > { %v2069_v56 = vrot.slane %v2068_v18, 1  ;;  %v2083_v26 = vadd.f32 %v2082_v11, %v2081_v0  ;;  %vm2345_vm2 = vcmp.eq.s32.totalorder %v5155_v2, %v5613_v51  ;;  %vm2346_vm4 = vcmp.eq.s32.totalorder %v5158_v4, %v5613_v51 }
 0x7f1   : > { %vm2329_vm15 = vcmp.eq.s32.totalorder %v5140_v32, %v5613_v51  ;;  %vm2330_vm5 = vcmp.eq.s32.totalorder %v5164_v60, %v5613_v51  ;;  %vm3966_vm7 = vmpackc.low %vm2346_vm4, %vm2345_vm2  ;;  %vm2347_vm3 = vcmp.eq.s32.totalorder %v5167_v10, %v5613_v51  ;;  %vm2348_vm13 = vcmp.eq.s32.totalorder %v5170_v62, %v5613_v51 }
 0x7f2   : > { %v2070_v7 = vadd.f32 %v2069_v56, %v2068_v18  ;;  %v2084_v44 = vrot.slane %v2083_v26, 1  ;;  %vm2331_vm6 = vcmp.eq.s32.totalorder %v5179_v30, %v5613_v51  ;;  %vm2332_vm14 = vcmp.eq.s32.totalorder %v5192_v3, %v5613_v51  ;;  %3967 = vmatprep.subr.msk.bf16.mxu1 %vm3966_vm7, %v4479_v49  ;;  %vm3968_vm0 = vmpackc.low %vm2330_vm5, %vm2329_vm15 }
 0x7f3   : > { %vm2349_vm1 = vcmp.eq.s32.totalorder %v5211_v40, %v5613_v51  ;;  %vm2350_vm8 = vcmp.eq.s32.totalorder %v5214_v9, %v5613_v51  ;;  %3969 = vmatpush3.bf16.msk.msra.mxu1 %vm3968_vm0, %v4479_v49  ;;  %vm3970_vm10 = vmpackc.low %vm2348_vm13, %vm2347_vm3  ;;  %vm2333_vm2 = vcmp.eq.s32.totalorder %v5234_v52, %v5613_v51  ;;  %vm2334_vm4 = vcmp.eq.s32.totalorder %v5237_v41, %v5613_v51 }
 0x7f4   : > { %4043 = vpush %v2070_v7  ;;  %v2085_v14 = vadd.f32 %v2084_v44, %v2083_v26  ;;  %3971 = vmatprep.subr.msk.bf16.mxu1 %vm3970_vm10, %v4479_v49  ;;  %vm3972_vm12 = vmpackc.low %vm2332_vm14, %vm2331_vm6  ;;  %vm2351_vm15 = vcmp.eq.s32.totalorder %v5252_v15, %v5613_v51  ;;  %vm2352_vm5 = vcmp.eq.s32.totalorder %v5261_v53, %v5613_v51 }
 0x7f5   : > { %vm3976_vm7 = vmpackc.low %vm2334_vm4, %vm2333_vm2  ;;  %vm2335_vm13 = vcmp.eq.s32.totalorder %v5280_v24, %v5613_v51  ;;  %vm2336_vm6 = vcmp.eq.s32.totalorder %v5297_v23, %v5613_v51  ;;  %vm2353_vm14 = vcmp.eq.s32.totalorder %v5307_v6, %v5613_v51  ;;  %vm2354_vm0 = vcmp.eq.s32.totalorder %v5310_v27, %v5613_v51 }
 0x7f6   : > { %4045 = vpush %v2085_v14  ;;  %vm3978_vm3 = vmpackc.low %vm2352_vm5, %vm2351_vm15  ;;  %vm2337_vm10 = vcmp.eq.s32.totalorder %v5336_v36, %v5613_v51  ;;  %vm2356_vm2 = vcmp.eq.s32.totalorder %v5352_v38, %v5613_v51  ;;  %vm2339_vm5 = vcmp.eq.s32.totalorder %v5365_v1, %v5613_v51 }
 0x7f7   : > { %3973 = vmatpush3.bf16.msk.msra.mxu1 %vm3972_vm12, %v4479_v49  ;;  %vm2338_vm12 = vcmp.eq.s32.totalorder %v5339_v39, %v5613_v51 }
 0x7f8   : > { %vm3984_vm4 = vmpackc.low %vm2338_vm12, %vm2337_vm10  ;;  %vm2360_vm10 = vcmp.eq.s32.totalorder %v5395_v59, %v5613_v51 }
 0x825   : > { %s4044_s4 = spop %4043 }
 0x826   : > { %s2089_s25 = smul.f32 0.00036656891, %s4044_s4 }
 0x827   : > { %s4046_s5 = spop %4045 }
 0x828   : > { %s2093_s6 = smul.f32 %s2089_s25, %s2089_s25  ;;  %v2095_v8 = vstv %s2089_s25 }
 0x829   : > { %s2092_s26 = smul.f32 0.00036656891, %s4046_s5  ;;  %v2096_v37 = vsub.f32 %v2056_v16, %v2095_v8  ;;  %v2097_v47 = vsub.f32 %v2057_v58, %v2095_v8  ;;  %v2098_v45 = vsub.f32 %v2058_v46, %v2095_v8  ;;  %s6093_s5 = smov 127   ;;  %v2455_v46 = vld [vmem:[%s5973_s8] sm:$0xff] }
 0x82b   : > { %s2094_s0 = ssub.f32 %s2092_s26, %s2093_s6 }
 0x82d   : > { %s2099_s21 = sadd.f32 1e-05, %s2094_s0 }
 0x82f   : > { %v2100_v17 = vstv %s2099_s21 }
 0x830   : > { %4393 = vrsqrt.f32 %v2100_v17 }
 0x83a   : > { %v4394_v5 = vpop.eup %4393 }
 0x83b   : > { %4047 = vpush %v4394_v5 }
 0x86c   : > { %s4048_s19 = spop %4047 }
 0x86d   : > { %v2103_v22 = vstv %s4048_s19 }
 0x86e   : > { %v2104_v50 = vmul.f32 %v2103_v22, %v2096_v37  ;;  %v5570_v13 = vmul.f32 %v2103_v22, %v2097_v47  ;;  %v2106_v20 = vmul.f32 %v2103_v22, %v2098_v45 }
 0x870   : > { %v5572_v54 = vmax.f32 %v2104_v50, 0.0  ;;  %v2108_v61 = vmax.f32 %v5570_v13, 0.0  ;;  %v2109_v29 = vmax.f32 %v2106_v20, 0.0 }
 0x872   : > { %2110 = vst [vmem:[#allocation2] sm:$0xff] %v5572_v54  ;;  %2112 = vst.msk [vmem:[#allocation2 + $0x10] sm:$0xff] %vm2060_vm11, %v2109_v29  ;;  %2119 = vrot.lane.b32.xlu1 %v5572_v54, %s6093_s5 }
 0x873   : > { %vm3974_vm11 = vmpackc.low %vm2350_vm8, %vm2349_vm1 }
 0x874   : > { %3975 = vmatprep.subr.msk.bf16.mxu1 %vm3974_vm11, %v4479_v49  ;;  %vm3980_vm1 = vmpackc.low %vm2336_vm6, %vm2335_vm13  ;;  %vm2355_vm11 = vcmp.eq.s32.totalorder %v5342_v43, %v5613_v51  ;;  %vm2358_vm13 = vcmp.eq.s32.totalorder %v5392_v35, %v5613_v51 }
 0x875   : > { %3977 = vmatpush3.bf16.msk.msra.mxu1 %vm3976_vm7, %v4479_v49  ;;  %vm3982_vm8 = vmpackc.low %vm2354_vm0, %vm2353_vm14  ;;  %vm2340_vm7 = vcmp.eq.s32.totalorder %v5381_v34, %v5613_v51  ;;  %vm2341_vm0 = vcmp.eq.s32.totalorder %v5408_v55, %v5613_v51 }
 0x876   : > { %3979 = vmatprep.subr.msk.bf16.mxu1 %vm3978_vm3, %v4479_v49  ;;  %vm3986_vm15 = vmpackc.low %vm2356_vm2, %vm2355_vm11  ;;  %vm2357_vm3 = vcmp.eq.s32.totalorder %v5389_v21, %v5613_v51  ;;  %vm6094_vm2 = vcmask 1039360  }
 0x877   : > { %vm3988_vm6 = vmpackc.low %vm2340_vm7, %vm2339_vm5  ;;  %vm6097_vm5 = vcmask 1022976  }
 0x878   : > { %vm3990_vm14 = vmpackc.low %vm2358_vm13, %vm2357_vm3  ;;  %vm6100_vm13 = vcmask 1014784  }
 0x879   : > { %v5579_v58 = vld [vmem:[#allocation2 + $0x10] sm:$0xff]  ;;  %3981 = vmatpush3.bf16.msk.msra.mxu1 %vm3980_vm1, %v4479_v49  ;;  %vm2342_vm1 = vcmp.eq.s32.totalorder %v5422_v57, %v5613_v51  ;;  %vm6098_vm7 = vmmov %vm6097_vm5 }
 0x87a   : > { %v4335_v16 = vpack.i.bf16 %v5579_v58, %v2108_v61  ;;  %3983 = vmatprep.subr.msk.bf16.mxu1 %vm3982_vm8, %v4479_v49  ;;  %vm2359_vm8 = vcmp.eq.s32.totalorder %v5432_v25, %v5613_v51  ;;  %vm3992_vm12 = vmpackc.low %vm2342_vm1, %vm2341_vm0  ;;  %vm6104_vm1 = vcmask 998400  }
 0x87b   : > { %vm3994_vm11 = vmpackc.low %vm2360_vm10, %vm2359_vm8  ;;  %vm6105_vm8 = vcmask 990208  }
 0x87c   : > { %4336 = vrot.lane.b32.xlu0 %v4335_v16, %s6093_s5  ;;  %4346 = vrot.lane.b32.xlu1 %v4335_v16, %s6048_s28  ;;  %vm6103_vm0 = vmmov %vm6100_vm13 }
 0x87d   : > { %3985 = vmatpush3.bf16.msk.msra.mxu1 %vm3984_vm4, %v4479_v49  ;;  %vm6095_vm4 = vmmov %vm6094_vm2 }
 0x87e   : > { %3987 = vmatprep.subr.msk.bf16.mxu1 %vm3986_vm15, %v4479_v49  ;;  %vm6096_vm15 = vcmask 1031168   ;;  %vm6106_vm10 = vmmov %vm6105_vm8 }
 0x87f   : > { %vm6099_vm3 = vmmov %vm6096_vm15 }
 0x880   : > { %4341 = vrot.lane.b32.xlu0 %v4335_v16, %s6047_s27  ;;  %2141 = vrot.lane.b32.xlu1 %v5572_v54, %s6048_s28 }
 0x881   : > { %3989 = vmatpush3.bf16.msk.msra.mxu1 %vm3988_vm6, %v4479_v49  ;;  %vm6101_vm6 = vcmask 1006592  }
 0x882   : > { %3991 = vmatprep.subr.msk.bf16.mxu1 %vm3990_vm14, %v4479_v49  ;;  %vm6102_vm14 = vmmov %vm6101_vm6 }
 0x884   : > { %2130 = vrot.lane.b32.xlu0 %v5572_v54, %s6047_s27  ;;  %4356 = vrot.lane.b32.xlu1 %v4335_v16, %s6050_s24 }
 0x885   : > { %3993 = vmatpush3.bf16.msk.msra.mxu1 %vm3992_vm12, %v4479_v49  ;;  %vm6107_vm12 = vmmov %vm6104_vm1 }
 0x886   : > { %3995 = vmatprep.subr.msk.bf16.mxu1 %vm3994_vm11, %v4479_v49  ;;  %vm6108_vm11 = vcmask 982016  }
 0x888   : > { %4351 = vrot.lane.b32.xlu0 %v4335_v16, %s6049_s22  ;;  %2163 = vrot.lane.b32.xlu1 %v5572_v54, %s6050_s24 }
 0x88c   : > { %2152 = vrot.lane.b32.xlu0 %v5572_v54, %s6049_s22  ;;  %4366 = vrot.lane.b32.xlu1 %v4335_v16, %s6052_s23 }
 0x890   : > { %4361 = vrot.lane.b32.xlu0 %v4335_v16, %s6051_s20  ;;  %2185 = vrot.lane.b32.xlu1 %v5572_v54, %s6052_s23 }
 0x894   : > { %2174 = vrot.lane.b32.xlu0 %v5572_v54, %s6051_s20  ;;  %4376 = vrot.lane.b32.xlu1 %v4335_v16, %s6054_s2 }
 0x898   : > { %4371 = vrot.lane.b32.xlu0 %v4335_v16, %s6053_s29  ;;  %2207 = vrot.lane.b32.xlu1 %v5572_v54, %s6054_s2 }
 0x89c   : > { %2196 = vrot.lane.b32.xlu0 %v5572_v54, %s6053_s29 }
 0x8a0   : > { %2458 = vperm.xlu0 %4128, %v2455_v46  }
 0x8e4   : > { %v2120_v2 = vpop.permute.xlu1 %2119 }
 0x8ee   : > { %v5690_v4 = vpop.permute.xlu0 %4336  ;;  %v5692_v10 = vpop.permute.xlu1 %4346 }
 0x8ef   : > { %v4339_v62 = vunpack.i.h.bf16 %v5690_v4  ;;  %v4338_v40 = vunpack.i.l.bf16 %v5690_v4  ;;  %v4349_v15 = vunpack.i.h.bf16 %v5692_v10  ;;  %v4348_v53 = vunpack.i.l.bf16 %v5692_v10 }
 0x8f0   : > { %v2318_v10 = vadd.s32 256, %v5140_v32 }
 0x8f1   : > { %v2125_v9 = vsel %vm6094_vm2, %v2120_v2, %v4338_v40  ;;  %v2126_v6 = vsel %vm6095_vm4, %v4338_v40, %v4339_v62  ;;  %v2148_v59 = vsel %vm6097_vm5, %v4348_v53, %v4349_v15  ;;  %vm6109_vm2 = vcmask 973824  }
 0x8f2   : > { %v2218_v27 = vpack.c.bf16 %v2125_v9, %v5572_v54  ;;  %v5703_v43 = vpop.permute.xlu0 %4341  ;;  %v2219_v38 = vpack.c.bf16 %v2126_v6, %v2108_v61  ;;  %v2142_v1 = vpop.permute.xlu1 %2141  ;;  %vm6110_vm4 = vmmov %vm6109_vm2  ;;  %vm6113_vm5 = vcmask 654336  }
 0x8f3   : > { %v4344_v34 = vunpack.i.h.bf16 %v5703_v43  ;;  %v4343_v21 = vunpack.i.l.bf16 %v5703_v43  ;;  %v2147_v63 = vsel %vm6098_vm7, %v2142_v1, %v4348_v53  ;;  %vm4483_vm7 = vmmov 0  }
 0x8f4   : > { %2237 = vmatprep.subr.bf16.mxu0 %v2219_v38  ;;  %v2323_v43 = vadd.s32 296, %v5140_v32 }
 0x8f5   : > { %2238 = vmatpush1.bf16.msra.mxu0 %v2218_v27  ;;  %v2137_v35 = vsel %vm6096_vm15, %v4343_v21, %v4344_v34  ;;  %vm6111_vm15 = vmmov %vm6108_vm11 }
 0x8f6   : > { %v2131_v55 = vpop.permute.xlu0 %2130  ;;  %v5715_v57 = vpop.permute.xlu1 %4356  ;;  %v2222_v25 = vpack.c.bf16 %v2148_v59, %v2137_v35 }
 0x8f7   : > { %v2136_v48 = vsel %vm6099_vm3, %v2131_v55, %v4343_v21  ;;  %v4359_v11 = vunpack.i.h.bf16 %v5715_v57  ;;  %v4358_v18 = vunpack.i.l.bf16 %v5715_v57  ;;  %vm6114_vm3 = vmmov %vm6113_vm5 }
 0x8f8   : > { %v2221_v0 = vpack.c.bf16 %v2147_v63, %v2136_v48  ;;  %2239 = vmatprep.subr.bf16.mxu0 %v2222_v25 }
 0x8f9   : > { %v2170_v17 = vsel %vm6101_vm6, %v4358_v18, %v4359_v11  ;;  %vm2344_vm6 = vcmp.eq.s32.totalorder %v5462_v31, %v5613_v51  ;;  %v2321_v31 = vadd.s32 280, %v5140_v32 }
 0x8fa   : > { %v4352_v56 = vpop.permute.xlu0 %4351  ;;  %2240 = vmatpush1.bf16.msra.mxu0 %v2221_v0  ;;  %v2164_v26 = vpop.permute.xlu1 %2163 }
 0x8fb   : > { %v4354_v7 = vunpack.i.h.bf16 %v4352_v56  ;;  %v4353_v44 = vunpack.i.l.bf16 %v4352_v56  ;;  %v2169_v47 = vsel %vm6102_vm14, %v2164_v26, %v4358_v18  ;;  %v2233_v26 = vld [vmem:[%s6112_s7] sm:$0xf] }
 0x8fd   : > { %v2159_v14 = vsel %vm6100_vm13, %v4353_v44, %v4354_v7  ;;  %vm2343_vm13 = vcmp.eq.s32.totalorder %v5459_v28, %v5613_v51  ;;  %v2320_v28 = vadd.s32 272, %v5140_v32 }
 0x8fe   : > { %v2153_v5 = vpop.permute.xlu0 %2152  ;;  %v4367_v8 = vpop.permute.xlu1 %4366  ;;  %v2225_v37 = vpack.c.bf16 %v2170_v17, %v2159_v14  ;;  %v2223_v14 = vpack.c.bf16 %v4349_v15, %v4344_v34  ;;  %v2226_v17 = vpack.c.bf16 %v4359_v11, %v4354_v7  ;;  %vm3996_vm14 = vmpackc.low %vm2344_vm6, %vm2343_vm13  ;;  %v2322_v15 = vadd.s32 288, %v5140_v32 }
 0x8ff   : > { %v2158_v45 = vsel %vm6103_vm0, %v2153_v5, %v4353_v44  ;;  %v4369_v50 = vunpack.i.h.bf16 %v4367_v8  ;;  %v4368_v13 = vunpack.i.l.bf16 %v4367_v8  ;;  %v2220_v44 = vpack.c.bf16 %v4339_v62, %v5579_v58  ;;  %3997 = vmatpush3.bf16.msk.msra.mxu1 %vm3996_vm14, %v4479_v49 }
 0x900   : > { %v2224_v22 = vpack.c.bf16 %v2169_v47, %v2158_v45  ;;  %2241 = vmatprep.subr.bf16.mxu0 %v2225_v37  ;;  %v2319_v62 = vadd.s32 264, %v5140_v32  ;;  %vm2361_vm0 = vcmp.eq.s32.totalorder %v2318_v10, %v5613_v51  ;;  %4014 = vmatprep.subr.bf16.mxu1 %v4482_v19  ;;  %v2324_v34 = vadd.s32 304, %v5140_v32 }
 0x901   : > { %v2192_v46 = vsel %vm6105_vm8, %v4368_v13, %v4369_v50  ;;  %v2325_v11 = vadd.s32 312, %v5140_v32  ;;  %v2327_v7 = vadd.s32 328, %v5140_v32  ;;  %v2326_v5 = vadd.s32 320, %v5140_v32 }
 0x902   : > { %v4362_v20 = vpop.permute.xlu0 %4361  ;;  %2242 = vmatpush1.bf16.msra.mxu0 %v2224_v22  ;;  %v2186_v54 = vpop.permute.xlu1 %2185 }
 0x903   : > { %v4364_v61 = vunpack.i.h.bf16 %v4362_v20  ;;  %v4363_v29 = vunpack.i.l.bf16 %v4362_v20  ;;  %v2191_v53 = vsel %vm6106_vm10, %v2186_v54, %v4368_v13  ;;  %vm2363_vm10 = vcmp.eq.s32.totalorder %v2320_v28, %v5613_v51 }
 0x904   : > { %vm2370_vm13 = vcmp.eq.s32.totalorder %v2327_v7, %v5613_v51  ;;  %vm2369_vm14 = vcmp.eq.s32.totalorder %v2326_v5, %v5613_v51  ;;  %v2682_v7 = vld [vmem:[%s5974_s9] sm:$0xf] }
 0x905   : > { %v2181_v16 = vsel %vm6104_vm1, %v4363_v29, %v4364_v61  ;;  %v2229_v58 = vpack.c.bf16 %v4369_v50, %v4364_v61  ;;  %vm2362_vm1 = vcmp.eq.s32.totalorder %v2319_v62, %v5613_v51  ;;  %v3518_v8 = vsel %vm2370_vm13, 1.0, %v4480_v42 }
 0x906   : > { %v2175_v2 = vpop.permute.xlu0 %2174  ;;  %v4377_v40 = vpop.permute.xlu1 %4376  ;;  %v2228_v9 = vpack.c.bf16 %v2192_v46, %v2181_v16  ;;  %vm3999_vm8 = vmpackc.low %vm2362_vm1, %vm2361_vm0  ;;  %v4011_v37 = vpack.c.bf16 %v3518_v8, %v4481_v12  ;;  %vm2461_vm1 = vcmask 596992  }
 0x907   : > { %v2180_v6 = vsel %vm6107_vm12, %v2175_v2, %v4363_v29  ;;  %v4379_v38 = vunpack.i.h.bf16 %v4377_v40  ;;  %v4378_v1 = vunpack.i.l.bf16 %v4377_v40  ;;  %vm2364_vm12 = vcmp.eq.s32.totalorder %v2321_v31, %v5613_v51  ;;  %vm4012_vm0 = vmpackc.low %vm1976_vm9, %vm2369_vm14 }
 0x908   : > { %v2227_v27 = vpack.c.bf16 %v2191_v53, %v2180_v6  ;;  %2243 = vmatprep.subr.bf16.mxu0 %v2228_v9 }
 0x909   : > { %v2214_v25 = vsel %vm6109_vm2, %v4378_v1, %v4379_v38  ;;  %vm2365_vm2 = vcmp.eq.s32.totalorder %v2322_v15, %v5613_v51  ;;  %v2757_v15 = vld [vmem:[%s5975_s10] sm:$0xff] }
 0x90a   : > { %v4372_v21 = vpop.permute.xlu0 %4371  ;;  %2244 = vmatpush1.bf16.msra.mxu0 %v2227_v27  ;;  %v2208_v55 = vpop.permute.xlu1 %2207 }
 0x90b   : > { %v4374_v35 = vunpack.i.h.bf16 %v4372_v21  ;;  %v4373_v59 = vunpack.i.l.bf16 %v4372_v21  ;;  %v2213_v0 = vsel %vm6110_vm4, %v2208_v55, %v4378_v1  ;;  %vm2366_vm4 = vcmp.eq.s32.totalorder %v2323_v43, %v5613_v51 }
 0x90c   : > { %v2726_v43 = vmul.u32 8, %v5142_v33 }
 0x90d   : > { %v2203_v57 = vsel %vm6108_vm11, %v4373_v59, %v4374_v35  ;;  %v2232_v4 = vpack.c.bf16 %v4379_v38, %v4374_v35  ;;  %vm4002_vm11 = vmpackc.low %vm2364_vm12, %vm2363_vm10 }
 0x90e   : > { %v2197_v63 = vpop.permute.xlu0 %2196  ;;  %v2231_v48 = vpack.c.bf16 %v2214_v25, %v2203_v57  ;;  %vm2727_vm10 = vcmp.eq.s32.totalorder %v5140_v32, %v2726_v43  ;;  %vm2728_vm12 = vcmp.eq.s32.totalorder %v5164_v60, %v2726_v43  ;;  %vm2734_vm14 = vcmp.eq.s32.totalorder %v5297_v23, %v2726_v43 }
 0x90f   : > { %v2202_v18 = vsel %vm6111_vm15, %v2197_v63, %v4373_v59  ;;  %vm4005_vm15 = vmpackc.low %vm2366_vm4, %vm2365_vm2  ;;  %vm2730_vm2 = vcmp.eq.s32.totalorder %v5192_v3, %v2726_v43 }
 0x910   : > { %v2230_v56 = vpack.c.bf16 %v2213_v0, %v2202_v18  ;;  %2245 = vmatprep.subr.bf16.mxu0 %v2231_v48  ;;  %vm4015_vm4 = vmpackc.low %vm2728_vm12, %vm2727_vm10  ;;  %vm2735_vm10 = vcmp.eq.s32.totalorder %v5336_v36, %v2726_v43 }
 0x911   : > { %vm4028_vm12 = vmpackc.low %vm1976_vm9, %vm2735_vm10  ;;  %vm6115_vm9 = vcmask 654336   ;;  %vm3187_vm10 = vcmask 253952  }
 0x912   : > { %2246 = vmatpush1.bf16.msra.mxu0 %v2230_v56 }
 0x913   : > { %3752 = vmatprep.subr.bf16.mxu0 %v4480_v42 }
 0x915   : > { %3475 = vmatmul.mubr.msk.bf16.vlgmr.msra.gmra.mrb[24].mxu0 %vm6113_vm5, %v2233_v26  ;;  %vm2367_vm5 = vcmp.eq.s32.totalorder %v2324_v34, %v5613_v51 }
 0x916   : > { %3753 = vmatpush3.bf16.msra.mxu0 %v2220_v44  ;;  %3762 = vmatprep.mubr.msk.bf16.mxu0 %vm4483_vm7, %v4480_v42 }
 0x917   : > { %3754 = vmatprep.subr.bf16.mxu0 %v4480_v42 }
 0x91a   : > { %3755 = vmatpush3.bf16.msra.mxu0 %v2223_v14 }
 0x91b   : > { %3756 = vmatprep.subr.bf16.mxu0 %v4480_v42 }
 0x91e   : > { %3757 = vmatpush3.bf16.msra.mxu0 %v2226_v17 }
 0x91f   : > { %3758 = vmatprep.subr.bf16.mxu0 %v4480_v42  ;;  %v2459_v46 = vpop.permute.xlu0 %2458 }
 0x922   : > { %3759 = vmatpush3.bf16.msra.mxu0 %v2229_v58 }
 0x923   : > { %3760 = vmatprep.subr.bf16.mxu0 %v4480_v42 }
 0x926   : > { %3761 = vmatpush3.bf16.msra.mxu0 %v2232_v4 }
 0x927   : > { %3998 = vmatprep.subr.bf16.mxu0 %v4482_v19 }
 0x929   : > { %3763 = vmatmul.mubr.msk.bf16.vlgmr.msra.gmra.mrb[28].mxu0 %vm6114_vm3, %v2233_v26  ;;  %vm2368_vm3 = vcmp.eq.s32.totalorder %v2325_v11, %v5613_v51 }
 0x92a   : > { %3786 = vmatprep.mubr.msk.f32.mxu0 %vm4483_vm7, %v4480_v42  ;;  %4000 = vmatpush3.bf16.msk.msra.mxu0 %vm3999_vm8, %v4479_v49  ;;  %vm4008_vm6 = vmpackc.low %vm2368_vm3, %vm2367_vm5  ;;  %vm2608_vm8 = vcmask 678912   ;;  %vm2731_vm5 = vcmp.eq.s32.totalorder %v5234_v52, %v2726_v43  ;;  %vm2732_vm3 = vcmp.eq.s32.totalorder %v5237_v41, %v2726_v43 }
 0x92b   : > { %4001 = vmatprep.subr.bf16.mxu0 %v4482_v19  ;;  %vm4021_vm13 = vmpackc.low %vm2732_vm3, %vm2731_vm5  ;;  %vm3031_vm5 = vcmask 23552   ;;  %vm3034_vm3 = vcmask 39936  }
 0x92e   : > { %4003 = vmatpush3.bf16.msk.msra.mxu0 %vm4002_vm11, %v4479_v49  ;;  %vm2729_vm11 = vcmp.eq.s32.totalorder %v5179_v30, %v2726_v43 }
 0x92f   : > { %4004 = vmatprep.subr.bf16.mxu0 %v4482_v19 }
 0x932   : > { %4006 = vmatpush3.bf16.msk.msra.mxu0 %vm4005_vm15, %v4479_v49  ;;  %vm4018_vm15 = vmpackc.low %vm2730_vm2, %vm2729_vm11  ;;  %vm2839_vm11 = vcmask 80896   ;;  %vm2958_vm2 = vcmask 7168  }
 0x933   : > { %4007 = vmatprep.subr.bf16.mxu0 %v4482_v19 }
 0x936   : > { %4009 = vmatpush3.bf16.msk.msra.mxu0 %vm4008_vm6, %v4479_v49  ;;  %vm2733_vm6 = vcmp.eq.s32.totalorder %v5280_v24, %v2726_v43 }
 0x937   : > { %4010 = vmatprep.subr.bf16.mxu0 %v4482_v19 }
 0x93a   : > { %4013 = vmatpush3.bf16.msk.msra.mxu0 %vm4012_vm0, %v4011_v37  ;;  %vm2736_vm0 = vcmp.eq.s32.totalorder %v5339_v39, %v2726_v43 }
 0x93b   : > { %3789 = vmatprep.subr.bf16.mxu0 %v4480_v42  ;;  %v3572_v32 = vsel %vm2736_vm0, 1.0, %v4480_v42  ;;  %vm3043_vm0 = vcmask 64512  }
 0x93c   : > { %v4027_v33 = vpack.c.bf16 %v3572_v32, %v4481_v12 }
 0x9e8   : > { %v2271_v47 = vpop.f32.mrb[24].mxu0 }
 0x9e9   : > { %v2273_v45 = vpop.f32.mrb[25].mxu0 }
 0x9ea   : > { %v2275_v22 = vpop.f32.mrb[26].mxu0  ;;  %2532 = vmatprep.mubr.f32.mxu1 %v2273_v45 }
 0x9eb   : > { %v2276_v50 = vpop.f32.mrb[27].mxu0  ;;  %2533 = vmatmul.mubr.f32.vlgmr.msra.gmra.mrb[20].mxu1 %v2271_v47 }
 0x9ec   : > { %3823 = vmatprep.mubr.msk.f32.mxu1 %vm4483_vm7, %v4480_v42  ;;  %4016 = vmatpush3.bf16.msk.msra.mxu1 %vm4015_vm4, %v4479_v49  ;;  %vm3047_vm4 = vcmask 1043456  }
 0x9ed   : > { %4017 = vmatprep.subr.bf16.mxu1 %v4482_v19 }
 0x9f0   : > { %4019 = vmatpush3.bf16.msk.msra.mxu1 %vm4018_vm15, %v4479_v49  ;;  %vm3029_vm15 = vcmask 15360  }
 0x9f1   : > { %4020 = vmatprep.subr.bf16.mxu1 %v4482_v19 }
 0x9f4   : > { %4022 = vmatpush3.bf16.msk.msra.mxu1 %vm4021_vm13, %v4479_v49  ;;  %vm6117_vm13 = vcmask 31744  }
 0x9f5   : > { %4023 = vmatprep.subr.bf16.mxu1 %v4482_v19 }
 0x9fc   : > { %v2312_v51 = vpop.f32.mrb[28].mxu0 }
 0x9fd   : > { %v3764_v13 = vpop.f32.mrb[29].mxu0  ;;  %3787 = vmatmul.mubr.msk.f32.vlgmr.msra.gmra.mrb[22].mxu0 %vm2461_vm1, %v2312_v51 }
 0x9fe   : > { %v2315_v20 = vpop.f32.mrb[30].mxu0  ;;  %3799 = vmatprep.mubr.msk.bf16.mxu0 %vm4483_vm7, %v4480_v42 }
 0x9ff   : > { %v3765_v54 = vpop.f32.mrb[31].mxu0 }
 0xabe   : > { %v3705_v61 = vpop.f32.mrb[20].mxu1 }
 0xabf   : > { %v3706_v29 = vpop.f32.mrb[21].mxu1 }
 0xac0   : > { %v3707_v16 = vadd.f32 %v3706_v29, %v3705_v61 }
 0xac2   : > { %v2535_v2 = vadd.f32 %v3707_v16, %v2459_v46 }
 0xad0   : > { %v2604_v40 = vpop.f32.mrb[22].mxu0 }
 0xad1   : > { %v2605_v9 = vadd.f32 %v2604_v40, %v2535_v2  ;;  %v3788_v53 = vpop.f32.mrb[23].mxu0 }
 0xad3   : > { %v2609_v6 = vsel %vm2608_vm8, %v2605_v9, 0.0  ;;  %v2619_v27 = vmul.f32 %v2605_v9, %v2605_v9 }
 0xad4   : > { %2610 = vadd.xlane.f32.xlu1 %v2609_v6 }
 0xad5   : > { %v2620_v38 = vsel %vm2608_vm8, %v2619_v27, 0.0 }
 0xad6   : > { %2621 = vadd.xlane.f32.xlu0 %v2620_v38 }
 0xb61   : > { %v2611_v1 = vpop.xlane.xlu1 %2610 }
 0xb62   : > { %v2612_v21 = vrot.slane %v2611_v1, 4 }
 0xb63   : > { %v2622_v35 = vpop.xlane.xlu0 %2621 }
 0xb64   : > { %v2613_v59 = vadd.f32 %v2612_v21, %v2611_v1  ;;  %v2623_v55 = vrot.slane %v2622_v35, 4 }
 0xb66   : > { %v2614_v57 = vrot.slane %v2613_v59, 2  ;;  %v2624_v25 = vadd.f32 %v2623_v55, %v2622_v35 }
 0xb68   : > { %v2625_v63 = vrot.slane %v2624_v25, 2  ;;  %v2615_v48 = vadd.f32 %v2614_v57, %v2613_v59 }
 0xb6a   : > { %v2616_v0 = vrot.slane %v2615_v48, 1  ;;  %v2626_v18 = vadd.f32 %v2625_v63, %v2624_v25 }
 0xb6c   : > { %v2617_v56 = vadd.f32 %v2616_v0, %v2615_v48  ;;  %v2627_v26 = vrot.slane %v2626_v18, 1 }
 0xb6e   : > { %4049 = vpush %v2617_v56  ;;  %v2628_v44 = vadd.f32 %v2627_v26, %v2626_v18 }
 0xb70   : > { %4051 = vpush %v2628_v44 }
 0xb9f   : > { %s4050_s26 = spop %4049 }
 0xba0   : > { %s2632_s4 = smul.f32 0.001506024, %s4050_s26 }
 0xba1   : > { %s4052_s25 = spop %4051 }
 0xba2   : > { %s2636_s6 = smul.f32 %s2632_s4, %s2632_s4  ;;  %v2638_v58 = vstv %s2632_s4 }
 0xba3   : > { %s2635_s19 = smul.f32 0.001506024, %s4052_s25  ;;  %v2639_v4 = vsub.f32 %v2605_v9, %v2638_v58 }
 0xba5   : > { %s2637_s0 = ssub.f32 %s2635_s19, %s2636_s6 }
 0xba7   : > { %s2640_s21 = sadd.f32 1e-05, %s2637_s0 }
 0xba9   : > { %v2641_v14 = vstv %s2640_s21 }
 0xbaa   : > { %4395 = vrsqrt.f32 %v2641_v14 }
 0xbb4   : > { %v4396_v17 = vpop.eup %4395 }
 0xbb5   : > { %4053 = vpush %v4396_v17 }
 0xbe6   : > { %s4054_s7 = spop %4053 }
 0xbe7   : > { %v2644_v10 = vstv %s4054_s7 }
 0xbe8   : > { %v2645_v62 = vmul.f32 %v2644_v10, %v2639_v4 }
 0xbea   : > { %v2646_v28 = vmax.f32 %v2645_v62, 0.0 }
 0xbec   : > { %2647 = vst.msk [vmem:[#allocation3] sm:$0xff] %vm2608_vm8, %v2646_v28  ;;  %vm4024_vm8 = vmpackc.low %vm2734_vm14, %vm2733_vm6  ;;  %vm3036_vm6 = vcmask 48128   ;;  %vm3038_vm14 = vcmask 56320  }
 0xbed   : > { %4025 = vmatpush3.bf16.msk.msra.mxu1 %vm4024_vm8, %v4479_v49  ;;  %vm3091_vm8 = vcmask 516096  }
 0xbee   : > { %4026 = vmatprep.subr.bf16.mxu1 %v4482_v19 }
 0xbf1   : > { %4029 = vmatpush3.bf16.msk.msra.mxu1 %vm4028_vm12, %v4027_v33  ;;  %v2913_v33 = vld [vmem:[%s5976_s11] sm:$0xf]  ;;  %vm3223_vm12 = vcmask 261120  }
 0xbf2   : > { %3840 = vmatprep.subr.bf16.mxu1 %v4480_v42 }
 0xbf3   : > { %v2648_v31 = vld [vmem:[#allocation3] sm:$0xff] }
 0xbf4   : > { %2653 = vrot.lane.b32.xlu1 %v2648_v31, %s6047_s27  ;;  %2650 = vrot.lane.b32.xlu0 %v2648_v31, %s6093_s5 }
 0xbf8   : > { %2656 = vrot.lane.b32.xlu1 %v2648_v31, %s6048_s28  ;;  %2659 = vrot.lane.b32.xlu0 %v2648_v31, %s6049_s22 }
 0xbfc   : > { %2662 = vrot.lane.b32.xlu1 %v2648_v31, %s6050_s24  ;;  %2665 = vrot.lane.b32.xlu0 %v2648_v31, %s6051_s20 }
 0xc00   : > { %2668 = vrot.lane.b32.xlu1 %v2648_v31, %s6052_s23  ;;  %2671 = vrot.lane.b32.xlu0 %v2648_v31, %s6053_s29 }
 0xc04   : > { %2674 = vrot.lane.b32.xlu1 %v2648_v31, %s6054_s2  ;;  %2760 = vperm.xlu0 %4128, %v2757_v15  }
 0xc66   : > { %v2654_v60 = vpop.permute.xlu1 %2653  ;;  %v2651_v30 = vpop.permute.xlu0 %2650 }
 0xc67   : > { %v2677_v3 = vpack.c.bf16 %v2651_v30, %v2648_v31 }
 0xc69   : > { %3790 = vmatpush3.bf16.msra.mxu0 %v2677_v3 }
 0xc6a   : > { %v2657_v52 = vpop.permute.xlu1 %2656  ;;  %v2660_v41 = vpop.permute.xlu0 %2659  ;;  %3791 = vmatprep.subr.bf16.mxu0 %v4480_v42 }
 0xc6b   : > { %v2678_v24 = vpack.c.bf16 %v2657_v52, %v2654_v60  ;;  %v2914_v60 = vld [vmem:[%s5977_s12] sm:$0xff] }
 0xc6d   : > { %3792 = vmatpush3.bf16.msra.mxu0 %v2678_v24 }
 0xc6e   : > { %v2663_v49 = vpop.permute.xlu1 %2662  ;;  %3793 = vmatprep.subr.bf16.mxu0 %v4480_v42  ;;  %v2666_v36 = vpop.permute.xlu0 %2665 }
 0xc6f   : > { %v2679_v23 = vpack.c.bf16 %v2663_v49, %v2660_v41 }
 0xc71   : > { %3794 = vmatpush3.bf16.msra.mxu0 %v2679_v23 }
 0xc72   : > { %v2669_v39 = vpop.permute.xlu1 %2668  ;;  %3795 = vmatprep.subr.bf16.mxu0 %v4480_v42  ;;  %v2672_v19 = vpop.permute.xlu0 %2671 }
 0xc73   : > { %v2680_v12 = vpack.c.bf16 %v2669_v39, %v2666_v36 }
 0xc75   : > { %3796 = vmatpush3.bf16.msra.mxu0 %v2680_v12 }
 0xc76   : > { %v2675_v34 = vpop.permute.xlu1 %2674  ;;  %3797 = vmatprep.subr.bf16.mxu0 %v4480_v42 }
 0xc77   : > { %v2681_v11 = vpack.c.bf16 %v2675_v34, %v2672_v19 }
 0xc79   : > { %3798 = vmatpush3.bf16.msra.mxu0 %v2681_v11 }
 0xc7a   : > { %3826 = vmatprep.subr.bf16.mxu0 %v4480_v42 }
 0xc7c   : > { %3800 = vmatmul.mubr.msk.bf16.vlgmr.msra.gmra.mrb[32].mxu0 %vm6115_vm9, %v2682_v7 }
 0xc7d   : > { %3836 = vmatprep.mubr.msk.bf16.mxu0 %vm4483_vm7, %v4480_v42 }
 0xc83   : > { %v2761_v45 = vpop.permute.xlu0 %2760 }
 0xd4f   : > { %v2720_v5 = vpop.f32.mrb[32].mxu0 }
 0xd50   : > { %v3801_v8 = vpop.f32.mrb[33].mxu0  ;;  %3824 = vmatmul.mubr.msk.f32.vlgmr.msra.gmra.mrb[22].mxu1 %vm2461_vm1, %v2720_v5  ;;  %vm6116_vm1 = vmmov %vm6115_vm9  ;;  %vm3267_vm9 = vcmask 16384  }
 0xd51   : > { %v2723_v37 = vpop.f32.mrb[34].mxu0  ;;  %3842 = vmatprep.mubr.msk.bf16.mxu1 %vm4483_vm7, %v4480_v42 }
 0xd52   : > { %v3802_v47 = vpop.f32.mrb[35].mxu0 }
 0xe23   : > { %v2835_v22 = vpop.f32.mrb[22].mxu1 }
 0xe24   : > { %v2836_v50 = vadd.f32 %v2835_v22, %v2761_v45  ;;  %v3825_v51 = vpop.f32.mrb[23].mxu1 }
 0xe26   : > { %v2840_v13 = vsel %vm2839_vm11, %v2836_v50, 0.0  ;;  %v2850_v20 = vmul.f32 %v2836_v50, %v2836_v50 }
 0xe27   : > { %2841 = vadd.xlane.f32.xlu1 %v2840_v13 }
 0xe28   : > { %v2851_v54 = vsel %vm2839_vm11, %v2850_v20, 0.0 }
 0xe29   : > { %2852 = vadd.xlane.f32.xlu0 %v2851_v54 }
 0xeb4   : > { %v2842_v61 = vpop.xlane.xlu1 %2841 }
 0xeb5   : > { %v2843_v29 = vrot.slane %v2842_v61, 4 }
 0xeb6   : > { %v2853_v16 = vpop.xlane.xlu0 %2852 }
 0xeb7   : > { %v2844_v46 = vadd.f32 %v2843_v29, %v2842_v61  ;;  %v2854_v2 = vrot.slane %v2853_v16, 4 }
 0xeb9   : > { %v2845_v40 = vrot.slane %v2844_v46, 2  ;;  %v2855_v9 = vadd.f32 %v2854_v2, %v2853_v16 }
 0xebb   : > { %v2856_v53 = vrot.slane %v2855_v9, 2  ;;  %v2846_v6 = vadd.f32 %v2845_v40, %v2844_v46 }
 0xebd   : > { %v2847_v27 = vrot.slane %v2846_v6, 1  ;;  %v2857_v38 = vadd.f32 %v2856_v53, %v2855_v9  ;;  %v3041_v53 = vld [vmem:[%s5978_s13] sm:$0xf] }
 0xebf   : > { %v2848_v1 = vadd.f32 %v2847_v27, %v2846_v6  ;;  %v2858_v21 = vrot.slane %v2857_v38, 1  ;;  %v3049_v6 = vsel %vm3047_vm4, %v3041_v53, 0 }
 0xec0   : > { %3841 = vmatpush3.bf16.msra.mxu1 %v3049_v6 }
 0xec1   : > { %4055 = vpush %v2848_v1  ;;  %v2859_v35 = vadd.f32 %v2858_v21, %v2857_v38  ;;  %3846 = vmatprep.subr.bf16.mxu1 %v4480_v42 }
 0xec3   : > { %4057 = vpush %v2859_v35 }
 0xef2   : > { %s4056_s6 = spop %4055 }
 0xef3   : > { %s2863_s19 = smul.f32 0.0125, %s4056_s6 }
 0xef4   : > { %s4058_s0 = spop %4057 }
 0xef5   : > { %s2867_s21 = smul.f32 %s2863_s19, %s2863_s19  ;;  %v2869_v57 = vstv %s2863_s19 }
 0xef6   : > { %s2866_s7 = smul.f32 0.0125, %s4058_s0  ;;  %v2870_v25 = vsub.f32 %v2836_v50, %v2869_v57 }
 0xef8   : > { %s2868_s26 = ssub.f32 %s2866_s7, %s2867_s21 }
 0xefa   : > { %s2871_s4 = sadd.f32 1e-05, %s2868_s26  ;;  %s4484_s26 = smov 2  }
 0xefc   : > { %v2872_v59 = vstv %s2871_s4  ;;  %s4485_s4 = smov 1  }
 0xefd   : > { %4397 = vrsqrt.f32 %v2872_v59 }
 0xf07   : > { %v4398_v55 = vpop.eup %4397 }
 0xf08   : > { %4059 = vpush %v4398_v55 }
 0xf39   : > { %s4060_s25 = spop %4059 }
 0xf3a   : > { %v2875_v63 = vstv %s4060_s25  ;;  %s4486_s25 = smov 4  }
 0xf3b   : > { %v2876_v48 = vmul.f32 %v2875_v63, %v2870_v25 }
 0xf3d   : > { %v2877_v0 = vmax.f32 %v2876_v48, 0.0 }
 0xf3f   : > { %2878 = vst.msk [vmem:[#allocation2] sm:$0xff] %vm2839_vm11, %v2877_v0 }
 0xf46   : > { %v2879_v18 = vld [vmem:[#allocation2] sm:$0xff] }
 0xf47   : > { %2884 = vrot.lane.b32.xlu1 %v2879_v18, %s6047_s27  ;;  %2881 = vrot.lane.b32.xlu0 %v2879_v18, %s6093_s5  ;;  %s4487_s27 = smov 3  }
 0xf4b   : > { %2887 = vrot.lane.b32.xlu1 %v2879_v18, %s6048_s28  ;;  %2890 = vrot.lane.b32.xlu0 %v2879_v18, %s6049_s22  ;;  %s4488_s28 = smov 6   ;;  %s4489_s22 = smov 5  }
 0xf4f   : > { %2893 = vrot.lane.b32.xlu1 %v2879_v18, %s6050_s24  ;;  %2896 = vrot.lane.b32.xlu0 %v2879_v18, %s6051_s20  ;;  %s4490_s24 = smov 7  }
 0xf53   : > { %2899 = vrot.lane.b32.xlu1 %v2879_v18, %s6052_s23  ;;  %2902 = vrot.lane.b32.xlu0 %v2879_v18, %s6053_s29 }
 0xf57   : > { %2905 = vrot.lane.b32.xlu1 %v2879_v18, %s6054_s2 }
 0xfb9   : > { %v2885_v56 = vpop.permute.xlu1 %2884  ;;  %v2882_v26 = vpop.permute.xlu0 %2881 }
 0xfba   : > { %v2908_v44 = vpack.c.bf16 %v2882_v26, %v2879_v18 }
 0xfbc   : > { %3827 = vmatpush3.bf16.msra.mxu0 %v2908_v44 }
 0xfbd   : > { %v2888_v14 = vpop.permute.xlu1 %2887  ;;  %v2891_v17 = vpop.permute.xlu0 %2890  ;;  %3828 = vmatprep.subr.bf16.mxu0 %v4480_v42 }
 0xfbe   : > { %v2909_v58 = vpack.c.bf16 %v2888_v14, %v2885_v56 }
 0xfc0   : > { %3829 = vmatpush3.bf16.msra.mxu0 %v2909_v58 }
 0xfc1   : > { %v2894_v4 = vpop.permute.xlu1 %2893  ;;  %3830 = vmatprep.subr.bf16.mxu0 %v4480_v42  ;;  %v2897_v62 = vpop.permute.xlu0 %2896 }
 0xfc2   : > { %v2910_v10 = vpack.c.bf16 %v2894_v4, %v2891_v17 }
 0xfc4   : > { %3831 = vmatpush3.bf16.msra.mxu0 %v2910_v10  ;;  %v3042_v10 = vld [vmem:[%s5979_s14] sm:$0x1] }
 0xfc5   : > { %v2900_v28 = vpop.permute.xlu1 %2899  ;;  %3832 = vmatprep.subr.bf16.mxu0 %v4480_v42  ;;  %v2903_v15 = vpop.permute.xlu0 %2902 }
 0xfc6   : > { %v2911_v31 = vpack.c.bf16 %v2900_v28, %v2897_v62 }
 0xfc8   : > { %3833 = vmatpush3.bf16.msra.mxu0 %v2911_v31 }
 0xfc9   : > { %v2906_v43 = vpop.permute.xlu1 %2905  ;;  %3834 = vmatprep.subr.bf16.mxu0 %v4480_v42 }
 0xfca   : > { %v2912_v32 = vpack.c.bf16 %v2906_v43, %v2903_v15 }
 0xfcc   : > { %3835 = vmatpush3.bf16.msra.mxu0 %v2912_v32 }
 0xfcd   : > { %3858 = vmatprep.subr.bf16.mxu0 %v4480_v42 }
 0xfcf   : > { %3837 = vmatmul.mubr.msk.bf16.vlgmr.msra.gmra.mrb[36].mxu0 %vm6116_vm1, %v2913_v33 }
 0xfd0   : > { %3862 = vmatprep.mubr.msk.bf16.mxu0 %vm4483_vm7, %v4480_v42 }
0x10a2   : > { %v2952_v30 = vpop.f32.mrb[36].mxu0 }
0x10a3   : > { %v2953_v3 = vadd.f32 %v2952_v30, %v2914_v60  ;;  %v3838_v52 = vpop.f32.mrb[37].mxu0  ;;  %v4383_v30 = vld [vmem:[%s5980_s15] sm:$0xff]  }
0x10a4   : > { %v2955_v41 = vpop.f32.mrb[38].mxu0  ;;  %v4385_v52 = vld [vmem:[%s5980_s15 + $0x10] sm:$0xff]  }
0x10a5   : > { %v3839_v24 = vpop.f32.mrb[39].mxu0  ;;  %v2959_v49 = vsel %vm2958_vm2, %v2953_v3, 0.0  ;;  %v2969_v23 = vmul.f32 %v2953_v3, %v2953_v3  ;;  %v4386_v41 = vld [vmem:[%s5980_s15 + $0x18] sm:$0xff]  }
0x10a6   : > { %2960 = vadd.xlane.f32.xlu0 %v2959_v49 }
0x10a7   : > { %v2970_v36 = vsel %vm2958_vm2, %v2969_v23, 0.0 }
0x10a8   : > { %2971 = vadd.xlane.f32.xlu1 %v2970_v36 }
0x1133   : > { %v2961_v39 = vpop.xlane.xlu0 %2960 }
0x1134   : > { %v2962_v12 = vrot.slane %v2961_v39, 4 }
0x1135   : > { %v2972_v19 = vpop.xlane.xlu1 %2971 }
0x1136   : > { %v2963_v34 = vadd.f32 %v2962_v12, %v2961_v39  ;;  %v2973_v11 = vrot.slane %v2972_v19, 4 }
0x1138   : > { %v2964_v7 = vrot.slane %v2963_v34, 2  ;;  %v2974_v5 = vadd.f32 %v2973_v11, %v2972_v19 }
0x113a   : > { %v2975_v8 = vrot.slane %v2974_v5, 2  ;;  %v2965_v37 = vadd.f32 %v2964_v7, %v2963_v34 }
0x113c   : > { %v2966_v47 = vrot.slane %v2965_v37, 1  ;;  %v2976_v45 = vadd.f32 %v2975_v8, %v2974_v5 }
0x113e   : > { %v2967_v22 = vadd.f32 %v2966_v47, %v2965_v37  ;;  %v2977_v50 = vrot.slane %v2976_v45, 1  ;;  %v3118_v37 = vld [vmem:[%s5981_s16] sm:$0x1] }
0x1140   : > { %4061 = vpush %v2967_v22  ;;  %v2978_v51 = vadd.f32 %v2977_v50, %v2976_v45 }
0x1142   : > { %4063 = vpush %v2978_v51 }
0x1171   : > { %s4062_s20 = spop %4061 }
0x1172   : > { %s2982_s23 = smul.f32 0.125, %s4062_s20 }
0x1173   : > { %s4064_s29 = spop %4063 }
0x1174   : > { %s2986_s2 = smul.f32 %s2982_s23, %s2982_s23  ;;  %v2988_v54 = vstv %s2982_s23 }
0x1175   : > { %s2985_s5 = smul.f32 0.125, %s4064_s29  ;;  %v2989_v61 = vsub.f32 %v2953_v3, %v2988_v54  ;;  %v4384_v3 = vld [vmem:[%s5980_s15 + $0x8] sm:$0xff]   ;;  %s3594_s29 = sshll.u32 %s4613_s1, 4 }
0x1177   : > { %s2987_s6 = ssub.f32 %s2985_s5, %s2986_s2 }
0x1179   : > { %s2990_s19 = sadd.f32 1e-05, %s2987_s6 }
0x117b   : > { %v2991_v13 = vstv %s2990_s19 }
0x117c   : > { %4399 = vrsqrt.f32 %v2991_v13 }
0x1186   : > { %v4400_v20 = vpop.eup %4399 }
0x1187   : > { %4065 = vpush %v4400_v20 }
0x11b8   : > { %s4066_s0 = spop %4065 }
0x11b9   : > { %v2994_v29 = vstv %s4066_s0  ;;  %s6118_s0 = sld [smem:[#allocation21_spill]] }
0x11ba   : > { %v2995_v16 = vmul.f32 %v2994_v29, %v2989_v61  ;;  %v4387_v61 = vld [vmem:[%s5982_s17] sm:$0xff]   ;;  %v4388_v29 = vld [vmem:[%s5982_s17 + $0x8] sm:$0xff]  }
0x11bb   : > { %3859 = vmatpush3.bf16.msra.mxu0 %v4387_v61 }
0x11bc   : > { %v2996_v46 = vmax.f32 %v2995_v16, 0.0  ;;  %3860 = vmatprep.subr.bf16.mxu0 %v4480_v42 }
0x11be   : > { %2997 = vst.msk [vmem:[#allocation3] sm:$0xff] %vm2958_vm2, %v2996_v46 }
0x11bf   : > { %3861 = vmatpush3.bf16.msra.mxu0 %v4388_v29  ;;  %s6119_s7 = smov %s6118_s0  ;;  %s5923_s21 = scalar_lea.hbm %s6118_s0, %s3594_s29 }
0x11c5   : > { %v2998_v2 = vld [vmem:[#allocation3] sm:$0xff] }
0x11c6   : > { %v3004_v40 = vrot.slane %v2998_v2, 2  ;;  %v3000_v9 = vrot.slane %v2998_v2, 1  ;;  %v3012_v27 = vrot.slane %v2998_v2, 4  ;;  %v3008_v38 = vrot.slane %v2998_v2, 3 }
0x11c7   : > { %v3020_v1 = vrot.slane %v2998_v2, 6  ;;  %v3016_v21 = vrot.slane %v2998_v2, 5  ;;  %v3024_v35 = vrot.slane %v2998_v2, 7 }
0x11c8   : > { %3005 = vrot.lane.b32.xlu1 %v3004_v40, %s4484_s26  ;;  %3001 = vrot.lane.b32.xlu0 %v3000_v9, %s4485_s4  ;;  %s4491_s4 = smov [#allocation4]  }
0x11cc   : > { %3013 = vrot.lane.b32.xlu1 %v3012_v27, %s4486_s25  ;;  %3009 = vrot.lane.b32.xlu0 %v3008_v38, %s4487_s27  ;;  %s4409_s25 = sshll.u32 %s4491_s4, 4  ;;  %s4410_s25 = int_to_ptr.vmem [resolvable:$false] %s4409_s25 }
0x11cd   : > { %s4411_s27 = scalar_lea.vmem %s4410_s25, 32 }
0x11d0   : > { %3021 = vrot.lane.b32.xlu1 %v3020_v1, %s4488_s28  ;;  %3017 = vrot.lane.b32.xlu0 %v3016_v21, %s4489_s22 }
0x11d4   : > { %3025 = vrot.lane.b32.xlu0 %v3024_v35, %s4490_s24  ;;  %s593_s24 = sand.u32 1, %s4459_s30  }
0x11d5   : > { %s594_s2 = scalar_lea.vmem [#allocation4], %s593_s24  ;;  %s3270_s1 = scalar_lea.sflag [#allocation5], %s593_s24 }
0x11d6   : > { %s3282_s5 = sshll.u32 %s594_s2, 4  ;;  %s5925_s5 = int_to_ptr.vmem [resolvable:$true] %s3282_s5 }
0x11d7   : > { %s4405_s26 = scalar_lea.vmem %s5925_s5, 16  ;;  %p4412_p0 = scmp.lt.s32.totalorder %s5925_s5, %s4410_s25 }
0x11d8   : > { %p4406_p11 = scmp.ne.s32.totalorder %s5925_s5, %s4405_s26  ;;  %p4413_p1 = scmp.lt.s32.totalorder %s4411_s27, %s4405_s26 }
0x11da   : > { %p4407_p12 = pnand %p4406_p11, %p4630_p5  ;;  %p4414_p2 = por %p4413_p1, %p4412_p0 }
0x11dc   : > { %p4408_p13 = pneg %p4407_p12 }
0x11de   : > { %p4415_p3 = pnand %p4414_p2, %p4408_p13 }
0x123a   : > { %v3006_v59 = vpop.permute.xlu1 %3005  ;;  %v3002_v55 = vpop.permute.xlu0 %3001 }
0x123b   : > { %v3028_v57 = vsel %vm2958_vm2, %v2998_v2, %v3002_v55 }
0x123c   : > { %v3030_v63 = vsel %vm3029_vm15, %v3028_v57, %v3006_v59 }
0x123e   : > { %v3014_v25 = vpop.permute.xlu1 %3013  ;;  %v3010_v48 = vpop.permute.xlu0 %3009 }
0x123f   : > { %v3032_v0 = vsel %vm3031_vm5, %v3030_v63, %v3010_v48 }
0x1240   : > { %v3033_v18 = vsel %vm6117_vm13, %v3032_v0, %v3014_v25 }
0x1242   : > { %v3018_v56 = vpop.permute.xlu0 %3017  ;;  %v3022_v26 = vpop.permute.xlu1 %3021 }
0x1243   : > { %v3035_v44 = vsel %vm3034_vm3, %v3033_v18, %v3018_v56 }
0x1244   : > { %v3037_v14 = vsel %vm3036_vm6, %v3035_v44, %v3022_v26 }
0x1246   : > { %v3026_v17 = vpop.permute.xlu0 %3025 }
0x1247   : > { %v3039_v58 = vsel %vm3038_vm14, %v3037_v14, %v3026_v17 }
0x1248   : > { %v3040_v4 = vpack.c.bf16 %v3039_v58, %v3039_v58 }
0x124a   : > { %3843 = vmatmul.mubr.msk.bf16.vlgmr.msra.gmra.mrb[24].mxu1 %vm3043_vm0, %v3040_v4 }
0x124b   : > { %3854 = vmatprep.mubr.msk.bf16.mxu1 %vm4483_vm7, %v4480_v42  ;;  %3847 = vmatpush3.bf16.msra.mxu1 %v4383_v30  ;;  %vm3143_vm7 = vcmask 523264  }
0x124c   : > { %3848 = vmatprep.subr.bf16.mxu1 %v4480_v42 }
0x124f   : > { %3849 = vmatpush3.bf16.msra.mxu1 %v4384_v3 }
0x1250   : > { %3850 = vmatprep.subr.bf16.mxu1 %v4480_v42 }
0x1253   : > { %3851 = vmatpush3.bf16.msra.mxu1 %v4385_v52 }
0x1254   : > { %3852 = vmatprep.subr.bf16.mxu1 %v4480_v42  ;;  %v3210_v42 = vld [vmem:[%s5983_s18] sm:$0x1] }
0x1257   : > { %3853 = vmatpush3.bf16.msra.mxu1 %v4386_v41 }
0x131d   : > { %v3085_v62 = vpop.f32.mrb[24].mxu1 }
0x131e   : > { %v3086_v28 = vadd.f32 %v3085_v62, %v3042_v10  ;;  %v3844_v31 = vpop.f32.mrb[25].mxu1 }
0x131f   : > { %v3088_v15 = vpop.f32.mrb[26].mxu1 }
0x1320   : > { %v3845_v43 = vpop.f32.mrb[27].mxu1  ;;  %v3092_v32 = vsel %vm3091_vm8, %v3086_v28, 0.0  ;;  %v3095_v33 = vmul.f32 %v3086_v28, %v3086_v28 }
0x1321   : > { %3093 = vadd.xlane.f32.xlu1 %v3092_v32 }
0x1322   : > { %v3096_v60 = vsel %vm3091_vm8, %v3095_v33, 0.0 }
0x1323   : > { %3097 = vadd.xlane.f32.xlu0 %v3096_v60 }
0x13ae   : > { %v3094_v24 = vpop.xlane.xlu1 %3093 }
0x13af   : > { %v3100_v49 = vmul.f32 0.015625, %v3094_v24 }
0x13b0   : > { %v3098_v23 = vpop.xlane.xlu0 %3097 }
0x13b1   : > { %v3102_v36 = vmul.f32 %v3100_v49, %v3100_v49  ;;  %v3101_v39 = vmul.f32 0.015625, %v3098_v23  ;;  %v3104_v34 = vsub.f32 %v3086_v28, %v3100_v49 }
0x13b3   : > { %v3103_v12 = vsub.f32 %v3101_v39, %v3102_v36 }
0x13b5   : > { %v3105_v19 = vadd.f32 1e-05, %v3103_v12 }
0x13b7   : > { %4401 = vrsqrt.f32 %v3105_v19 }
0x13c1   : > { %v4402_v11 = vpop.eup %4401 }
0x13c2   : > { %v3107_v7 = vmul.f32 %v4402_v11, %v3104_v34 }
0x13c4   : > { %v3108_v5 = vmax.f32 %v3107_v7, 0.0 }
0x13c6   : > { %v3109_v8 = vpack.c.bf16 %v3108_v5, %v3108_v5 }
0x13c8   : > { %3855 = vmatmul.mubr.msk.bf16.vlgmr.msra.gmra.mrb[28].mxu1 %vm3143_vm7, %v3109_v8 }
0x149b   : > { %v3181_v47 = vpop.f32.mrb[28].mxu1 }
0x149c   : > { %v3182_v45 = vadd.f32 %v3181_v47, %v3118_v37  ;;  %v3856_v22 = vpop.f32.mrb[29].mxu1 }
0x149d   : > { %v3184_v50 = vpop.f32.mrb[30].mxu1 }
0x149e   : > { %v3857_v51 = vpop.f32.mrb[31].mxu1  ;;  %v3188_v13 = vsel %vm3187_vm10, %v3182_v45, 0.0  ;;  %v3191_v20 = vmul.f32 %v3182_v45, %v3182_v45 }
0x149f   : > { %3189 = vadd.xlane.f32.xlu0 %v3188_v13 }
0x14a0   : > { %v3192_v54 = vsel %vm3187_vm10, %v3191_v20, 0.0 }
0x14a1   : > { %3193 = vadd.xlane.f32.xlu1 %v3192_v54 }
0x152c   : > { %v3190_v16 = vpop.xlane.xlu0 %3189 }
0x152d   : > { %v3196_v46 = vmul.f32 0.03125, %v3190_v16 }
0x152e   : > { %v3194_v2 = vpop.xlane.xlu1 %3193 }
0x152f   : > { %v3198_v40 = vmul.f32 %v3196_v46, %v3196_v46  ;;  %v3197_v9 = vmul.f32 0.03125, %v3194_v2  ;;  %v3200_v27 = vsub.f32 %v3182_v45, %v3196_v46 }
0x1531   : > { %v3199_v53 = vsub.f32 %v3197_v9, %v3198_v40 }
0x1533   : > { %v3201_v6 = vadd.f32 1e-05, %v3199_v53 }
0x1535   : > { %4403 = vrsqrt.f32 %v3201_v6 }
0x153f   : > { %v4404_v38 = vpop.eup %4403 }
0x1540   : > { %v3203_v1 = vmul.f32 %v4404_v38, %v3200_v27 }
0x1542   : > { %v3204_v21 = vmax.f32 %v3203_v1, 0.0 }
0x1544   : > { %v3205_v35 = vpack.c.bf16 %v3204_v21, %v3204_v21 }
0x1546   : > { %3863 = vmatmul.mubr.msk.bf16.vlgmr.msra.gmra.mrb[40].mxu0 %vm3223_vm12, %v3205_v35 }
0x1619   : > { %v3261_v59 = vpop.f32.mrb[40].mxu0 }
0x161a   : > { %v3262_v55 = vadd.f32 %v3261_v59, %v3210_v42  ;;  %v3864_v57 = vpop.f32.mrb[41].mxu0 }
0x161b   : > { %v3264_v25 = vpop.f32.mrb[42].mxu0 }
0x161c   : > { %v3865_v63 = vpop.f32.mrb[43].mxu0  ;;  %3268 = vst.msk [vmem:[%s594_s2] sm:$0x1] %vm3267_vm9, %v3262_v55 }
0x161d   : > { %4418 = shalt.err (!%p4415_p3)
}
0x161e   : > { %s4419_s28 = scalar_lea.hbm %s5923_s21, 16  ;;  %s4423_s20 = scalar_lea.hbm %s6119_s7, 32 }
0x161f   : > { %p4420_p4 = scmp.ne.s32.totalorder %s5923_s21, %s4419_s28  ;;  %p4424_p9 = scmp.lt.u32.totalorder %s5923_s21, %s6119_s7 }
0x1620   : > { %p4425_p10 = scmp.lt.u32.totalorder %s4423_s20, %s4419_s28  ;;  %p4427_p12 = scmp.lt.u32.totalorder %s4419_s28, %s5923_s21 }
0x1621   : > { %p4421_p7 = pnand %p4420_p4, %p4630_p5 }
0x1622   : > { %p4426_p11 = por %p4425_p10, %p4424_p9 }
0x1623   : > { %p4422_p8 = pneg %p4421_p7 }
0x1624   : > { %p4428_p13 = por %p4427_p12, %p4426_p11 }
0x1626   : > { %p4429_p0 = pnand %p4428_p13, %p4422_p8 }
0x1628   : > { %4432 = shalt.err (!%p4429_p0)
}
0x1629   : > { %4067 = dma.vmem_to_hbm [thread:$0]  (%p4630_p5), %s5925_s5, 16, %s5923_s21, %s3270_s1  }
0x162a PF: > { %s6120_s2 = sld [smem:[#allocation9_spill]]  ;;  %s6121_s6 = sld [smem:[#allocation7_spill]] }
0x1630   : > { %p4073_p1 = scmp.ge.s32.totalorder %s6120_s2, 2  ;;  %s3294_s0 = sand.u32 1, %s6121_s6  }
0x1631   : > { %s3295_s26 = scalar_lea.sflag [#allocation5], %s3294_s0 }
0x1632   : > { %p4070_p2 = pnand %p4073_p1, %p4634_p6 }
0x1634   : > { %4450 = dma.done.wait (!%p4070_p2), %s3295_s26, 16  }
0x1635   : > { %4452 = vsyncadd (!%p4070_p2), %s3295_s26, 4294967280  ;;  %s6123_s21 = sld [smem:[#allocation10_spill]]  ;;  %s6124_s4 = sld [smem:[#allocation8_spill]] }
0x1636   : > { %s6125_s20 = sld [smem:[#allocation11_spill]]  ;;  %s6126_s0 = smov %s4459_s30 }
0x163b   : > { %p29_p3 = scmp.ge.s32.totalorder %s6123_s21, 4   ;;  %s6127_s30 = smov %s6124_s4 }
0x163d   :  { %31 = sbr.rel (!%p29_p3) target bundleno = 13 (0xd), region = 131 }
0x1644   :  { %3299 = vsyncpa [#allocation5], 1 }
0x1645   :  { %3301 = vsyncpa [#allocation5 + $0x1], 1 }

</bundles_post_ra>
